<compile_context>
chip_gen: v6e
topology: v6e:2x2x1
jax: 0.10.0
libtpu: 0.0.40
codegen_flags: <defaults>
</compile_context>

<pallas_src>
import functools
import math
import numpy as np
import jax
import jax.numpy as jnp
from jax.experimental import pallas as pl
from jax.experimental.pallas import tpu as pltpu


# ----------------------------------------------------------------------------
# Pallas plumbing helpers
# ----------------------------------------------------------------------------

def _vmem_spec():
    return pl.BlockSpec(memory_space=pltpu.MemorySpace.VMEM)


def _pcall(kernel, n_in, out_shape):
    """Single-invocation pallas_call: whole (tiny) arrays resident in VMEM."""
    return pl.pallas_call(
        kernel,
        out_shape=out_shape,
        in_specs=[_vmem_spec() for _ in range(n_in)],
        out_specs=_vmem_spec(),
    )


# ----------------------------------------------------------------------------
# In-kernel math helpers (traced inside kernels)
# ----------------------------------------------------------------------------

def _layernorm(x, g, b):
    # nn.LayerNorm: biased variance, eps=1e-5; f32 math.
    mu = jnp.mean(x, axis=-1, keepdims=True)
    var = jnp.mean((x - mu) ** 2, axis=-1, keepdims=True)
    return (x - mu) * jax.lax.rsqrt(var + 1e-5) * g + b


def _heads_attention(q2, k2, v2, mask, B, Sq, Skv, H):
    """q2:(B*Sq,D) k2,v2:(B*Skv,D) f32; mask:(B,1|Sq,Skv) f32 or None.

    Per-head attention with static head slices (no XLA transposes); softmax in
    f32, matmul operands in bf16, denominator via EUP approx reciprocal.
    Returns the concatenated context of shape (B*Sq, D) in f32.
    """
    D = q2.shape[-1]
    hd = D // H
    inv_scale = 1.0 / math.sqrt(hd)
    q3 = q2.reshape(B, Sq, D)
    k3 = k2.reshape(B, Skv, D)
    v3 = v2.reshape(B, Skv, D)
    outs = []
    for h in range(H):                                 # static unroll, H small
        lo, hi = h * hd, (h + 1) * hd
        qh = q3[:, :, lo:hi].astype(jnp.bfloat16)
        kh = k3[:, :, lo:hi].astype(jnp.bfloat16)
        vh = v3[:, :, lo:hi].astype(jnp.bfloat16)
        energy = jnp.einsum("bqd,bkd->bqk", qh, kh,
                            preferred_element_type=jnp.float32) * inv_scale
        if mask is not None:
            # masked_fill_(mask == 0, -1e10); broadcast over the query dim.
            energy = jnp.where(mask == 0.0, -1e10, energy)
        emax = jnp.max(energy, axis=-1, keepdims=True)
        p = jnp.exp(energy - emax)
        inv_den = pl.reciprocal(jnp.sum(p, axis=-1, keepdims=True), approx=True)
        attn = (p * inv_den).astype(jnp.bfloat16)
        outs.append(jnp.einsum("bqk,bkd->bqd", attn, vh,
                               preferred_element_type=jnp.float32))
    ctx = jnp.concatenate(outs, axis=-1)               # (B, Sq, D)
    return ctx.reshape(B * Sq, D)


# ----------------------------------------------------------------------------
# Fused sub-layer kernels
# ----------------------------------------------------------------------------

def self_attn_sublayer_kernel(x_ref, g_ref, b_ref, wqkv_ref, bqkv_ref,
                              wo_ref, bo_ref, mask_ref, o_ref, *, H):
    # out = x + out_proj(attention(LN(x), LN(x), LN(x), mask))
    x = x_ref[...]                                     # (B, S, D) f32
    B, S, D = x.shape
    xn = _layernorm(x, g_ref[...], b_ref[...]).reshape(B * S, D)
    qkv = jnp.dot(xn.astype(jnp.bfloat16), wqkv_ref[...],
                  preferred_element_type=jnp.float32) + bqkv_ref[...]
    q2 = qkv[:, :D]
    k2 = qkv[:, D:2 * D]
    v2 = qkv[:, 2 * D:]
    ctx = _heads_attention(q2, k2, v2, mask_ref[...], B, S, S, H)
    y = jnp.dot(ctx.astype(jnp.bfloat16), wo_ref[...],
                preferred_element_type=jnp.float32) + bo_ref[...]
    o_ref[...] = x + y.reshape(B, S, D)


def _cross_attn_body(x_ref, kv_ref, g_ref, b_ref, wq_ref, bq_ref,
                     wkv_ref, bkv_ref, wo_ref, bo_ref, mask, o_ref, *, H):
    # out = x + out_proj(attention(LN(x), kv, kv, mask))   (kv is NOT normed)
    x = x_ref[...]                                     # (B, S, D) f32
    kv = kv_ref[...]                                   # (B, Skv, D) f32
    B, S, D = x.shape
    Skv = kv.shape[1]
    xn = _layernorm(x, g_ref[...], b_ref[...]).reshape(B * S, D)
    q2 = jnp.dot(xn.astype(jnp.bfloat16), wq_ref[...],
                 preferred_element_type=jnp.float32) + bq_ref[...]
    kvp = jnp.dot(kv.reshape(B * Skv, D).astype(jnp.bfloat16), wkv_ref[...],
                  preferred_element_type=jnp.float32) + bkv_ref[...]
    k2 = kvp[:, :D]
    v2 = kvp[:, D:]
    ctx = _heads_attention(q2, k2, v2, mask, B, S, Skv, H)
    y = jnp.dot(ctx.astype(jnp.bfloat16), wo_ref[...],
                preferred_element_type=jnp.float32) + bo_ref[...]
    o_ref[...] = x + y.reshape(B, S, D)


def cross_attn_masked_kernel(x_ref, kv_ref, g_ref, b_ref, wq_ref, bq_ref,
                             wkv_ref, bkv_ref, wo_ref, bo_ref, mask_ref,
                             o_ref, *, H):
    _cross_attn_body(x_ref, kv_ref, g_ref, b_ref, wq_ref, bq_ref,
                     wkv_ref, bkv_ref, wo_ref, bo_ref, mask_ref[...], o_ref, H=H)


def cross_attn_nomask_kernel(x_ref, kv_ref, g_ref, b_ref, wq_ref, bq_ref,
                             wkv_ref, bkv_ref, wo_ref, bo_ref, o_ref, *, H):
    _cross_attn_body(x_ref, kv_ref, g_ref, b_ref, wq_ref, bq_ref,
                     wkv_ref, bkv_ref, wo_ref, bo_ref, None, o_ref, H=H)


def ffn_sublayer_kernel(x_ref, g_ref, b_ref, w1_ref, b1_ref, w2_ref, b2_ref,
                        o_ref):
    # out = x + fc2(relu(fc1(LN(x))))
    x = x_ref[...]                                     # (B, S, D) f32
    B, S, D = x.shape
    xn = _layernorm(x, g_ref[...], b_ref[...]).reshape(B * S, D)
    h = jnp.dot(xn.astype(jnp.bfloat16), w1_ref[...],
                preferred_element_type=jnp.float32) + b1_ref[...]
    h = jnp.maximum(h, 0.0)
    y = jnp.dot(h.astype(jnp.bfloat16), w2_ref[...],
                preferred_element_type=jnp.float32) + b2_ref[...]
    o_ref[...] = x + y.reshape(B, S, D)


def norm_std_kernel(x_ref, a_ref, b_ref, o_ref):
    # custom Norm: alpha * (x - mean) / (std + eps) + bias
    # torch.std is unbiased (divides by D-1); eps = 1e-6
    x = x_ref[...]
    D = x.shape[-1]
    mu = jnp.mean(x, axis=-1, keepdims=True)
    var = jnp.sum((x - mu) ** 2, axis=-1, keepdims=True) / (D - 1)
    std = jnp.sqrt(var)
    o_ref[...] = a_ref[...] * (x - mu) / (std + 1e-6) + b_ref[...]


def generator_kernel(x_ref, w1_ref, b1_ref, w2_ref, b2_ref, o_ref, *, vocab):
    # log_softmax(linear2(relu(linear(x))))  with lane-padded vocab axis.
    x = x_ref[...]                                     # (B, L, D) f32
    B, L, D = x.shape
    x2 = x.reshape(B * L, D)
    h = jnp.dot(x2.astype(jnp.bfloat16), w1_ref[...],
                preferred_element_type=jnp.float32) + b1_ref[...]
    h = jnp.maximum(h, 0.0)
    logits = jnp.dot(h.astype(jnp.bfloat16), w2_ref[...],
                     preferred_element_type=jnp.float32) + b2_ref[...]
    Vp = logits.shape[-1]
    if Vp != vocab:
        col = jax.lax.broadcasted_iota(jnp.int32, logits.shape, 1)
        logits = jnp.where(col < vocab, logits, -1e30)   # kill padded columns
    m = jnp.max(logits, axis=-1, keepdims=True)
    z = logits - m
    lse = jnp.log(jnp.sum(jnp.exp(z), axis=-1, keepdims=True))
    o_ref[...] = (z - lse).reshape(B, L, Vp)


# ----------------------------------------------------------------------------
# Module wrappers (plain-JAX glue around the fused kernels)
# ----------------------------------------------------------------------------

def self_attn_sublayer(ln, ap, x, mask, H):
    B, S, D = x.shape
    kern = functools.partial(self_attn_sublayer_kernel, H=H)
    return _pcall(kern, 8, jax.ShapeDtypeStruct((B, S, D), jnp.float32))(
        x, ln["g"], ln["b"], ap["wqkv"], ap["bqkv"], ap["wo"], ap["bo"], mask)


def cross_attn_sublayer(ln, ap, x, kv, mask, H):
    B, S, D = x.shape
    args = [x, kv, ln["g"], ln["b"], ap["wq"], ap["bq"],
            ap["wkv"], ap["bkv"], ap["wo"], ap["bo"]]
    if mask is not None:
        kern = functools.partial(cross_attn_masked_kernel, H=H)
        args.append(mask)
    else:
        kern = functools.partial(cross_attn_nomask_kernel, H=H)
    return _pcall(kern, len(args),
                  jax.ShapeDtypeStruct((B, S, D), jnp.float32))(*args)


def ffn_sublayer(ln, fp, x):
    B, S, D = x.shape
    return _pcall(ffn_sublayer_kernel, 7,
                  jax.ShapeDtypeStruct((B, S, D), jnp.float32))(
        x, ln["g"], ln["b"], fp["w1"], fp["b1"], fp["w2"], fp["b2"])


def custom_norm(p, x):
    return _pcall(norm_std_kernel, 3,
                  jax.ShapeDtypeStruct(x.shape, jnp.float32))(
        x, p["alpha"], p["bias"])


def generator(p, x, vocab):
    B, L, D = x.shape
    Vp = p["w1"].shape[1]
    kern = functools.partial(generator_kernel, vocab=vocab)
    out = _pcall(kern, 5, jax.ShapeDtypeStruct((B, L, Vp), jnp.float32))(
        x, p["w1"], p["b1"], p["w2"], p["b2"])
    return out[:, :, :vocab]


def encoder_pure(p, src, src_mask, H):
    x = src + p["pos_enc"][None, :src.shape[1], :]
    for lp in p["layers"]:
        x = self_attn_sublayer(lp["ln1"], lp["self_attn"], x, src_mask, H)
        x = ffn_sublayer(lp["ln2"], lp["ffn"], x)
    return custom_norm(p["norm"], x)


def encoder_cross(p, src1, src2, src1_mask, H):
    # Matches Encoder(flag='cross'): layer(x_flow=x, x_rgb=src2, src_mask)
    x = src1 + p["pos_enc"][None, :src1.shape[1], :]
    for lp in p["layers"]:
        x_flow = x       # accumulating stream: K/V source of the cross attention
        y = self_attn_sublayer(lp["ln1"], lp["self_attn"], src2, src1_mask, H)
        y = cross_attn_sublayer(lp["ln2"], lp["cross_attn"], y, x_flow, None, H)
        y = ffn_sublayer(lp["ln3"], lp["ffn"], y)
        x = y
    return custom_norm(p["norm"], x)


def decoder(p, trg, memory, trg_mask, src_mask, H):
    d_model = p["embed"].shape[1]
    x = jnp.take(p["embed"], trg, axis=0) * np.sqrt(d_model)    # Embedder
    x = x + p["pos_enc"][None, :trg.shape[1], :]
    for lp in p["layers"]:
        x = self_attn_sublayer(lp["ln1"], lp["self_attn"], x, trg_mask, H)
        x = cross_attn_sublayer(lp["ln2"], lp["enc_attn"], x, memory, src_mask, H)
        x = ffn_sublayer(lp["ln3"], lp["ffn"], x)
    return custom_norm(p["norm"], x)


@functools.partial(jax.jit, static_argnames=("H", "vocab"))
def tevc_forward(params, src_rgb, src_flow, trg,
                 src_rgb_mask, src_flow_mask, trg_mask, *, H, vocab):
    memory_flow = encoder_pure(params["pure_encoder"], src_flow, src_flow_mask, H)
    memory_cross = encoder_cross(params["cross_encoder"], src_rgb, memory_flow,
                                 src_rgb_mask, H)
    out_decoder = decoder(params["decoder"], trg, memory_cross, trg_mask,
                          src_rgb_mask, H)
    return generator(params["generator"], out_decoder, vocab)


# ----------------------------------------------------------------------------
# Deterministic parameter initialization (synthetic; mirrors xavier_uniform)
# ----------------------------------------------------------------------------

def make_pos_enc(seq_len, d_model):
    pos_enc = np.zeros((seq_len, d_model), dtype=np.float64)
    odds = np.arange(0, d_model, 2)
    evens = np.arange(1, d_model, 2)
    for pos in range(seq_len):
        pos_enc[pos, odds] = np.sin(pos / 10000 ** (odds / d_model))
        pos_enc[pos, evens] = np.cos(pos / 10000 ** (evens / d_model))
    return jnp.asarray(pos_enc, dtype=jnp.float32)


def init_params(key, *, d_model, H, N, d_ff, vocab, seq_len):
    keys = iter(jax.random.split(key, 512))

    def nxt():
        return next(keys)

    def xavier(shape):
        fan_in, fan_out = shape[0], shape[1]
        a = float(np.sqrt(6.0 / (fan_in + fan_out)))
        return jax.random.uniform(nxt(), shape, jnp.float32, -a, a)

    def zeros(n):
        return jnp.zeros((1, n), jnp.float32)

    def ones(n):
        return jnp.ones((1, n), jnp.float32)

    def mha_self_p():
        wq, wk, wv = xavier((d_model, d_model)), xavier((d_model, d_model)), \
            xavier((d_model, d_model))
        wo = xavier((d_model, d_model))
        return {"wqkv": jnp.concatenate([wq, wk, wv], axis=1).astype(jnp.bfloat16),
                "bqkv": zeros(3 * d_model),
                "wo": wo.astype(jnp.bfloat16), "bo": zeros(d_model)}

    def mha_cross_p():
        wq, wk, wv = xavier((d_model, d_model)), xavier((d_model, d_model)), \
            xavier((d_model, d_model))
        wo = xavier((d_model, d_model))
        return {"wq": wq.astype(jnp.bfloat16), "bq": zeros(d_model),
                "wkv": jnp.concatenate([wk, wv], axis=1).astype(jnp.bfloat16),
                "bkv": zeros(2 * d_model),
                "wo": wo.astype(jnp.bfloat16), "bo": zeros(d_model)}

    def ln_p():
        return {"g": ones(d_model), "b": zeros(d_model)}

    def ffn_p():
        return {"w1": xavier((d_model, d_ff)).astype(jnp.bfloat16),
                "b1": zeros(d_ff),
                "w2": xavier((d_ff, d_model)).astype(jnp.bfloat16),
                "b2": zeros(d_model)}

    def norm_p():
        return {"alpha": ones(d_model), "bias": zeros(d_model)}

    pos_enc = make_pos_enc(seq_len, d_model)

    pure_layers = [{"ln1": ln_p(), "ln2": ln_p(),
                    "self_attn": mha_self_p(), "ffn": ffn_p()} for _ in range(N)]
    cross_layers = [{"ln1": ln_p(), "ln2": ln_p(), "ln3": ln_p(),
                     "self_attn": mha_self_p(), "cross_attn": mha_cross_p(),
                     "ffn": ffn_p()} for _ in range(N)]
    dec_layers = [{"ln1": ln_p(), "ln2": ln_p(), "ln3": ln_p(),
                   "self_attn": mha_self_p(), "enc_attn": mha_cross_p(),
                   "ffn": ffn_p()} for _ in range(N)]

    # Generator: pad vocab axis to a multiple of 128 lanes (zero-padded weights
    # / biases; padded logit columns are masked to -inf inside the kernel).
    Vp = ((vocab + 127) // 128) * 128
    gw1 = jnp.pad(xavier((d_model, vocab)), ((0, 0), (0, Vp - vocab)))
    gw2 = jnp.pad(xavier((vocab, vocab)), ((0, Vp - vocab), (0, Vp - vocab)))

    return {
        "pure_encoder": {"pos_enc": pos_enc, "layers": pure_layers, "norm": norm_p()},
        "cross_encoder": {"pos_enc": pos_enc, "layers": cross_layers, "norm": norm_p()},
        "decoder": {"pos_enc": pos_enc, "embed": xavier((vocab, d_model)),
                    "layers": dec_layers, "norm": norm_p()},
        "generator": {"w1": gw1.astype(jnp.bfloat16), "b1": zeros(Vp),
                      "w2": gw2.astype(jnp.bfloat16), "b2": zeros(Vp)},
    }


# ----------------------------------------------------------------------------
# Demo
# ----------------------------------------------------------------------------

if __name__ == "__main__":
    B, S, T = 2, 8, 8
    d_model, H, N_layers, d_ff, vocab = 32, 4, 2, 64, 64
    pad_idx = 0

    root = jax.random.PRNGKey(0)
    k_param, k_rgb, k_flow, k_trg = jax.random.split(root, 4)

    params = init_params(k_param, d_model=d_model, H=H, N=N_layers,
                         d_ff=d_ff, vocab=vocab, seq_len=S)

    src_rgb = jax.random.normal(k_rgb, (B, S, d_model), jnp.float32)
    src_flow = jax.random.normal(k_flow, (B, S, d_model), jnp.float32)
    trg_body = jax.random.randint(k_trg, (B, T - 2), 1, vocab, dtype=jnp.int32)
    trg = jnp.concatenate([trg_body, jnp.full((B, 2), pad_idx, jnp.int32)], axis=1)

    # masks, following mask()/subsequent_mask() semantics
    src_rgb_mask = jnp.ones((B, 1, S), jnp.float32)
    src_flow_mask = jnp.ones((B, 1, S), jnp.float32)
    causal = jnp.tril(jnp.ones((1, T, T), jnp.float32))
    trg_pad = (trg != pad_idx).astype(jnp.float32)[:, None, :]   # (B,1,T)
    trg_mask = trg_pad * causal                                  # (B,T,T)

    out = tevc_forward(params, src_rgb, src_flow, trg,
                       src_rgb_mask, src_flow_mask, trg_mask,
                       H=H, vocab=vocab)
    out = jax.block_until_ready(out)
    assert out.shape == (B, T, vocab)
    assert bool(jnp.all(jnp.isfinite(out)))
    # TODO(synk): dropout layers are identity (inference); embedding gather and
    # positional-encoding add remain plain-JAX glue.
    print("KERNEL_OK")
</pallas_src>

<mosaic_0001>
module attributes {stable_mosaic.version = 11 : i64} {
  func.func @norm_std_kernel(%arg0: memref<2x8x32xf32, #tpu.memory_space<vmem>>, %arg1: memref<1x32xf32, #tpu.memory_space<vmem>>, %arg2: memref<1x32xf32, #tpu.memory_space<vmem>>, %arg3: memref<2x8x32xf32, #tpu.memory_space<vmem>>) attributes {dimension_semantics = [], scalar_prefetch = 0 : i64, scratch_operands = 0 : i64, tpu.core_type = #tpu.core_type<tc>} {
    %c0 = arith.constant 0 : index
    %c0_0 = arith.constant 0 : index
    %c0_1 = arith.constant 0 : index
    %0 = vector.load %arg0[%c0, %c0_0, %c0_1] : memref<2x8x32xf32, #tpu.memory_space<vmem>>, vector<2x8x32xf32>
    %cst = arith.constant dense<0.000000e+00> : vector<2x8xf32>
    %1 = vector.multi_reduction <add>, %0, %cst [2] : vector<2x8x32xf32> to vector<2x8xf32>
    %2 = vector.shape_cast %1 : vector<2x8xf32> to vector<2x8x1xf32>
    %cst_2 = arith.constant 3.200000e+01 : f32
    %3 = vector.broadcast %cst_2 : f32 to vector<2x8x1xf32>
    %4 = arith.divf %2, %3 : vector<2x8x1xf32>
    %5 = vector.broadcast %4 : vector<2x8x1xf32> to vector<2x8x32xf32>
    %6 = arith.subf %0, %5 : vector<2x8x32xf32>
    %7 = arith.mulf %6, %6 : vector<2x8x32xf32>
    %cst_3 = arith.constant dense<0.000000e+00> : vector<2x8xf32>
    %8 = vector.multi_reduction <add>, %7, %cst_3 [2] : vector<2x8x32xf32> to vector<2x8xf32>
    %9 = vector.shape_cast %8 : vector<2x8xf32> to vector<2x8x1xf32>
    %cst_4 = arith.constant 3.100000e+01 : f32
    %10 = vector.broadcast %cst_4 : f32 to vector<2x8x1xf32>
    %11 = arith.divf %9, %10 : vector<2x8x1xf32>
    %12 = math.sqrt %11 : vector<2x8x1xf32>
    %c0_5 = arith.constant 0 : index
    %c0_6 = arith.constant 0 : index
    %13 = vector.load %arg1[%c0_5, %c0_6] : memref<1x32xf32, #tpu.memory_space<vmem>>, vector<1x32xf32>
    %14 = vector.broadcast %4 : vector<2x8x1xf32> to vector<2x8x32xf32>
    %15 = arith.subf %0, %14 : vector<2x8x32xf32>
    %16 = vector.shape_cast %13 : vector<1x32xf32> to vector<1x1x32xf32>
    %17 = vector.broadcast %16 : vector<1x1x32xf32> to vector<2x8x32xf32>
    %18 = arith.mulf %17, %15 : vector<2x8x32xf32>
    %cst_7 = arith.constant 9.99999997E-7 : f32
    %19 = vector.broadcast %cst_7 : f32 to vector<2x8x1xf32>
    %20 = arith.addf %12, %19 : vector<2x8x1xf32>
    %21 = vector.broadcast %20 : vector<2x8x1xf32> to vector<2x8x32xf32>
    %22 = arith.divf %18, %21 : vector<2x8x32xf32>
    %c0_8 = arith.constant 0 : index
    %c0_9 = arith.constant 0 : index
    %23 = vector.load %arg2[%c0_8, %c0_9] : memref<1x32xf32, #tpu.memory_space<vmem>>, vector<1x32xf32>
    %24 = vector.shape_cast %23 : vector<1x32xf32> to vector<1x1x32xf32>
    %25 = vector.broadcast %24 : vector<1x1x32xf32> to vector<2x8x32xf32>
    %26 = arith.addf %22, %25 : vector<2x8x32xf32>
    %c0_10 = arith.constant 0 : index
    %c0_11 = arith.constant 0 : index
    %c0_12 = arith.constant 0 : index
    %27 = vector.load %arg3[%c0_10, %c0_11, %c0_12] : memref<2x8x32xf32, #tpu.memory_space<vmem>>, vector<2x8x32xf32>
    tpu.vector_store %arg3[%c0_10, %c0_11, %c0_12], %26 {strides = array<i32>} : memref<2x8x32xf32, #tpu.memory_space<vmem>>, vector<2x8x32xf32>,
    return
  }
}

module attributes {stable_mosaic.version = 11 : i64} {
  func.func @ffn_sublayer_kernel(%arg0: memref<2x8x32xf32, #tpu.memory_space<vmem>>, %arg1: memref<1x32xf32, #tpu.memory_space<vmem>>, %arg2: memref<1x32xf32, #tpu.memory_space<vmem>>, %arg3: memref<32x64xbf16, #tpu.memory_space<vmem>>, %arg4: memref<1x64xf32, #tpu.memory_space<vmem>>, %arg5: memref<64x32xbf16, #tpu.memory_space<vmem>>, %arg6: memref<1x32xf32, #tpu.memory_space<vmem>>, %arg7: memref<2x8x32xf32, #tpu.memory_space<vmem>>) attributes {dimension_semantics = [], scalar_prefetch = 0 : i64, scratch_operands = 0 : i64, tpu.core_type = #tpu.core_type<tc>} {
    %c0 = arith.constant 0 : index
    %c0_0 = arith.constant 0 : index
    %c0_1 = arith.constant 0 : index
    %0 = vector.load %arg0[%c0, %c0_0, %c0_1] : memref<2x8x32xf32, #tpu.memory_space<vmem>>, vector<2x8x32xf32>
    %c0_2 = arith.constant 0 : index
    %c0_3 = arith.constant 0 : index
    %1 = vector.load %arg1[%c0_2, %c0_3] : memref<1x32xf32, #tpu.memory_space<vmem>>, vector<1x32xf32>
    %c0_4 = arith.constant 0 : index
    %c0_5 = arith.constant 0 : index
    %2 = vector.load %arg2[%c0_4, %c0_5] : memref<1x32xf32, #tpu.memory_space<vmem>>, vector<1x32xf32>
    %cst = arith.constant dense<0.000000e+00> : vector<2x8xf32>
    %3 = vector.multi_reduction <add>, %0, %cst [2] : vector<2x8x32xf32> to vector<2x8xf32>
    %4 = vector.shape_cast %3 : vector<2x8xf32> to vector<2x8x1xf32>
    %cst_6 = arith.constant 3.200000e+01 : f32
    %5 = vector.broadcast %cst_6 : f32 to vector<2x8x1xf32>
    %6 = arith.divf %4, %5 : vector<2x8x1xf32>
    %7 = vector.broadcast %6 : vector<2x8x1xf32> to vector<2x8x32xf32>
    %8 = arith.subf %0, %7 : vector<2x8x32xf32>
    %9 = arith.mulf %8, %8 : vector<2x8x32xf32>
    %cst_7 = arith.constant dense<0.000000e+00> : vector<2x8xf32>
    %10 = vector.multi_reduction <add>, %9, %cst_7 [2] : vector<2x8x32xf32> to vector<2x8xf32>
    %11 = vector.shape_cast %10 : vector<2x8xf32> to vector<2x8x1xf32>
    %cst_8 = arith.constant 3.200000e+01 : f32
    %12 = vector.broadcast %cst_8 : f32 to vector<2x8x1xf32>
    %13 = arith.divf %11, %12 : vector<2x8x1xf32>
    %14 = vector.broadcast %6 : vector<2x8x1xf32> to vector<2x8x32xf32>
    %15 = arith.subf %0, %14 : vector<2x8x32xf32>
    %cst_9 = arith.constant 9.99999974E-6 : f32
    %16 = vector.broadcast %cst_9 : f32 to vector<2x8x1xf32>
    %17 = arith.addf %13, %16 : vector<2x8x1xf32>
    %18 = math.rsqrt %17 : vector<2x8x1xf32>
    %19 = vector.broadcast %18 : vector<2x8x1xf32> to vector<2x8x32xf32>
    %20 = arith.mulf %15, %19 : vector<2x8x32xf32>
    %21 = vector.shape_cast %1 : vector<1x32xf32> to vector<1x1x32xf32>
    %22 = vector.broadcast %21 : vector<1x1x32xf32> to vector<2x8x32xf32>
    %23 = arith.mulf %20, %22 : vector<2x8x32xf32>
    %24 = vector.shape_cast %2 : vector<1x32xf32> to vector<1x1x32xf32>
    %25 = vector.broadcast %24 : vector<1x1x32xf32> to vector<2x8x32xf32>
    %26 = arith.addf %23, %25 : vector<2x8x32xf32>
    %27 = vector.shape_cast %26 : vector<2x8x32xf32> to vector<16x32xf32>
    %28 = arith.truncf %27 : vector<16x32xf32> to vector<16x32xbf16>
    %c0_10 = arith.constant 0 : index
    %c0_11 = arith.constant 0 : index
    %29 = vector.load %arg3[%c0_10, %c0_11] : memref<32x64xbf16, #tpu.memory_space<vmem>>, vector<32x64xbf16>
    %cst_12 = arith.constant dense<0.000000e+00> : vector<16x64xf32>
    %30 = tpu.matmul %28, %29, %cst_12 {dimension_numbers = #tpu.dot_dimension_numbers<[1], [0], [0], [1], [0, 0, 1, 1], [], []>} : vector<16x32xbf16>, vector<32x64xbf16>, vector<16x64xf32> -> vector<16x64xf32>
    %c0_13 = arith.constant 0 : index
    %c0_14 = arith.constant 0 : index
    %31 = vector.load %arg4[%c0_13, %c0_14] : memref<1x64xf32, #tpu.memory_space<vmem>>, vector<1x64xf32>
    %32 = vector.broadcast %31 : vector<1x64xf32> to vector<16x64xf32>
    %33 = arith.addf %30, %32 : vector<16x64xf32>
    %cst_15 = arith.constant 0.000000e+00 : f32
    %34 = vector.broadcast %cst_15 : f32 to vector<16x64xf32>
    %35 = arith.maximumf %33, %34 : vector<16x64xf32>
    %36 = arith.truncf %35 : vector<16x64xf32> to vector<16x64xbf16>
    %c0_16 = arith.constant 0 : index
    %c0_17 = arith.constant 0 : index
    %37 = vector.load %arg5[%c0_16, %c0_17] : memref<64x32xbf16, #tpu.memory_space<vmem>>, vector<64x32xbf16>
    %cst_18 = arith.constant dense<0.000000e+00> : vector<16x32xf32>
    %38 = tpu.matmul %36, %37, %cst_18 {dimension_numbers = #tpu.dot_dimension_numbers<[1], [0], [0], [1], [0, 0, 1, 1], [], []>} : vector<16x64xbf16>, vector<64x32xbf16>, vector<16x32xf32> -> vector<16x32xf32>
    %c0_19 = arith.constant 0 : index
    %c0_20 = arith.constant 0 : index
    %39 = vector.load %arg6[%c0_19, %c0_20] : memref<1x32xf32, #tpu.memory_space<vmem>>, vector<1x32xf32>
    %40 = vector.broadcast %39 : vector<1x32xf32> to vector<16x32xf32>
    %41 = arith.addf %38, %40 : vector<16x32xf32>
    %42 = vector.shape_cast %41 : vector<16x32xf32> to vector<2x8x32xf32>
    %43 = arith.addf %0, %42 : vector<2x8x32xf32>
    %c0_21 = arith.constant 0 : index
    %c0_22 = arith.constant 0 : index
    %c0_23 = arith.constant 0 : index
    %44 = vector.load %arg7[%c0_21, %c0_22, %c0_23] : memref<2x8x32xf32, #tpu.memory_space<vmem>>, vector<2x8x32xf32>
    tpu.vector_store %arg7[%c0_21, %c0_22, %c0_23], %43 {strides = array<i32>} : memref<2x8x32xf32, #tpu.memory_space<vmem>>, vector<2x8x32xf32>,
    return
  }
}

module attributes {stable_mosaic.version = 11 : i64} {
  func.func @self_attn_sublayer_kernel(%arg0: memref<2x8x32xf32, #tpu.memory_space<vmem>>, %arg1: memref<1x32xf32, #tpu.memory_space<vmem>>, %arg2: memref<1x32xf32, #tpu.memory_space<vmem>>, %arg3: memref<32x96xbf16, #tpu.memory_space<vmem>>, %arg4: memref<1x96xf32, #tpu.memory_space<vmem>>, %arg5: memref<32x32xbf16, #tpu.memory_space<vmem>>, %arg6: memref<1x32xf32, #tpu.memory_space<vmem>>, %arg7: memref<2x8x8xf32, #tpu.memory_space<vmem>>, %arg8: memref<2x8x32xf32, #tpu.memory_space<vmem>>) attributes {dimension_semantics = [], scalar_prefetch = 0 : i64, scratch_operands = 0 : i64, tpu.core_type = #tpu.core_type<tc>} {
    %c0 = arith.constant 0 : index
    %c0_0 = arith.constant 0 : index
    %c0_1 = arith.constant 0 : index
    %0 = vector.load %arg0[%c0, %c0_0, %c0_1] : memref<2x8x32xf32, #tpu.memory_space<vmem>>, vector<2x8x32xf32>
    %c0_2 = arith.constant 0 : index
    %c0_3 = arith.constant 0 : index
    %1 = vector.load %arg1[%c0_2, %c0_3] : memref<1x32xf32, #tpu.memory_space<vmem>>, vector<1x32xf32>
    %c0_4 = arith.constant 0 : index
    %c0_5 = arith.constant 0 : index
    %2 = vector.load %arg2[%c0_4, %c0_5] : memref<1x32xf32, #tpu.memory_space<vmem>>, vector<1x32xf32>
    %cst = arith.constant dense<0.000000e+00> : vector<2x8xf32>
    %3 = vector.multi_reduction <add>, %0, %cst [2] : vector<2x8x32xf32> to vector<2x8xf32>
    %4 = vector.shape_cast %3 : vector<2x8xf32> to vector<2x8x1xf32>
    %cst_6 = arith.constant 3.200000e+01 : f32
    %5 = vector.broadcast %cst_6 : f32 to vector<2x8x1xf32>
    %6 = arith.divf %4, %5 : vector<2x8x1xf32>
    %7 = vector.broadcast %6 : vector<2x8x1xf32> to vector<2x8x32xf32>
    %8 = arith.subf %0, %7 : vector<2x8x32xf32>
    %9 = arith.mulf %8, %8 : vector<2x8x32xf32>
    %cst_7 = arith.constant dense<0.000000e+00> : vector<2x8xf32>
    %10 = vector.multi_reduction <add>, %9, %cst_7 [2] : vector<2x8x32xf32> to vector<2x8xf32>
    %11 = vector.shape_cast %10 : vector<2x8xf32> to vector<2x8x1xf32>
    %cst_8 = arith.constant 3.200000e+01 : f32
    %12 = vector.broadcast %cst_8 : f32 to vector<2x8x1xf32>
    %13 = arith.divf %11, %12 : vector<2x8x1xf32>
    %14 = vector.broadcast %6 : vector<2x8x1xf32> to vector<2x8x32xf32>
    %15 = arith.subf %0, %14 : vector<2x8x32xf32>
    %cst_9 = arith.constant 9.99999974E-6 : f32
    %16 = vector.broadcast %cst_9 : f32 to vector<2x8x1xf32>
    %17 = arith.addf %13, %16 : vector<2x8x1xf32>
    %18 = math.rsqrt %17 : vector<2x8x1xf32>
    %19 = vector.broadcast %18 : vector<2x8x1xf32> to vector<2x8x32xf32>
    %20 = arith.mulf %15, %19 : vector<2x8x32xf32>
    %21 = vector.shape_cast %1 : vector<1x32xf32> to vector<1x1x32xf32>
    %22 = vector.broadcast %21 : vector<1x1x32xf32> to vector<2x8x32xf32>
    %23 = arith.mulf %20, %22 : vector<2x8x32xf32>
    %24 = vector.shape_cast %2 : vector<1x32xf32> to vector<1x1x32xf32>
    %25 = vector.broadcast %24 : vector<1x1x32xf32> to vector<2x8x32xf32>
    %26 = arith.addf %23, %25 : vector<2x8x32xf32>
    %27 = vector.shape_cast %26 : vector<2x8x32xf32> to vector<16x32xf32>
    %28 = arith.truncf %27 : vector<16x32xf32> to vector<16x32xbf16>
    %c0_10 = arith.constant 0 : index
    %c0_11 = arith.constant 0 : index
    %29 = vector.load %arg3[%c0_10, %c0_11] : memref<32x96xbf16, #tpu.memory_space<vmem>>, vector<32x96xbf16>
    %cst_12 = arith.constant dense<0.000000e+00> : vector<16x96xf32>
    %30 = tpu.matmul %28, %29, %cst_12 {dimension_numbers = #tpu.dot_dimension_numbers<[1], [0], [0], [1], [0, 0, 1, 1], [], []>} : vector<16x32xbf16>, vector<32x96xbf16>, vector<16x96xf32> -> vector<16x96xf32>
    %c0_13 = arith.constant 0 : index
    %c0_14 = arith.constant 0 : index
    %31 = vector.load %arg4[%c0_13, %c0_14] : memref<1x96xf32, #tpu.memory_space<vmem>>, vector<1x96xf32>
    %32 = vector.broadcast %31 : vector<1x96xf32> to vector<16x96xf32>
    %33 = arith.addf %30, %32 : vector<16x96xf32>
    %34 = vector.extract_strided_slice %33 {offsets = [0, 0], sizes = [16, 32], strides = [1, 1]} : vector<16x96xf32> to vector<16x32xf32>
    %35 = vector.extract_strided_slice %33 {offsets = [0, 32], sizes = [16, 32], strides = [1, 1]} : vector<16x96xf32> to vector<16x32xf32>
    %36 = vector.extract_strided_slice %33 {offsets = [0, 64], sizes = [16, 32], strides = [1, 1]} : vector<16x96xf32> to vector<16x32xf32>
    %c0_15 = arith.constant 0 : index
    %c0_16 = arith.constant 0 : index
    %c0_17 = arith.constant 0 : index
    %37 = vector.load %arg7[%c0_15, %c0_16, %c0_17] : memref<2x8x8xf32, #tpu.memory_space<vmem>>, vector<2x8x8xf32>
    %38 = vector.shape_cast %34 : vector<16x32xf32> to vector<2x8x32xf32>
    %39 = vector.shape_cast %35 : vector<16x32xf32> to vector<2x8x32xf32>
    %40 = vector.shape_cast %36 : vector<16x32xf32> to vector<2x8x32xf32>
    %41 = vector.extract_strided_slice %38 {offsets = [0, 0, 0], sizes = [2, 8, 8], strides = [1, 1, 1]} : vector<2x8x32xf32> to vector<2x8x8xf32>
    %42 = arith.truncf %41 : vector<2x8x8xf32> to vector<2x8x8xbf16>
    %43 = vector.extract_strided_slice %39 {offsets = [0, 0, 0], sizes = [2, 8, 8], strides = [1, 1, 1]} : vector<2x8x32xf32> to vector<2x8x8xf32>
    %44 = arith.truncf %43 : vector<2x8x8xf32> to vector<2x8x8xbf16>
    %45 = vector.extract_strided_slice %40 {offsets = [0, 0, 0], sizes = [2, 8, 8], strides = [1, 1, 1]} : vector<2x8x32xf32> to vector<2x8x8xf32>
    %46 = arith.truncf %45 : vector<2x8x8xf32> to vector<2x8x8xbf16>
    "tpu.trace_start"() <{level = 10 : i32, message = "bqd,bkd->bqk"}> : () -> ()
    %cst_18 = arith.constant dense<0.000000e+00> : vector<2x8x8xf32>
    %47 = tpu.matmul %42, %44, %cst_18 {dimension_numbers = #tpu.dot_dimension_numbers<[2], [2], [1], [1], [0, 0, 0, 1, 1, 1], [0], [0]>} : vector<2x8x8xbf16>, vector<2x8x8xbf16>, vector<2x8x8xf32> -> vector<2x8x8xf32>
    "tpu.trace_stop"() : () -> ()
    %cst_19 = arith.constant 0.353553385 : f32
    %48 = vector.broadcast %cst_19 : f32 to vector<2x8x8xf32>
    %49 = arith.mulf %47, %48 : vector<2x8x8xf32>
    %cst_20 = arith.constant 0.000000e+00 : f32
    %50 = vector.broadcast %cst_20 : f32 to vector<2x8x8xf32>
    %51 = arith.cmpf oeq, %37, %50 : vector<2x8x8xf32>
    %cst_21 = arith.constant -1.000000e+10 : f32
    %52 = vector.broadcast %cst_21 : f32 to vector<2x8x8xf32>
    %53 = arith.select %51, %52, %49 : vector<2x8x8xi1>, vector<2x8x8xf32>
    %cst_22 = arith.constant dense<0xFF800000> : vector<2x8xf32>
    %54 = vector.multi_reduction <maximumf>, %53, %cst_22 [2] : vector<2x8x8xf32> to vector<2x8xf32>
    %55 = vector.shape_cast %54 : vector<2x8xf32> to vector<2x8x1xf32>
    %56 = vector.broadcast %55 : vector<2x8x1xf32> to vector<2x8x8xf32>
    %57 = arith.subf %53, %56 : vector<2x8x8xf32>
    %58 = math.exp %57 : vector<2x8x8xf32>
    %cst_23 = arith.constant dense<0.000000e+00> : vector<2x8xf32>
    %59 = vector.multi_reduction <add>, %58, %cst_23 [2] : vector<2x8x8xf32> to vector<2x8xf32>
    %60 = vector.shape_cast %59 : vector<2x8xf32> to vector<2x8x1xf32>
    %61 = tpu.reciprocal %60 {approx = true} : vector<2x8x1xf32> -> vector<2x8x1xf32>
    %62 = vector.broadcast %61 : vector<2x8x1xf32> to vector<2x8x8xf32>
    %63 = arith.mulf %58, %62 : vector<2x8x8xf32>
    %64 = arith.truncf %63 : vector<2x8x8xf32> to vector<2x8x8xbf16>
    "tpu.trace_start"() <{level = 10 : i32, message = "bqk,bkd->bqd"}> : () -> ()
    %cst_24 = arith.constant dense<0.000000e+00> : vector<2x8x8xf32>
    %65 = tpu.matmul %64, %46, %cst_24 {dimension_numbers = #tpu.dot_dimension_numbers<[2], [1], [1], [2], [0, 0, 0, 1, 1, 2], [0], [0]>} : vector<2x8x8xbf16>, vector<2x8x8xbf16>, vector<2x8x8xf32> -> vector<2x8x8xf32>
    "tpu.trace_stop"() : () -> ()
    %66 = vector.extract_strided_slice %38 {offsets = [0, 0, 8], sizes = [2, 8, 8], strides = [1, 1, 1]} : vector<2x8x32xf32> to vector<2x8x8xf32>
    %67 = arith.truncf %66 : vector<2x8x8xf32> to vector<2x8x8xbf16>
    %68 = vector.extract_strided_slice %39 {offsets = [0, 0, 8], sizes = [2, 8, 8], strides = [1, 1, 1]} : vector<2x8x32xf32> to vector<2x8x8xf32>
    %69 = arith.truncf %68 : vector<2x8x8xf32> to vector<2x8x8xbf16>
    %70 = vector.extract_strided_slice %40 {offsets = [0, 0, 8], sizes = [2, 8, 8], strides = [1, 1, 1]} : vector<2x8x32xf32> to vector<2x8x8xf32>
    %71 = arith.truncf %70 : vector<2x8x8xf32> to vector<2x8x8xbf16>
    "tpu.trace_start"() <{level = 10 : i32, message = "bqd,bkd->bqk"}> : () -> ()
    %cst_25 = arith.constant dense<0.000000e+00> : vector<2x8x8xf32>
    %72 = tpu.matmul %67, %69, %cst_25 {dimension_numbers = #tpu.dot_dimension_numbers<[2], [2], [1], [1], [0, 0, 0, 1, 1, 1], [0], [0]>} : vector<2x8x8xbf16>, vector<2x8x8xbf16>, vector<2x8x8xf32> -> vector<2x8x8xf32>
    "tpu.trace_stop"() : () -> ()
    %cst_26 = arith.constant 0.353553385 : f32
    %73 = vector.broadcast %cst_26 : f32 to vector<2x8x8xf32>
    %74 = arith.mulf %72, %73 : vector<2x8x8xf32>
    %cst_27 = arith.constant 0.000000e+00 : f32
    %75 = vector.broadcast %cst_27 : f32 to vector<2x8x8xf32>
    %76 = arith.cmpf oeq, %37, %75 : vector<2x8x8xf32>
    %cst_28 = arith.constant -1.000000e+10 : f32
    %77 = vector.broadcast %cst_28 : f32 to vector<2x8x8xf32>
    %78 = arith.select %76, %77, %74 : vector<2x8x8xi1>, vector<2x8x8xf32>
    %cst_29 = arith.constant dense<0xFF800000> : vector<2x8xf32>
    %79 = vector.multi_reduction <maximumf>, %78, %cst_29 [2] : vector<2x8x8xf32> to vector<2x8xf32>
    %80 = vector.shape_cast %79 : vector<2x8xf32> to vector<2x8x1xf32>
    %81 = vector.broadcast %80 : vector<2x8x1xf32> to vector<2x8x8xf32>
    %82 = arith.subf %78, %81 : vector<2x8x8xf32>
    %83 = math.exp %82 : vector<2x8x8xf32>
    %cst_30 = arith.constant dense<0.000000e+00> : vector<2x8xf32>
    %84 = vector.multi_reduction <add>, %83, %cst_30 [2] : vector<2x8x8xf32> to vector<2x8xf32>
    %85 = vector.shape_cast %84 : vector<2x8xf32> to vector<2x8x1xf32>
    %86 = tpu.reciprocal %85 {approx = true} : vector<2x8x1xf32> -> vector<2x8x1xf32>
    %87 = vector.broadcast %86 : vector<2x8x1xf32> to vector<2x8x8xf32>
    %88 = arith.mulf %83, %87 : vector<2x8x8xf32>
    %89 = arith.truncf %88 : vector<2x8x8xf32> to vector<2x8x8xbf16>
    "tpu.trace_start"() <{level = 10 : i32, message = "bqk,bkd->bqd"}> : () -> ()
    %cst_31 = arith.constant dense<0.000000e+00> : vector<2x8x8xf32>
    %90 = tpu.matmul %89, %71, %cst_31 {dimension_numbers = #tpu.dot_dimension_numbers<[2], [1], [1], [2], [0, 0, 0, 1, 1, 2], [0], [0]>} : vector<2x8x8xbf16>, vector<2x8x8xbf16>, vector<2x8x8xf32> -> vector<2x8x8xf32>
    "tpu.trace_stop"() : () -> ()
    %91 = vector.extract_strided_slice %38 {offsets = [0, 0, 16], sizes = [2, 8, 8], strides = [1, 1, 1]} : vector<2x8x32xf32> to vector<2x8x8xf32>
    %92 = arith.truncf %91 : vector<2x8x8xf32> to vector<2x8x8xbf16>
    %93 = vector.extract_strided_slice %39 {offsets = [0, 0, 16], sizes = [2, 8, 8], strides = [1, 1, 1]} : vector<2x8x32xf32> to vector<2x8x8xf32>
    %94 = arith.truncf %93 : vector<2x8x8xf32> to vector<2x8x8xbf16>
    %95 = vector.extract_strided_slice %40 {offsets = [0, 0, 16], sizes = [2, 8, 8], strides = [1, 1, 1]} : vector<2x8x32xf32> to vector<2x8x8xf32>
    %96 = arith.truncf %95 : vector<2x8x8xf32> to vector<2x8x8xbf16>
    "tpu.trace_start"() <{level = 10 : i32, message = "bqd,bkd->bqk"}> : () -> ()
    %cst_32 = arith.constant dense<0.000000e+00> : vector<2x8x8xf32>
    %97 = tpu.matmul %92, %94, %cst_32 {dimension_numbers = #tpu.dot_dimension_numbers<[2], [2], [1], [1], [0, 0, 0, 1, 1, 1], [0], [0]>} : vector<2x8x8xbf16>, vector<2x8x8xbf16>, vector<2x8x8xf32> -> vector<2x8x8xf32>
    "tpu.trace_stop"() : () -> ()
    %cst_33 = arith.constant 0.353553385 : f32
    %98 = vector.broadcast %cst_33 : f32 to vector<2x8x8xf32>
    %99 = arith.mulf %97, %98 : vector<2x8x8xf32>
    %cst_34 = arith.constant 0.000000e+00 : f32
    %100 = vector.broadcast %cst_34 : f32 to vector<2x8x8xf32>
    %101 = arith.cmpf oeq, %37, %100 : vector<2x8x8xf32>
    %cst_35 = arith.constant -1.000000e+10 : f32
    %102 = vector.broadcast %cst_35 : f32 to vector<2x8x8xf32>
    %103 = arith.select %101, %102, %99 : vector<2x8x8xi1>, vector<2x8x8xf32>
    %cst_36 = arith.constant dense<0xFF800000> : vector<2x8xf32>
    %104 = vector.multi_reduction <maximumf>, %103, %cst_36 [2] : vector<2x8x8xf32> to vector<2x8xf32>
    %105 = vector.shape_cast %104 : vector<2x8xf32> to vector<2x8x1xf32>
    %106 = vector.broadcast %105 : vector<2x8x1xf32> to vector<2x8x8xf32>
    %107 = arith.subf %103, %106 : vector<2x8x8xf32>
    %108 = math.exp %107 : vector<2x8x8xf32>
    %cst_37 = arith.constant dense<0.000000e+00> : vector<2x8xf32>
    %109 = vector.multi_reduction <add>, %108, %cst_37 [2] : vector<2x8x8xf32> to vector<2x8xf32>
    %110 = vector.shape_cast %109 : vector<2x8xf32> to vector<2x8x1xf32>
    %111 = tpu.reciprocal %110 {approx = true} : vector<2x8x1xf32> -> vector<2x8x1xf32>
    %112 = vector.broadcast %111 : vector<2x8x1xf32> to vector<2x8x8xf32>
    %113 = arith.mulf %108, %112 : vector<2x8x8xf32>
    %114 = arith.truncf %113 : vector<2x8x8xf32> to vector<2x8x8xbf16>
    "tpu.trace_start"() <{level = 10 : i32, message = "bqk,bkd->bqd"}> : () -> ()
    %cst_38 = arith.constant dense<0.000000e+00> : vector<2x8x8xf32>
    %115 = tpu.matmul %114, %96, %cst_38 {dimension_numbers = #tpu.dot_dimension_numbers<[2], [1], [1], [2], [0, 0, 0, 1, 1, 2], [0], [0]>} : vector<2x8x8xbf16>, vector<2x8x8xbf16>, vector<2x8x8xf32> -> vector<2x8x8xf32>
    "tpu.trace_stop"() : () -> ()
    %116 = vector.extract_strided_slice %38 {offsets = [0, 0, 24], sizes = [2, 8, 8], strides = [1, 1, 1]} : vector<2x8x32xf32> to vector<2x8x8xf32>
    %117 = arith.truncf %116 : vector<2x8x8xf32> to vector<2x8x8xbf16>
    %118 = vector.extract_strided_slice %39 {offsets = [0, 0, 24], sizes = [2, 8, 8], strides = [1, 1, 1]} : vector<2x8x32xf32> to vector<2x8x8xf32>
    %119 = arith.truncf %118 : vector<2x8x8xf32> to vector<2x8x8xbf16>
    %120 = vector.extract_strided_slice %40 {offsets = [0, 0, 24], sizes = [2, 8, 8], strides = [1, 1, 1]} : vector<2x8x32xf32> to vector<2x8x8xf32>
    %121 = arith.truncf %120 : vector<2x8x8xf32> to vector<2x8x8xbf16>
    "tpu.trace_start"() <{level = 10 : i32, message = "bqd,bkd->bqk"}> : () -> ()
    %cst_39 = arith.constant dense<0.000000e+00> : vector<2x8x8xf32>
    %122 = tpu.matmul %117, %119, %cst_39 {dimension_numbers = #tpu.dot_dimension_numbers<[2], [2], [1], [1], [0, 0, 0, 1, 1, 1], [0], [0]>} : vector<2x8x8xbf16>, vector<2x8x8xbf16>, vector<2x8x8xf32> -> vector<2x8x8xf32>
    "tpu.trace_stop"() : () -> ()
    %cst_40 = arith.constant 0.353553385 : f32
    %123 = vector.broadcast %cst_40 : f32 to vector<2x8x8xf32>
    %124 = arith.mulf %122, %123 : vector<2x8x8xf32>
    %cst_41 = arith.constant 0.000000e+00 : f32
    %125 = vector.broadcast %cst_41 : f32 to vector<2x8x8xf32>
    %126 = arith.cmpf oeq, %37, %125 : vector<2x8x8xf32>
    %cst_42 = arith.constant -1.000000e+10 : f32
    %127 = vector.broadcast %cst_42 : f32 to vector<2x8x8xf32>
    %128 = arith.select %126, %127, %124 : vector<2x8x8xi1>, vector<2x8x8xf32>
    %cst_43 = arith.constant dense<0xFF800000> : vector<2x8xf32>
    %129 = vector.multi_reduction <maximumf>, %128, %cst_43 [2] : vector<2x8x8xf32> to vector<2x8xf32>
    %130 = vector.shape_cast %129 : vector<2x8xf32> to vector<2x8x1xf32>
    %131 = vector.broadcast %130 : vector<2x8x1xf32> to vector<2x8x8xf32>
    %132 = arith.subf %128, %131 : vector<2x8x8xf32>
    %133 = math.exp %132 : vector<2x8x8xf32>
    %cst_44 = arith.constant dense<0.000000e+00> : vector<2x8xf32>
    %134 = vector.multi_reduction <add>, %133, %cst_44 [2] : vector<2x8x8xf32> to vector<2x8xf32>
    %135 = vector.shape_cast %134 : vector<2x8xf32> to vector<2x8x1xf32>
    %136 = tpu.reciprocal %135 {approx = true} : vector<2x8x1xf32> -> vector<2x8x1xf32>
    %137 = vector.broadcast %136 : vector<2x8x1xf32> to vector<2x8x8xf32>
    %138 = arith.mulf %133, %137 : vector<2x8x8xf32>
    %139 = arith.truncf %138 : vector<2x8x8xf32> to vector<2x8x8xbf16>
    "tpu.trace_start"() <{level = 10 : i32, message = "bqk,bkd->bqd"}> : () -> ()
    %cst_45 = arith.constant dense<0.000000e+00> : vector<2x8x8xf32>
    %140 = tpu.matmul %139, %121, %cst_45 {dimension_numbers = #tpu.dot_dimension_numbers<[2], [1], [1], [2], [0, 0, 0, 1, 1, 2], [0], [0]>} : vector<2x8x8xbf16>, vector<2x8x8xbf16>, vector<2x8x8xf32> -> vector<2x8x8xf32>
    "tpu.trace_stop"() : () -> ()
    %141 = tpu.concatenate %65, %90, %115, %140 in 2 : vector<2x8x8xf32>, vector<2x8x8xf32>, vector<2x8x8xf32>, vector<2x8x8xf32> -> vector<2x8x32xf32>
    %142 = vector.shape_cast %141 : vector<2x8x32xf32> to vector<16x32xf32>
    %143 = arith.truncf %142 : vector<16x32xf32> to vector<16x32xbf16>
    %c0_46 = arith.constant 0 : index
    %c0_47 = arith.constant 0 : index
    %144 = vector.load %arg5[%c0_46, %c0_47] : memref<32x32xbf16, #tpu.memory_space<vmem>>, vector<32x32xbf16>
    %cst_48 = arith.constant dense<0.000000e+00> : vector<16x32xf32>
    %145 = tpu.matmul %143, %144, %cst_48 {dimension_numbers = #tpu.dot_dimension_numbers<[1], [0], [0], [1], [0, 0, 1, 1], [], []>} : vector<16x32xbf16>, vector<32x32xbf16>, vector<16x32xf32> -> vector<16x32xf32>
    %c0_49 = arith.constant 0 : index
    %c0_50 = arith.constant 0 : index
    %146 = vector.load %arg6[%c0_49, %c0_50] : memref<1x32xf32, #tpu.memory_space<vmem>>, vector<1x32xf32>
    %147 = vector.broadcast %146 : vector<1x32xf32> to vector<16x32xf32>
    %148 = arith.addf %145, %147 : vector<16x32xf32>
    %149 = vector.shape_cast %148 : vector<16x32xf32> to vector<2x8x32xf32>
    %150 = arith.addf %0, %149 : vector<2x8x32xf32>
    %c0_51 = arith.constant 0 : index
    %c0_52 = arith.constant 0 : index
    %c0_53 = arith.constant 0 : index
    %151 = vector.load %arg8[%c0_51, %c0_52, %c0_53] : memref<2x8x32xf32, #tpu.memory_space<vmem>>, vector<2x8x32xf32>
    tpu.vector_store %arg8[%c0_51, %c0_52, %c0_53], %150 {strides = array<i32>} : memref<2x8x32xf32, #tpu.memory_space<vmem>>, vector<2x8x32xf32>,
    return
  }
}

module attributes {stable_mosaic.version = 11 : i64} {
  func.func @self_attn_sublayer_kernel(%arg0: memref<2x8x32xf32, #tpu.memory_space<vmem>>, %arg1: memref<1x32xf32, #tpu.memory_space<vmem>>, %arg2: memref<1x32xf32, #tpu.memory_space<vmem>>, %arg3: memref<32x96xbf16, #tpu.memory_space<vmem>>, %arg4: memref<1x96xf32, #tpu.memory_space<vmem>>, %arg5: memref<32x32xbf16, #tpu.memory_space<vmem>>, %arg6: memref<1x32xf32, #tpu.memory_space<vmem>>, %arg7: memref<2x1x8xf32, #tpu.memory_space<vmem>>, %arg8: memref<2x8x32xf32, #tpu.memory_space<vmem>>) attributes {dimension_semantics = [], scalar_prefetch = 0 : i64, scratch_operands = 0 : i64, tpu.core_type = #tpu.core_type<tc>} {
    %c0 = arith.constant 0 : index
    %c0_0 = arith.constant 0 : index
    %c0_1 = arith.constant 0 : index
    %0 = vector.load %arg0[%c0, %c0_0, %c0_1] : memref<2x8x32xf32, #tpu.memory_space<vmem>>, vector<2x8x32xf32>
    %c0_2 = arith.constant 0 : index
    %c0_3 = arith.constant 0 : index
    %1 = vector.load %arg1[%c0_2, %c0_3] : memref<1x32xf32, #tpu.memory_space<vmem>>, vector<1x32xf32>
    %c0_4 = arith.constant 0 : index
    %c0_5 = arith.constant 0 : index
    %2 = vector.load %arg2[%c0_4, %c0_5] : memref<1x32xf32, #tpu.memory_space<vmem>>, vector<1x32xf32>
    %cst = arith.constant dense<0.000000e+00> : vector<2x8xf32>
    %3 = vector.multi_reduction <add>, %0, %cst [2] : vector<2x8x32xf32> to vector<2x8xf32>
    %4 = vector.shape_cast %3 : vector<2x8xf32> to vector<2x8x1xf32>
    %cst_6 = arith.constant 3.200000e+01 : f32
    %5 = vector.broadcast %cst_6 : f32 to vector<2x8x1xf32>
    %6 = arith.divf %4, %5 : vector<2x8x1xf32>
    %7 = vector.broadcast %6 : vector<2x8x1xf32> to vector<2x8x32xf32>
    %8 = arith.subf %0, %7 : vector<2x8x32xf32>
    %9 = arith.mulf %8, %8 : vector<2x8x32xf32>
    %cst_7 = arith.constant dense<0.000000e+00> : vector<2x8xf32>
    %10 = vector.multi_reduction <add>, %9, %cst_7 [2] : vector<2x8x32xf32> to vector<2x8xf32>
    %11 = vector.shape_cast %10 : vector<2x8xf32> to vector<2x8x1xf32>
    %cst_8 = arith.constant 3.200000e+01 : f32
    %12 = vector.broadcast %cst_8 : f32 to vector<2x8x1xf32>
    %13 = arith.divf %11, %12 : vector<2x8x1xf32>
    %14 = vector.broadcast %6 : vector<2x8x1xf32> to vector<2x8x32xf32>
    %15 = arith.subf %0, %14 : vector<2x8x32xf32>
    %cst_9 = arith.constant 9.99999974E-6 : f32
    %16 = vector.broadcast %cst_9 : f32 to vector<2x8x1xf32>
    %17 = arith.addf %13, %16 : vector<2x8x1xf32>
    %18 = math.rsqrt %17 : vector<2x8x1xf32>
    %19 = vector.broadcast %18 : vector<2x8x1xf32> to vector<2x8x32xf32>
    %20 = arith.mulf %15, %19 : vector<2x8x32xf32>
    %21 = vector.shape_cast %1 : vector<1x32xf32> to vector<1x1x32xf32>
    %22 = vector.broadcast %21 : vector<1x1x32xf32> to vector<2x8x32xf32>
    %23 = arith.mulf %20, %22 : vector<2x8x32xf32>
    %24 = vector.shape_cast %2 : vector<1x32xf32> to vector<1x1x32xf32>
    %25 = vector.broadcast %24 : vector<1x1x32xf32> to vector<2x8x32xf32>
    %26 = arith.addf %23, %25 : vector<2x8x32xf32>
    %27 = vector.shape_cast %26 : vector<2x8x32xf32> to vector<16x32xf32>
    %28 = arith.truncf %27 : vector<16x32xf32> to vector<16x32xbf16>
    %c0_10 = arith.constant 0 : index
    %c0_11 = arith.constant 0 : index
    %29 = vector.load %arg3[%c0_10, %c0_11] : memref<32x96xbf16, #tpu.memory_space<vmem>>, vector<32x96xbf16>
    %cst_12 = arith.constant dense<0.000000e+00> : vector<16x96xf32>
    %30 = tpu.matmul %28, %29, %cst_12 {dimension_numbers = #tpu.dot_dimension_numbers<[1], [0], [0], [1], [0, 0, 1, 1], [], []>} : vector<16x32xbf16>, vector<32x96xbf16>, vector<16x96xf32> -> vector<16x96xf32>
    %c0_13 = arith.constant 0 : index
    %c0_14 = arith.constant 0 : index
    %31 = vector.load %arg4[%c0_13, %c0_14] : memref<1x96xf32, #tpu.memory_space<vmem>>, vector<1x96xf32>
    %32 = vector.broadcast %31 : vector<1x96xf32> to vector<16x96xf32>
    %33 = arith.addf %30, %32 : vector<16x96xf32>
    %34 = vector.extract_strided_slice %33 {offsets = [0, 0], sizes = [16, 32], strides = [1, 1]} : vector<16x96xf32> to vector<16x32xf32>
    %35 = vector.extract_strided_slice %33 {offsets = [0, 32], sizes = [16, 32], strides = [1, 1]} : vector<16x96xf32> to vector<16x32xf32>
    %36 = vector.extract_strided_slice %33 {offsets = [0, 64], sizes = [16, 32], strides = [1, 1]} : vector<16x96xf32> to vector<16x32xf32>
    %c0_15 = arith.constant 0 : index
    %c0_16 = arith.constant 0 : index
    %c0_17 = arith.constant 0 : index
    %37 = vector.load %arg7[%c0_15, %c0_16, %c0_17] : memref<2x1x8xf32, #tpu.memory_space<vmem>>, vector<2x1x8xf32>
    %38 = vector.shape_cast %34 : vector<16x32xf32> to vector<2x8x32xf32>
    %39 = vector.shape_cast %35 : vector<16x32xf32> to vector<2x8x32xf32>
    %40 = vector.shape_cast %36 : vector<16x32xf32> to vector<2x8x32xf32>
    %41 = vector.extract_strided_slice %38 {offsets = [0, 0, 0], sizes = [2, 8, 8], strides = [1, 1, 1]} : vector<2x8x32xf32> to vector<2x8x8xf32>
    %42 = arith.truncf %41 : vector<2x8x8xf32> to vector<2x8x8xbf16>
    %43 = vector.extract_strided_slice %39 {offsets = [0, 0, 0], sizes = [2, 8, 8], strides = [1, 1, 1]} : vector<2x8x32xf32> to vector<2x8x8xf32>
    %44 = arith.truncf %43 : vector<2x8x8xf32> to vector<2x8x8xbf16>
    %45 = vector.extract_strided_slice %40 {offsets = [0, 0, 0], sizes = [2, 8, 8], strides = [1, 1, 1]} : vector<2x8x32xf32> to vector<2x8x8xf32>
    %46 = arith.truncf %45 : vector<2x8x8xf32> to vector<2x8x8xbf16>
    "tpu.trace_start"() <{level = 10 : i32, message = "bqd,bkd->bqk"}> : () -> ()
    %cst_18 = arith.constant dense<0.000000e+00> : vector<2x8x8xf32>
    %47 = tpu.matmul %42, %44, %cst_18 {dimension_numbers = #tpu.dot_dimension_numbers<[2], [2], [1], [1], [0, 0, 0, 1, 1, 1], [0], [0]>} : vector<2x8x8xbf16>, vector<2x8x8xbf16>, vector<2x8x8xf32> -> vector<2x8x8xf32>
    "tpu.trace_stop"() : () -> ()
    %cst_19 = arith.constant 0.353553385 : f32
    %48 = vector.broadcast %cst_19 : f32 to vector<2x8x8xf32>
    %49 = arith.mulf %47, %48 : vector<2x8x8xf32>
    %cst_20 = arith.constant 0.000000e+00 : f32
    %50 = vector.broadcast %cst_20 : f32 to vector<2x1x8xf32>
    %51 = arith.cmpf oeq, %37, %50 : vector<2x1x8xf32>
    %cst_21 = arith.constant -1.000000e+10 : f32
    %52 = vector.shape_cast %51 : vector<2x1x8xi1> to vector<2x1x8xi1>
    %53 = vector.broadcast %52 : vector<2x1x8xi1> to vector<2x8x8xi1>
    %54 = vector.broadcast %cst_21 : f32 to vector<2x8x8xf32>
    %55 = arith.select %53, %54, %49 : vector<2x8x8xi1>, vector<2x8x8xf32>
    %cst_22 = arith.constant dense<0xFF800000> : vector<2x8xf32>
    %56 = vector.multi_reduction <maximumf>, %55, %cst_22 [2] : vector<2x8x8xf32> to vector<2x8xf32>
    %57 = vector.shape_cast %56 : vector<2x8xf32> to vector<2x8x1xf32>
    %58 = vector.broadcast %57 : vector<2x8x1xf32> to vector<2x8x8xf32>
    %59 = arith.subf %55, %58 : vector<2x8x8xf32>
    %60 = math.exp %59 : vector<2x8x8xf32>
    %cst_23 = arith.constant dense<0.000000e+00> : vector<2x8xf32>
    %61 = vector.multi_reduction <add>, %60, %cst_23 [2] : vector<2x8x8xf32> to vector<2x8xf32>
    %62 = vector.shape_cast %61 : vector<2x8xf32> to vector<2x8x1xf32>
    %63 = tpu.reciprocal %62 {approx = true} : vector<2x8x1xf32> -> vector<2x8x1xf32>
    %64 = vector.broadcast %63 : vector<2x8x1xf32> to vector<2x8x8xf32>
    %65 = arith.mulf %60, %64 : vector<2x8x8xf32>
    %66 = arith.truncf %65 : vector<2x8x8xf32> to vector<2x8x8xbf16>
    "tpu.trace_start"() <{level = 10 : i32, message = "bqk,bkd->bqd"}> : () -> ()
    %cst_24 = arith.constant dense<0.000000e+00> : vector<2x8x8xf32>
    %67 = tpu.matmul %66, %46, %cst_24 {dimension_numbers = #tpu.dot_dimension_numbers<[2], [1], [1], [2], [0, 0, 0, 1, 1, 2], [0], [0]>} : vector<2x8x8xbf16>, vector<2x8x8xbf16>, vector<2x8x8xf32> -> vector<2x8x8xf32>
    "tpu.trace_stop"() : () -> ()
    %68 = vector.extract_strided_slice %38 {offsets = [0, 0, 8], sizes = [2, 8, 8], strides = [1, 1, 1]} : vector<2x8x32xf32> to vector<2x8x8xf32>
    %69 = arith.truncf %68 : vector<2x8x8xf32> to vector<2x8x8xbf16>
    %70 = vector.extract_strided_slice %39 {offsets = [0, 0, 8], sizes = [2, 8, 8], strides = [1, 1, 1]} : vector<2x8x32xf32> to vector<2x8x8xf32>
    %71 = arith.truncf %70 : vector<2x8x8xf32> to vector<2x8x8xbf16>
    %72 = vector.extract_strided_slice %40 {offsets = [0, 0, 8], sizes = [2, 8, 8], strides = [1, 1, 1]} : vector<2x8x32xf32> to vector<2x8x8xf32>
    %73 = arith.truncf %72 : vector<2x8x8xf32> to vector<2x8x8xbf16>
    "tpu.trace_start"() <{level = 10 : i32, message = "bqd,bkd->bqk"}> : () -> ()
    %cst_25 = arith.constant dense<0.000000e+00> : vector<2x8x8xf32>
    %74 = tpu.matmul %69, %71, %cst_25 {dimension_numbers = #tpu.dot_dimension_numbers<[2], [2], [1], [1], [0, 0, 0, 1, 1, 1], [0], [0]>} : vector<2x8x8xbf16>, vector<2x8x8xbf16>, vector<2x8x8xf32> -> vector<2x8x8xf32>
    "tpu.trace_stop"() : () -> ()
    %cst_26 = arith.constant 0.353553385 : f32
    %75 = vector.broadcast %cst_26 : f32 to vector<2x8x8xf32>
    %76 = arith.mulf %74, %75 : vector<2x8x8xf32>
    %cst_27 = arith.constant 0.000000e+00 : f32
    %77 = vector.broadcast %cst_27 : f32 to vector<2x1x8xf32>
    %78 = arith.cmpf oeq, %37, %77 : vector<2x1x8xf32>
    %cst_28 = arith.constant -1.000000e+10 : f32
    %79 = vector.shape_cast %78 : vector<2x1x8xi1> to vector<2x1x8xi1>
    %80 = vector.broadcast %79 : vector<2x1x8xi1> to vector<2x8x8xi1>
    %81 = vector.broadcast %cst_28 : f32 to vector<2x8x8xf32>
    %82 = arith.select %80, %81, %76 : vector<2x8x8xi1>, vector<2x8x8xf32>
    %cst_29 = arith.constant dense<0xFF800000> : vector<2x8xf32>
    %83 = vector.multi_reduction <maximumf>, %82, %cst_29 [2] : vector<2x8x8xf32> to vector<2x8xf32>
    %84 = vector.shape_cast %83 : vector<2x8xf32> to vector<2x8x1xf32>
    %85 = vector.broadcast %84 : vector<2x8x1xf32> to vector<2x8x8xf32>
    %86 = arith.subf %82, %85 : vector<2x8x8xf32>
    %87 = math.exp %86 : vector<2x8x8xf32>
    %cst_30 = arith.constant dense<0.000000e+00> : vector<2x8xf32>
    %88 = vector.multi_reduction <add>, %87, %cst_30 [2] : vector<2x8x8xf32> to vector<2x8xf32>
    %89 = vector.shape_cast %88 : vector<2x8xf32> to vector<2x8x1xf32>
    %90 = tpu.reciprocal %89 {approx = true} : vector<2x8x1xf32> -> vector<2x8x1xf32>
    %91 = vector.broadcast %90 : vector<2x8x1xf32> to vector<2x8x8xf32>
    %92 = arith.mulf %87, %91 : vector<2x8x8xf32>
    %93 = arith.truncf %92 : vector<2x8x8xf32> to vector<2x8x8xbf16>
    "tpu.trace_start"() <{level = 10 : i32, message = "bqk,bkd->bqd"}> : () -> ()
    %cst_31 = arith.constant dense<0.000000e+00> : vector<2x8x8xf32>
    %94 = tpu.matmul %93, %73, %cst_31 {dimension_numbers = #tpu.dot_dimension_numbers<[2], [1], [1], [2], [0, 0, 0, 1, 1, 2], [0], [0]>} : vector<2x8x8xbf16>, vector<2x8x8xbf16>, vector<2x8x8xf32> -> vector<2x8x8xf32>
    "tpu.trace_stop"() : () -> ()
    %95 = vector.extract_strided_slice %38 {offsets = [0, 0, 16], sizes = [2, 8, 8], strides = [1, 1, 1]} : vector<2x8x32xf32> to vector<2x8x8xf32>
    %96 = arith.truncf %95 : vector<2x8x8xf32> to vector<2x8x8xbf16>
    %97 = vector.extract_strided_slice %39 {offsets = [0, 0, 16], sizes = [2, 8, 8], strides = [1, 1, 1]} : vector<2x8x32xf32> to vector<2x8x8xf32>
    %98 = arith.truncf %97 : vector<2x8x8xf32> to vector<2x8x8xbf16>
    %99 = vector.extract_strided_slice %40 {offsets = [0, 0, 16], sizes = [2, 8, 8], strides = [1, 1, 1]} : vector<2x8x32xf32> to vector<2x8x8xf32>
    %100 = arith.truncf %99 : vector<2x8x8xf32> to vector<2x8x8xbf16>
    "tpu.trace_start"() <{level = 10 : i32, message = "bqd,bkd->bqk"}> : () -> ()
    %cst_32 = arith.constant dense<0.000000e+00> : vector<2x8x8xf32>
    %101 = tpu.matmul %96, %98, %cst_32 {dimension_numbers = #tpu.dot_dimension_numbers<[2], [2], [1], [1], [0, 0, 0, 1, 1, 1], [0], [0]>} : vector<2x8x8xbf16>, vector<2x8x8xbf16>, vector<2x8x8xf32> -> vector<2x8x8xf32>
    "tpu.trace_stop"() : () -> ()
    %cst_33 = arith.constant 0.353553385 : f32
    %102 = vector.broadcast %cst_33 : f32 to vector<2x8x8xf32>
    %103 = arith.mulf %101, %102 : vector<2x8x8xf32>
    %cst_34 = arith.constant 0.000000e+00 : f32
    %104 = vector.broadcast %cst_34 : f32 to vector<2x1x8xf32>
    %105 = arith.cmpf oeq, %37, %104 : vector<2x1x8xf32>
    %cst_35 = arith.constant -1.000000e+10 : f32
    %106 = vector.shape_cast %105 : vector<2x1x8xi1> to vector<2x1x8xi1>
    %107 = vector.broadcast %106 : vector<2x1x8xi1> to vector<2x8x8xi1>
    %108 = vector.broadcast %cst_35 : f32 to vector<2x8x8xf32>
    %109 = arith.select %107, %108, %103 : vector<2x8x8xi1>, vector<2x8x8xf32>
    %cst_36 = arith.constant dense<0xFF800000> : vector<2x8xf32>
    %110 = vector.multi_reduction <maximumf>, %109, %cst_36 [2] : vector<2x8x8xf32> to vector<2x8xf32>
    %111 = vector.shape_cast %110 : vector<2x8xf32> to vector<2x8x1xf32>
    %112 = vector.broadcast %111 : vector<2x8x1xf32> to vector<2x8x8xf32>
    %113 = arith.subf %109, %112 : vector<2x8x8xf32>
    %114 = math.exp %113 : vector<2x8x8xf32>
    %cst_37 = arith.constant dense<0.000000e+00> : vector<2x8xf32>
    %115 = vector.multi_reduction <add>, %114, %cst_37 [2] : vector<2x8x8xf32> to vector<2x8xf32>
    %116 = vector.shape_cast %115 : vector<2x8xf32> to vector<2x8x1xf32>
    %117 = tpu.reciprocal %116 {approx = true} : vector<2x8x1xf32> -> vector<2x8x1xf32>
    %118 = vector.broadcast %117 : vector<2x8x1xf32> to vector<2x8x8xf32>
    %119 = arith.mulf %114, %118 : vector<2x8x8xf32>
    %120 = arith.truncf %119 : vector<2x8x8xf32> to vector<2x8x8xbf16>
    "tpu.trace_start"() <{level = 10 : i32, message = "bqk,bkd->bqd"}> : () -> ()
    %cst_38 = arith.constant dense<0.000000e+00> : vector<2x8x8xf32>
    %121 = tpu.matmul %120, %100, %cst_38 {dimension_numbers = #tpu.dot_dimension_numbers<[2], [1], [1], [2], [0, 0, 0, 1, 1, 2], [0], [0]>} : vector<2x8x8xbf16>, vector<2x8x8xbf16>, vector<2x8x8xf32> -> vector<2x8x8xf32>
    "tpu.trace_stop"() : () -> ()
    %122 = vector.extract_strided_slice %38 {offsets = [0, 0, 24], sizes = [2, 8, 8], strides = [1, 1, 1]} : vector<2x8x32xf32> to vector<2x8x8xf32>
    %123 = arith.truncf %122 : vector<2x8x8xf32> to vector<2x8x8xbf16>
    %124 = vector.extract_strided_slice %39 {offsets = [0, 0, 24], sizes = [2, 8, 8], strides = [1, 1, 1]} : vector<2x8x32xf32> to vector<2x8x8xf32>
    %125 = arith.truncf %124 : vector<2x8x8xf32> to vector<2x8x8xbf16>
    %126 = vector.extract_strided_slice %40 {offsets = [0, 0, 24], sizes = [2, 8, 8], strides = [1, 1, 1]} : vector<2x8x32xf32> to vector<2x8x8xf32>
    %127 = arith.truncf %126 : vector<2x8x8xf32> to vector<2x8x8xbf16>
    "tpu.trace_start"() <{level = 10 : i32, message = "bqd,bkd->bqk"}> : () -> ()
    %cst_39 = arith.constant dense<0.000000e+00> : vector<2x8x8xf32>
    %128 = tpu.matmul %123, %125, %cst_39 {dimension_numbers = #tpu.dot_dimension_numbers<[2], [2], [1], [1], [0, 0, 0, 1, 1, 1], [0], [0]>} : vector<2x8x8xbf16>, vector<2x8x8xbf16>, vector<2x8x8xf32> -> vector<2x8x8xf32>
    "tpu.trace_stop"() : () -> ()
    %cst_40 = arith.constant 0.353553385 : f32
    %129 = vector.broadcast %cst_40 : f32 to vector<2x8x8xf32>
    %130 = arith.mulf %128, %129 : vector<2x8x8xf32>
    %cst_41 = arith.constant 0.000000e+00 : f32
    %131 = vector.broadcast %cst_41 : f32 to vector<2x1x8xf32>
    %132 = arith.cmpf oeq, %37, %131 : vector<2x1x8xf32>
    %cst_42 = arith.constant -1.000000e+10 : f32
    %133 = vector.shape_cast %132 : vector<2x1x8xi1> to vector<2x1x8xi1>
    %134 = vector.broadcast %133 : vector<2x1x8xi1> to vector<2x8x8xi1>
    %135 = vector.broadcast %cst_42 : f32 to vector<2x8x8xf32>
    %136 = arith.select %134, %135, %130 : vector<2x8x8xi1>, vector<2x8x8xf32>
    %cst_43 = arith.constant dense<0xFF800000> : vector<2x8xf32>
    %137 = vector.multi_reduction <maximumf>, %136, %cst_43 [2] : vector<2x8x8xf32> to vector<2x8xf32>
    %138 = vector.shape_cast %137 : vector<2x8xf32> to vector<2x8x1xf32>
    %139 = vector.broadcast %138 : vector<2x8x1xf32> to vector<2x8x8xf32>
    %140 = arith.subf %136, %139 : vector<2x8x8xf32>
    %141 = math.exp %140 : vector<2x8x8xf32>
    %cst_44 = arith.constant dense<0.000000e+00> : vector<2x8xf32>
    %142 = vector.multi_reduction <add>, %141, %cst_44 [2] : vector<2x8x8xf32> to vector<2x8xf32>
    %143 = vector.shape_cast %142 : vector<2x8xf32> to vector<2x8x1xf32>
    %144 = tpu.reciprocal %143 {approx = true} : vector<2x8x1xf32> -> vector<2x8x1xf32>
    %145 = vector.broadcast %144 : vector<2x8x1xf32> to vector<2x8x8xf32>
    %146 = arith.mulf %141, %145 : vector<2x8x8xf32>
    %147 = arith.truncf %146 : vector<2x8x8xf32> to vector<2x8x8xbf16>
    "tpu.trace_start"() <{level = 10 : i32, message = "bqk,bkd->bqd"}> : () -> ()
    %cst_45 = arith.constant dense<0.000000e+00> : vector<2x8x8xf32>
    %148 = tpu.matmul %147, %127, %cst_45 {dimension_numbers = #tpu.dot_dimension_numbers<[2], [1], [1], [2], [0, 0, 0, 1, 1, 2], [0], [0]>} : vector<2x8x8xbf16>, vector<2x8x8xbf16>, vector<2x8x8xf32> -> vector<2x8x8xf32>
    "tpu.trace_stop"() : () -> ()
    %149 = tpu.concatenate %67, %94, %121, %148 in 2 : vector<2x8x8xf32>, vector<2x8x8xf32>, vector<2x8x8xf32>, vector<2x8x8xf32> -> vector<2x8x32xf32>
    %150 = vector.shape_cast %149 : vector<2x8x32xf32> to vector<16x32xf32>
    %151 = arith.truncf %150 : vector<16x32xf32> to vector<16x32xbf16>
    %c0_46 = arith.constant 0 : index
    %c0_47 = arith.constant 0 : index
    %152 = vector.load %arg5[%c0_46, %c0_47] : memref<32x32xbf16, #tpu.memory_space<vmem>>, vector<32x32xbf16>
    %cst_48 = arith.constant dense<0.000000e+00> : vector<16x32xf32>
    %153 = tpu.matmul %151, %152, %cst_48 {dimension_numbers = #tpu.dot_dimension_numbers<[1], [0], [0], [1], [0, 0, 1, 1], [], []>} : vector<16x32xbf16>, vector<32x32xbf16>, vector<16x32xf32> -> vector<16x32xf32>
    %c0_49 = arith.constant 0 : index
    %c0_50 = arith.constant 0 : index
    %154 = vector.load %arg6[%c0_49, %c0_50] : memref<1x32xf32, #tpu.memory_space<vmem>>, vector<1x32xf32>
    %155 = vector.broadcast %154 : vector<1x32xf32> to vector<16x32xf32>
    %156 = arith.addf %153, %155 : vector<16x32xf32>
    %157 = vector.shape_cast %156 : vector<16x32xf32> to vector<2x8x32xf32>
    %158 = arith.addf %0, %157 : vector<2x8x32xf32>
    %c0_51 = arith.constant 0 : index
    %c0_52 = arith.constant 0 : index
    %c0_53 = arith.constant 0 : index
    %159 = vector.load %arg8[%c0_51, %c0_52, %c0_53] : memref<2x8x32xf32, #tpu.memory_space<vmem>>, vector<2x8x32xf32>
    tpu.vector_store %arg8[%c0_51, %c0_52, %c0_53], %158 {strides = array<i32>} : memref<2x8x32xf32, #tpu.memory_space<vmem>>, vector<2x8x32xf32>,
    return
  }
}

module attributes {stable_mosaic.version = 11 : i64} {
  func.func @cross_attn_nomask_kernel(%arg0: memref<2x8x32xf32, #tpu.memory_space<vmem>>, %arg1: memref<2x8x32xf32, #tpu.memory_space<vmem>>, %arg2: memref<1x32xf32, #tpu.memory_space<vmem>>, %arg3: memref<1x32xf32, #tpu.memory_space<vmem>>, %arg4: memref<32x32xbf16, #tpu.memory_space<vmem>>, %arg5: memref<1x32xf32, #tpu.memory_space<vmem>>, %arg6: memref<32x64xbf16, #tpu.memory_space<vmem>>, %arg7: memref<1x64xf32, #tpu.memory_space<vmem>>, %arg8: memref<32x32xbf16, #tpu.memory_space<vmem>>, %arg9: memref<1x32xf32, #tpu.memory_space<vmem>>, %arg10: memref<2x8x32xf32, #tpu.memory_space<vmem>>) attributes {dimension_semantics = [], scalar_prefetch = 0 : i64, scratch_operands = 0 : i64, tpu.core_type = #tpu.core_type<tc>} {
    %c0 = arith.constant 0 : index
    %c0_0 = arith.constant 0 : index
    %c0_1 = arith.constant 0 : index
    %0 = vector.load %arg0[%c0, %c0_0, %c0_1] : memref<2x8x32xf32, #tpu.memory_space<vmem>>, vector<2x8x32xf32>
    %c0_2 = arith.constant 0 : index
    %c0_3 = arith.constant 0 : index
    %c0_4 = arith.constant 0 : index
    %1 = vector.load %arg1[%c0_2, %c0_3, %c0_4] : memref<2x8x32xf32, #tpu.memory_space<vmem>>, vector<2x8x32xf32>
    %c0_5 = arith.constant 0 : index
    %c0_6 = arith.constant 0 : index
    %2 = vector.load %arg2[%c0_5, %c0_6] : memref<1x32xf32, #tpu.memory_space<vmem>>, vector<1x32xf32>
    %c0_7 = arith.constant 0 : index
    %c0_8 = arith.constant 0 : index
    %3 = vector.load %arg3[%c0_7, %c0_8] : memref<1x32xf32, #tpu.memory_space<vmem>>, vector<1x32xf32>
    %cst = arith.constant dense<0.000000e+00> : vector<2x8xf32>
    %4 = vector.multi_reduction <add>, %0, %cst [2] : vector<2x8x32xf32> to vector<2x8xf32>
    %5 = vector.shape_cast %4 : vector<2x8xf32> to vector<2x8x1xf32>
    %cst_9 = arith.constant 3.200000e+01 : f32
    %6 = vector.broadcast %cst_9 : f32 to vector<2x8x1xf32>
    %7 = arith.divf %5, %6 : vector<2x8x1xf32>
    %8 = vector.broadcast %7 : vector<2x8x1xf32> to vector<2x8x32xf32>
    %9 = arith.subf %0, %8 : vector<2x8x32xf32>
    %10 = arith.mulf %9, %9 : vector<2x8x32xf32>
    %cst_10 = arith.constant dense<0.000000e+00> : vector<2x8xf32>
    %11 = vector.multi_reduction <add>, %10, %cst_10 [2] : vector<2x8x32xf32> to vector<2x8xf32>
    %12 = vector.shape_cast %11 : vector<2x8xf32> to vector<2x8x1xf32>
    %cst_11 = arith.constant 3.200000e+01 : f32
    %13 = vector.broadcast %cst_11 : f32 to vector<2x8x1xf32>
    %14 = arith.divf %12, %13 : vector<2x8x1xf32>
    %15 = vector.broadcast %7 : vector<2x8x1xf32> to vector<2x8x32xf32>
    %16 = arith.subf %0, %15 : vector<2x8x32xf32>
    %cst_12 = arith.constant 9.99999974E-6 : f32
    %17 = vector.broadcast %cst_12 : f32 to vector<2x8x1xf32>
    %18 = arith.addf %14, %17 : vector<2x8x1xf32>
    %19 = math.rsqrt %18 : vector<2x8x1xf32>
    %20 = vector.broadcast %19 : vector<2x8x1xf32> to vector<2x8x32xf32>
    %21 = arith.mulf %16, %20 : vector<2x8x32xf32>
    %22 = vector.shape_cast %2 : vector<1x32xf32> to vector<1x1x32xf32>
    %23 = vector.broadcast %22 : vector<1x1x32xf32> to vector<2x8x32xf32>
    %24 = arith.mulf %21, %23 : vector<2x8x32xf32>
    %25 = vector.shape_cast %3 : vector<1x32xf32> to vector<1x1x32xf32>
    %26 = vector.broadcast %25 : vector<1x1x32xf32> to vector<2x8x32xf32>
    %27 = arith.addf %24, %26 : vector<2x8x32xf32>
    %28 = vector.shape_cast %27 : vector<2x8x32xf32> to vector<16x32xf32>
    %29 = arith.truncf %28 : vector<16x32xf32> to vector<16x32xbf16>
    %c0_13 = arith.constant 0 : index
    %c0_14 = arith.constant 0 : index
    %30 = vector.load %arg4[%c0_13, %c0_14] : memref<32x32xbf16, #tpu.memory_space<vmem>>, vector<32x32xbf16>
    %cst_15 = arith.constant dense<0.000000e+00> : vector<16x32xf32>
    %31 = tpu.matmul %29, %30, %cst_15 {dimension_numbers = #tpu.dot_dimension_numbers<[1], [0], [0], [1], [0, 0, 1, 1], [], []>} : vector<16x32xbf16>, vector<32x32xbf16>, vector<16x32xf32> -> vector<16x32xf32>
    %c0_16 = arith.constant 0 : index
    %c0_17 = arith.constant 0 : index
    %32 = vector.load %arg5[%c0_16, %c0_17] : memref<1x32xf32, #tpu.memory_space<vmem>>, vector<1x32xf32>
    %33 = vector.broadcast %32 : vector<1x32xf32> to vector<16x32xf32>
    %34 = arith.addf %31, %33 : vector<16x32xf32>
    %35 = vector.shape_cast %1 : vector<2x8x32xf32> to vector<16x32xf32>
    %36 = arith.truncf %35 : vector<16x32xf32> to vector<16x32xbf16>
    %c0_18 = arith.constant 0 : index
    %c0_19 = arith.constant 0 : index
    %37 = vector.load %arg6[%c0_18, %c0_19] : memref<32x64xbf16, #tpu.memory_space<vmem>>, vector<32x64xbf16>
    %cst_20 = arith.constant dense<0.000000e+00> : vector<16x64xf32>
    %38 = tpu.matmul %36, %37, %cst_20 {dimension_numbers = #tpu.dot_dimension_numbers<[1], [0], [0], [1], [0, 0, 1, 1], [], []>} : vector<16x32xbf16>, vector<32x64xbf16>, vector<16x64xf32> -> vector<16x64xf32>
    %c0_21 = arith.constant 0 : index
    %c0_22 = arith.constant 0 : index
    %39 = vector.load %arg7[%c0_21, %c0_22] : memref<1x64xf32, #tpu.memory_space<vmem>>, vector<1x64xf32>
    %40 = vector.broadcast %39 : vector<1x64xf32> to vector<16x64xf32>
    %41 = arith.addf %38, %40 : vector<16x64xf32>
    %42 = vector.extract_strided_slice %41 {offsets = [0, 0], sizes = [16, 32], strides = [1, 1]} : vector<16x64xf32> to vector<16x32xf32>
    %43 = vector.extract_strided_slice %41 {offsets = [0, 32], sizes = [16, 32], strides = [1, 1]} : vector<16x64xf32> to vector<16x32xf32>
    %44 = vector.shape_cast %34 : vector<16x32xf32> to vector<2x8x32xf32>
    %45 = vector.shape_cast %42 : vector<16x32xf32> to vector<2x8x32xf32>
    %46 = vector.shape_cast %43 : vector<16x32xf32> to vector<2x8x32xf32>
    %47 = vector.extract_strided_slice %44 {offsets = [0, 0, 0], sizes = [2, 8, 8], strides = [1, 1, 1]} : vector<2x8x32xf32> to vector<2x8x8xf32>
    %48 = arith.truncf %47 : vector<2x8x8xf32> to vector<2x8x8xbf16>
    %49 = vector.extract_strided_slice %45 {offsets = [0, 0, 0], sizes = [2, 8, 8], strides = [1, 1, 1]} : vector<2x8x32xf32> to vector<2x8x8xf32>
    %50 = arith.truncf %49 : vector<2x8x8xf32> to vector<2x8x8xbf16>
    %51 = vector.extract_strided_slice %46 {offsets = [0, 0, 0], sizes = [2, 8, 8], strides = [1, 1, 1]} : vector<2x8x32xf32> to vector<2x8x8xf32>
    %52 = arith.truncf %51 : vector<2x8x8xf32> to vector<2x8x8xbf16>
    "tpu.trace_start"() <{level = 10 : i32, message = "bqd,bkd->bqk"}> : () -> ()
    %cst_23 = arith.constant dense<0.000000e+00> : vector<2x8x8xf32>
    %53 = tpu.matmul %48, %50, %cst_23 {dimension_numbers = #tpu.dot_dimension_numbers<[2], [2], [1], [1], [0, 0, 0, 1, 1, 1], [0], [0]>} : vector<2x8x8xbf16>, vector<2x8x8xbf16>, vector<2x8x8xf32> -> vector<2x8x8xf32>
    "tpu.trace_stop"() : () -> ()
    %cst_24 = arith.constant 0.353553385 : f32
    %54 = vector.broadcast %cst_24 : f32 to vector<2x8x8xf32>
    %55 = arith.mulf %53, %54 : vector<2x8x8xf32>
    %cst_25 = arith.constant dense<0xFF800000> : vector<2x8xf32>
    %56 = vector.multi_reduction <maximumf>, %55, %cst_25 [2] : vector<2x8x8xf32> to vector<2x8xf32>
    %57 = vector.shape_cast %56 : vector<2x8xf32> to vector<2x8x1xf32>
    %58 = vector.broadcast %57 : vector<2x8x1xf32> to vector<2x8x8xf32>
    %59 = arith.subf %55, %58 : vector<2x8x8xf32>
    %60 = math.exp %59 : vector<2x8x8xf32>
    %cst_26 = arith.constant dense<0.000000e+00> : vector<2x8xf32>
    %61 = vector.multi_reduction <add>, %60, %cst_26 [2] : vector<2x8x8xf32> to vector<2x8xf32>
    %62 = vector.shape_cast %61 : vector<2x8xf32> to vector<2x8x1xf32>
    %63 = tpu.reciprocal %62 {approx = true} : vector<2x8x1xf32> -> vector<2x8x1xf32>
    %64 = vector.broadcast %63 : vector<2x8x1xf32> to vector<2x8x8xf32>
    %65 = arith.mulf %60, %64 : vector<2x8x8xf32>
    %66 = arith.truncf %65 : vector<2x8x8xf32> to vector<2x8x8xbf16>
    "tpu.trace_start"() <{level = 10 : i32, message = "bqk,bkd->bqd"}> : () -> ()
    %cst_27 = arith.constant dense<0.000000e+00> : vector<2x8x8xf32>
    %67 = tpu.matmul %66, %52, %cst_27 {dimension_numbers = #tpu.dot_dimension_numbers<[2], [1], [1], [2], [0, 0, 0, 1, 1, 2], [0], [0]>} : vector<2x8x8xbf16>, vector<2x8x8xbf16>, vector<2x8x8xf32> -> vector<2x8x8xf32>
    "tpu.trace_stop"() : () -> ()
    %68 = vector.extract_strided_slice %44 {offsets = [0, 0, 8], sizes = [2, 8, 8], strides = [1, 1, 1]} : vector<2x8x32xf32> to vector<2x8x8xf32>
    %69 = arith.truncf %68 : vector<2x8x8xf32> to vector<2x8x8xbf16>
    %70 = vector.extract_strided_slice %45 {offsets = [0, 0, 8], sizes = [2, 8, 8], strides = [1, 1, 1]} : vector<2x8x32xf32> to vector<2x8x8xf32>
    %71 = arith.truncf %70 : vector<2x8x8xf32> to vector<2x8x8xbf16>
    %72 = vector.extract_strided_slice %46 {offsets = [0, 0, 8], sizes = [2, 8, 8], strides = [1, 1, 1]} : vector<2x8x32xf32> to vector<2x8x8xf32>
    %73 = arith.truncf %72 : vector<2x8x8xf32> to vector<2x8x8xbf16>
    "tpu.trace_start"() <{level = 10 : i32, message = "bqd,bkd->bqk"}> : () -> ()
    %cst_28 = arith.constant dense<0.000000e+00> : vector<2x8x8xf32>
    %74 = tpu.matmul %69, %71, %cst_28 {dimension_numbers = #tpu.dot_dimension_numbers<[2], [2], [1], [1], [0, 0, 0, 1, 1, 1], [0], [0]>} : vector<2x8x8xbf16>, vector<2x8x8xbf16>, vector<2x8x8xf32> -> vector<2x8x8xf32>
    "tpu.trace_stop"() : () -> ()
    %cst_29 = arith.constant 0.353553385 : f32
    %75 = vector.broadcast %cst_29 : f32 to vector<2x8x8xf32>
    %76 = arith.mulf %74, %75 : vector<2x8x8xf32>
    %cst_30 = arith.constant dense<0xFF800000> : vector<2x8xf32>
    %77 = vector.multi_reduction <maximumf>, %76, %cst_30 [2] : vector<2x8x8xf32> to vector<2x8xf32>
    %78 = vector.shape_cast %77 : vector<2x8xf32> to vector<2x8x1xf32>
    %79 = vector.broadcast %78 : vector<2x8x1xf32> to vector<2x8x8xf32>
    %80 = arith.subf %76, %79 : vector<2x8x8xf32>
    %81 = math.exp %80 : vector<2x8x8xf32>
    %cst_31 = arith.constant dense<0.000000e+00> : vector<2x8xf32>
    %82 = vector.multi_reduction <add>, %81, %cst_31 [2] : vector<2x8x8xf32> to vector<2x8xf32>
    %83 = vector.shape_cast %82 : vector<2x8xf32> to vector<2x8x1xf32>
    %84 = tpu.reciprocal %83 {approx = true} : vector<2x8x1xf32> -> vector<2x8x1xf32>
    %85 = vector.broadcast %84 : vector<2x8x1xf32> to vector<2x8x8xf32>
    %86 = arith.mulf %81, %85 : vector<2x8x8xf32>
    %87 = arith.truncf %86 : vector<2x8x8xf32> to vector<2x8x8xbf16>
    "tpu.trace_start"() <{level = 10 : i32, message = "bqk,bkd->bqd"}> : () -> ()
    %cst_32 = arith.constant dense<0.000000e+00> : vector<2x8x8xf32>
    %88 = tpu.matmul %87, %73, %cst_32 {dimension_numbers = #tpu.dot_dimension_numbers<[2], [1], [1], [2], [0, 0, 0, 1, 1, 2], [0], [0]>} : vector<2x8x8xbf16>, vector<2x8x8xbf16>, vector<2x8x8xf32> -> vector<2x8x8xf32>
    "tpu.trace_stop"() : () -> ()
    %89 = vector.extract_strided_slice %44 {offsets = [0, 0, 16], sizes = [2, 8, 8], strides = [1, 1, 1]} : vector<2x8x32xf32> to vector<2x8x8xf32>
    %90 = arith.truncf %89 : vector<2x8x8xf32> to vector<2x8x8xbf16>
    %91 = vector.extract_strided_slice %45 {offsets = [0, 0, 16], sizes = [2, 8, 8], strides = [1, 1, 1]} : vector<2x8x32xf32> to vector<2x8x8xf32>
    %92 = arith.truncf %91 : vector<2x8x8xf32> to vector<2x8x8xbf16>
    %93 = vector.extract_strided_slice %46 {offsets = [0, 0, 16], sizes = [2, 8, 8], strides = [1, 1, 1]} : vector<2x8x32xf32> to vector<2x8x8xf32>
    %94 = arith.truncf %93 : vector<2x8x8xf32> to vector<2x8x8xbf16>
    "tpu.trace_start"() <{level = 10 : i32, message = "bqd,bkd->bqk"}> : () -> ()
    %cst_33 = arith.constant dense<0.000000e+00> : vector<2x8x8xf32>
    %95 = tpu.matmul %90, %92, %cst_33 {dimension_numbers = #tpu.dot_dimension_numbers<[2], [2], [1], [1], [0, 0, 0, 1, 1, 1], [0], [0]>} : vector<2x8x8xbf16>, vector<2x8x8xbf16>, vector<2x8x8xf32> -> vector<2x8x8xf32>
    "tpu.trace_stop"() : () -> ()
    %cst_34 = arith.constant 0.353553385 : f32
    %96 = vector.broadcast %cst_34 : f32 to vector<2x8x8xf32>
    %97 = arith.mulf %95, %96 : vector<2x8x8xf32>
    %cst_35 = arith.constant dense<0xFF800000> : vector<2x8xf32>
    %98 = vector.multi_reduction <maximumf>, %97, %cst_35 [2] : vector<2x8x8xf32> to vector<2x8xf32>
    %99 = vector.shape_cast %98 : vector<2x8xf32> to vector<2x8x1xf32>
    %100 = vector.broadcast %99 : vector<2x8x1xf32> to vector<2x8x8xf32>
    %101 = arith.subf %97, %100 : vector<2x8x8xf32>
    %102 = math.exp %101 : vector<2x8x8xf32>
    %cst_36 = arith.constant dense<0.000000e+00> : vector<2x8xf32>
    %103 = vector.multi_reduction <add>, %102, %cst_36 [2] : vector<2x8x8xf32> to vector<2x8xf32>
    %104 = vector.shape_cast %103 : vector<2x8xf32> to vector<2x8x1xf32>
    %105 = tpu.reciprocal %104 {approx = true} : vector<2x8x1xf32> -> vector<2x8x1xf32>
    %106 = vector.broadcast %105 : vector<2x8x1xf32> to vector<2x8x8xf32>
    %107 = arith.mulf %102, %106 : vector<2x8x8xf32>
    %108 = arith.truncf %107 : vector<2x8x8xf32> to vector<2x8x8xbf16>
    "tpu.trace_start"() <{level = 10 : i32, message = "bqk,bkd->bqd"}> : () -> ()
    %cst_37 = arith.constant dense<0.000000e+00> : vector<2x8x8xf32>
    %109 = tpu.matmul %108, %94, %cst_37 {dimension_numbers = #tpu.dot_dimension_numbers<[2], [1], [1], [2], [0, 0, 0, 1, 1, 2], [0], [0]>} : vector<2x8x8xbf16>, vector<2x8x8xbf16>, vector<2x8x8xf32> -> vector<2x8x8xf32>
    "tpu.trace_stop"() : () -> ()
    %110 = vector.extract_strided_slice %44 {offsets = [0, 0, 24], sizes = [2, 8, 8], strides = [1, 1, 1]} : vector<2x8x32xf32> to vector<2x8x8xf32>
    %111 = arith.truncf %110 : vector<2x8x8xf32> to vector<2x8x8xbf16>
    %112 = vector.extract_strided_slice %45 {offsets = [0, 0, 24], sizes = [2, 8, 8], strides = [1, 1, 1]} : vector<2x8x32xf32> to vector<2x8x8xf32>
    %113 = arith.truncf %112 : vector<2x8x8xf32> to vector<2x8x8xbf16>
    %114 = vector.extract_strided_slice %46 {offsets = [0, 0, 24], sizes = [2, 8, 8], strides = [1, 1, 1]} : vector<2x8x32xf32> to vector<2x8x8xf32>
    %115 = arith.truncf %114 : vector<2x8x8xf32> to vector<2x8x8xbf16>
    "tpu.trace_start"() <{level = 10 : i32, message = "bqd,bkd->bqk"}> : () -> ()
    %cst_38 = arith.constant dense<0.000000e+00> : vector<2x8x8xf32>
    %116 = tpu.matmul %111, %113, %cst_38 {dimension_numbers = #tpu.dot_dimension_numbers<[2], [2], [1], [1], [0, 0, 0, 1, 1, 1], [0], [0]>} : vector<2x8x8xbf16>, vector<2x8x8xbf16>, vector<2x8x8xf32> -> vector<2x8x8xf32>
    "tpu.trace_stop"() : () -> ()
    %cst_39 = arith.constant 0.353553385 : f32
    %117 = vector.broadcast %cst_39 : f32 to vector<2x8x8xf32>
    %118 = arith.mulf %116, %117 : vector<2x8x8xf32>
    %cst_40 = arith.constant dense<0xFF800000> : vector<2x8xf32>
    %119 = vector.multi_reduction <maximumf>, %118, %cst_40 [2] : vector<2x8x8xf32> to vector<2x8xf32>
    %120 = vector.shape_cast %119 : vector<2x8xf32> to vector<2x8x1xf32>
    %121 = vector.broadcast %120 : vector<2x8x1xf32> to vector<2x8x8xf32>
    %122 = arith.subf %118, %121 : vector<2x8x8xf32>
    %123 = math.exp %122 : vector<2x8x8xf32>
    %cst_41 = arith.constant dense<0.000000e+00> : vector<2x8xf32>
    %124 = vector.multi_reduction <add>, %123, %cst_41 [2] : vector<2x8x8xf32> to vector<2x8xf32>
    %125 = vector.shape_cast %124 : vector<2x8xf32> to vector<2x8x1xf32>
    %126 = tpu.reciprocal %125 {approx = true} : vector<2x8x1xf32> -> vector<2x8x1xf32>
    %127 = vector.broadcast %126 : vector<2x8x1xf32> to vector<2x8x8xf32>
    %128 = arith.mulf %123, %127 : vector<2x8x8xf32>
    %129 = arith.truncf %128 : vector<2x8x8xf32> to vector<2x8x8xbf16>
    "tpu.trace_start"() <{level = 10 : i32, message = "bqk,bkd->bqd"}> : () -> ()
    %cst_42 = arith.constant dense<0.000000e+00> : vector<2x8x8xf32>
    %130 = tpu.matmul %129, %115, %cst_42 {dimension_numbers = #tpu.dot_dimension_numbers<[2], [1], [1], [2], [0, 0, 0, 1, 1, 2], [0], [0]>} : vector<2x8x8xbf16>, vector<2x8x8xbf16>, vector<2x8x8xf32> -> vector<2x8x8xf32>
    "tpu.trace_stop"() : () -> ()
    %131 = tpu.concatenate %67, %88, %109, %130 in 2 : vector<2x8x8xf32>, vector<2x8x8xf32>, vector<2x8x8xf32>, vector<2x8x8xf32> -> vector<2x8x32xf32>
    %132 = vector.shape_cast %131 : vector<2x8x32xf32> to vector<16x32xf32>
    %133 = arith.truncf %132 : vector<16x32xf32> to vector<16x32xbf16>
    %c0_43 = arith.constant 0 : index
    %c0_44 = arith.constant 0 : index
    %134 = vector.load %arg8[%c0_43, %c0_44] : memref<32x32xbf16, #tpu.memory_space<vmem>>, vector<32x32xbf16>
    %cst_45 = arith.constant dense<0.000000e+00> : vector<16x32xf32>
    %135 = tpu.matmul %133, %134, %cst_45 {dimension_numbers = #tpu.dot_dimension_numbers<[1], [0], [0], [1], [0, 0, 1, 1], [], []>} : vector<16x32xbf16>, vector<32x32xbf16>, vector<16x32xf32> -> vector<16x32xf32>
    %c0_46 = arith.constant 0 : index
    %c0_47 = arith.constant 0 : index
    %136 = vector.load %arg9[%c0_46, %c0_47] : memref<1x32xf32, #tpu.memory_space<vmem>>, vector<1x32xf32>
    %137 = vector.broadcast %136 : vector<1x32xf32> to vector<16x32xf32>
    %138 = arith.addf %135, %137 : vector<16x32xf32>
    %139 = vector.shape_cast %138 : vector<16x32xf32> to vector<2x8x32xf32>
    %140 = arith.addf %0, %139 : vector<2x8x32xf32>
    %c0_48 = arith.constant 0 : index
    %c0_49 = arith.constant 0 : index
    %c0_50 = arith.constant 0 : index
    %141 = vector.load %arg10[%c0_48, %c0_49, %c0_50] : memref<2x8x32xf32, #tpu.memory_space<vmem>>, vector<2x8x32xf32>
    tpu.vector_store %arg10[%c0_48, %c0_49, %c0_50], %140 {strides = array<i32>} : memref<2x8x32xf32, #tpu.memory_space<vmem>>, vector<2x8x32xf32>,
    return
  }
}

module attributes {stable_mosaic.version = 11 : i64} {
  func.func @cross_attn_masked_kernel(%arg0: memref<2x8x32xf32, #tpu.memory_space<vmem>>, %arg1: memref<2x8x32xf32, #tpu.memory_space<vmem>>, %arg2: memref<1x32xf32, #tpu.memory_space<vmem>>, %arg3: memref<1x32xf32, #tpu.memory_space<vmem>>, %arg4: memref<32x32xbf16, #tpu.memory_space<vmem>>, %arg5: memref<1x32xf32, #tpu.memory_space<vmem>>, %arg6: memref<32x64xbf16, #tpu.memory_space<vmem>>, %arg7: memref<1x64xf32, #tpu.memory_space<vmem>>, %arg8: memref<32x32xbf16, #tpu.memory_space<vmem>>, %arg9: memref<1x32xf32, #tpu.memory_space<vmem>>, %arg10: memref<2x1x8xf32, #tpu.memory_space<vmem>>, %arg11: memref<2x8x32xf32, #tpu.memory_space<vmem>>) attributes {dimension_semantics = [], scalar_prefetch = 0 : i64, scratch_operands = 0 : i64, tpu.core_type = #tpu.core_type<tc>} {
    %c0 = arith.constant 0 : index
    %c0_0 = arith.constant 0 : index
    %c0_1 = arith.constant 0 : index
    %0 = vector.load %arg10[%c0, %c0_0, %c0_1] : memref<2x1x8xf32, #tpu.memory_space<vmem>>, vector<2x1x8xf32>
    %c0_2 = arith.constant 0 : index
    %c0_3 = arith.constant 0 : index
    %c0_4 = arith.constant 0 : index
    %1 = vector.load %arg0[%c0_2, %c0_3, %c0_4] : memref<2x8x32xf32, #tpu.memory_space<vmem>>, vector<2x8x32xf32>
    %c0_5 = arith.constant 0 : index
    %c0_6 = arith.constant 0 : index
    %c0_7 = arith.constant 0 : index
    %2 = vector.load %arg1[%c0_5, %c0_6, %c0_7] : memref<2x8x32xf32, #tpu.memory_space<vmem>>, vector<2x8x32xf32>
    %c0_8 = arith.constant 0 : index
    %c0_9 = arith.constant 0 : index
    %3 = vector.load %arg2[%c0_8, %c0_9] : memref<1x32xf32, #tpu.memory_space<vmem>>, vector<1x32xf32>
    %c0_10 = arith.constant 0 : index
    %c0_11 = arith.constant 0 : index
    %4 = vector.load %arg3[%c0_10, %c0_11] : memref<1x32xf32, #tpu.memory_space<vmem>>, vector<1x32xf32>
    %cst = arith.constant dense<0.000000e+00> : vector<2x8xf32>
    %5 = vector.multi_reduction <add>, %1, %cst [2] : vector<2x8x32xf32> to vector<2x8xf32>
    %6 = vector.shape_cast %5 : vector<2x8xf32> to vector<2x8x1xf32>
    %cst_12 = arith.constant 3.200000e+01 : f32
    %7 = vector.broadcast %cst_12 : f32 to vector<2x8x1xf32>
    %8 = arith.divf %6, %7 : vector<2x8x1xf32>
    %9 = vector.broadcast %8 : vector<2x8x1xf32> to vector<2x8x32xf32>
    %10 = arith.subf %1, %9 : vector<2x8x32xf32>
    %11 = arith.mulf %10, %10 : vector<2x8x32xf32>
    %cst_13 = arith.constant dense<0.000000e+00> : vector<2x8xf32>
    %12 = vector.multi_reduction <add>, %11, %cst_13 [2] : vector<2x8x32xf32> to vector<2x8xf32>
    %13 = vector.shape_cast %12 : vector<2x8xf32> to vector<2x8x1xf32>
    %cst_14 = arith.constant 3.200000e+01 : f32
    %14 = vector.broadcast %cst_14 : f32 to vector<2x8x1xf32>
    %15 = arith.divf %13, %14 : vector<2x8x1xf32>
    %16 = vector.broadcast %8 : vector<2x8x1xf32> to vector<2x8x32xf32>
    %17 = arith.subf %1, %16 : vector<2x8x32xf32>
    %cst_15 = arith.constant 9.99999974E-6 : f32
    %18 = vector.broadcast %cst_15 : f32 to vector<2x8x1xf32>
    %19 = arith.addf %15, %18 : vector<2x8x1xf32>
    %20 = math.rsqrt %19 : vector<2x8x1xf32>
    %21 = vector.broadcast %20 : vector<2x8x1xf32> to vector<2x8x32xf32>
    %22 = arith.mulf %17, %21 : vector<2x8x32xf32>
    %23 = vector.shape_cast %3 : vector<1x32xf32> to vector<1x1x32xf32>
    %24 = vector.broadcast %23 : vector<1x1x32xf32> to vector<2x8x32xf32>
    %25 = arith.mulf %22, %24 : vector<2x8x32xf32>
    %26 = vector.shape_cast %4 : vector<1x32xf32> to vector<1x1x32xf32>
    %27 = vector.broadcast %26 : vector<1x1x32xf32> to vector<2x8x32xf32>
    %28 = arith.addf %25, %27 : vector<2x8x32xf32>
    %29 = vector.shape_cast %28 : vector<2x8x32xf32> to vector<16x32xf32>
    %30 = arith.truncf %29 : vector<16x32xf32> to vector<16x32xbf16>
    %c0_16 = arith.constant 0 : index
    %c0_17 = arith.constant 0 : index
    %31 = vector.load %arg4[%c0_16, %c0_17] : memref<32x32xbf16, #tpu.memory_space<vmem>>, vector<32x32xbf16>
    %cst_18 = arith.constant dense<0.000000e+00> : vector<16x32xf32>
    %32 = tpu.matmul %30, %31, %cst_18 {dimension_numbers = #tpu.dot_dimension_numbers<[1], [0], [0], [1], [0, 0, 1, 1], [], []>} : vector<16x32xbf16>, vector<32x32xbf16>, vector<16x32xf32> -> vector<16x32xf32>
    %c0_19 = arith.constant 0 : index
    %c0_20 = arith.constant 0 : index
    %33 = vector.load %arg5[%c0_19, %c0_20] : memref<1x32xf32, #tpu.memory_space<vmem>>, vector<1x32xf32>
    %34 = vector.broadcast %33 : vector<1x32xf32> to vector<16x32xf32>
    %35 = arith.addf %32, %34 : vector<16x32xf32>
    %36 = vector.shape_cast %2 : vector<2x8x32xf32> to vector<16x32xf32>
    %37 = arith.truncf %36 : vector<16x32xf32> to vector<16x32xbf16>
    %c0_21 = arith.constant 0 : index
    %c0_22 = arith.constant 0 : index
    %38 = vector.load %arg6[%c0_21, %c0_22] : memref<32x64xbf16, #tpu.memory_space<vmem>>, vector<32x64xbf16>
    %cst_23 = arith.constant dense<0.000000e+00> : vector<16x64xf32>
    %39 = tpu.matmul %37, %38, %cst_23 {dimension_numbers = #tpu.dot_dimension_numbers<[1], [0], [0], [1], [0, 0, 1, 1], [], []>} : vector<16x32xbf16>, vector<32x64xbf16>, vector<16x64xf32> -> vector<16x64xf32>
    %c0_24 = arith.constant 0 : index
    %c0_25 = arith.constant 0 : index
    %40 = vector.load %arg7[%c0_24, %c0_25] : memref<1x64xf32, #tpu.memory_space<vmem>>, vector<1x64xf32>
    %41 = vector.broadcast %40 : vector<1x64xf32> to vector<16x64xf32>
    %42 = arith.addf %39, %41 : vector<16x64xf32>
    %43 = vector.extract_strided_slice %42 {offsets = [0, 0], sizes = [16, 32], strides = [1, 1]} : vector<16x64xf32> to vector<16x32xf32>
    %44 = vector.extract_strided_slice %42 {offsets = [0, 32], sizes = [16, 32], strides = [1, 1]} : vector<16x64xf32> to vector<16x32xf32>
    %45 = vector.shape_cast %35 : vector<16x32xf32> to vector<2x8x32xf32>
    %46 = vector.shape_cast %43 : vector<16x32xf32> to vector<2x8x32xf32>
    %47 = vector.shape_cast %44 : vector<16x32xf32> to vector<2x8x32xf32>
    %48 = vector.extract_strided_slice %45 {offsets = [0, 0, 0], sizes = [2, 8, 8], strides = [1, 1, 1]} : vector<2x8x32xf32> to vector<2x8x8xf32>
    %49 = arith.truncf %48 : vector<2x8x8xf32> to vector<2x8x8xbf16>
    %50 = vector.extract_strided_slice %46 {offsets = [0, 0, 0], sizes = [2, 8, 8], strides = [1, 1, 1]} : vector<2x8x32xf32> to vector<2x8x8xf32>
    %51 = arith.truncf %50 : vector<2x8x8xf32> to vector<2x8x8xbf16>
    %52 = vector.extract_strided_slice %47 {offsets = [0, 0, 0], sizes = [2, 8, 8], strides = [1, 1, 1]} : vector<2x8x32xf32> to vector<2x8x8xf32>
    %53 = arith.truncf %52 : vector<2x8x8xf32> to vector<2x8x8xbf16>
    "tpu.trace_start"() <{level = 10 : i32, message = "bqd,bkd->bqk"}> : () -> ()
    %cst_26 = arith.constant dense<0.000000e+00> : vector<2x8x8xf32>
    %54 = tpu.matmul %49, %51, %cst_26 {dimension_numbers = #tpu.dot_dimension_numbers<[2], [2], [1], [1], [0, 0, 0, 1, 1, 1], [0], [0]>} : vector<2x8x8xbf16>, vector<2x8x8xbf16>, vector<2x8x8xf32> -> vector<2x8x8xf32>
    "tpu.trace_stop"() : () -> ()
    %cst_27 = arith.constant 0.353553385 : f32
    %55 = vector.broadcast %cst_27 : f32 to vector<2x8x8xf32>
    %56 = arith.mulf %54, %55 : vector<2x8x8xf32>
    %cst_28 = arith.constant 0.000000e+00 : f32
    %57 = vector.broadcast %cst_28 : f32 to vector<2x1x8xf32>
    %58 = arith.cmpf oeq, %0, %57 : vector<2x1x8xf32>
    %cst_29 = arith.constant -1.000000e+10 : f32
    %59 = vector.shape_cast %58 : vector<2x1x8xi1> to vector<2x1x8xi1>
    %60 = vector.broadcast %59 : vector<2x1x8xi1> to vector<2x8x8xi1>
    %61 = vector.broadcast %cst_29 : f32 to vector<2x8x8xf32>
    %62 = arith.select %60, %61, %56 : vector<2x8x8xi1>, vector<2x8x8xf32>
    %cst_30 = arith.constant dense<0xFF800000> : vector<2x8xf32>
    %63 = vector.multi_reduction <maximumf>, %62, %cst_30 [2] : vector<2x8x8xf32> to vector<2x8xf32>
    %64 = vector.shape_cast %63 : vector<2x8xf32> to vector<2x8x1xf32>
    %65 = vector.broadcast %64 : vector<2x8x1xf32> to vector<2x8x8xf32>
    %66 = arith.subf %62, %65 : vector<2x8x8xf32>
    %67 = math.exp %66 : vector<2x8x8xf32>
    %cst_31 = arith.constant dense<0.000000e+00> : vector<2x8xf32>
    %68 = vector.multi_reduction <add>, %67, %cst_31 [2] : vector<2x8x8xf32> to vector<2x8xf32>
    %69 = vector.shape_cast %68 : vector<2x8xf32> to vector<2x8x1xf32>
    %70 = tpu.reciprocal %69 {approx = true} : vector<2x8x1xf32> -> vector<2x8x1xf32>
    %71 = vector.broadcast %70 : vector<2x8x1xf32> to vector<2x8x8xf32>
    %72 = arith.mulf %67, %71 : vector<2x8x8xf32>
    %73 = arith.truncf %72 : vector<2x8x8xf32> to vector<2x8x8xbf16>
    "tpu.trace_start"() <{level = 10 : i32, message = "bqk,bkd->bqd"}> : () -> ()
    %cst_32 = arith.constant dense<0.000000e+00> : vector<2x8x8xf32>
    %74 = tpu.matmul %73, %53, %cst_32 {dimension_numbers = #tpu.dot_dimension_numbers<[2], [1], [1], [2], [0, 0, 0, 1, 1, 2], [0], [0]>} : vector<2x8x8xbf16>, vector<2x8x8xbf16>, vector<2x8x8xf32> -> vector<2x8x8xf32>
    "tpu.trace_stop"() : () -> ()
    %75 = vector.extract_strided_slice %45 {offsets = [0, 0, 8], sizes = [2, 8, 8], strides = [1, 1, 1]} : vector<2x8x32xf32> to vector<2x8x8xf32>
    %76 = arith.truncf %75 : vector<2x8x8xf32> to vector<2x8x8xbf16>
    %77 = vector.extract_strided_slice %46 {offsets = [0, 0, 8], sizes = [2, 8, 8], strides = [1, 1, 1]} : vector<2x8x32xf32> to vector<2x8x8xf32>
    %78 = arith.truncf %77 : vector<2x8x8xf32> to vector<2x8x8xbf16>
    %79 = vector.extract_strided_slice %47 {offsets = [0, 0, 8], sizes = [2, 8, 8], strides = [1, 1, 1]} : vector<2x8x32xf32> to vector<2x8x8xf32>
    %80 = arith.truncf %79 : vector<2x8x8xf32> to vector<2x8x8xbf16>
    "tpu.trace_start"() <{level = 10 : i32, message = "bqd,bkd->bqk"}> : () -> ()
    %cst_33 = arith.constant dense<0.000000e+00> : vector<2x8x8xf32>
    %81 = tpu.matmul %76, %78, %cst_33 {dimension_numbers = #tpu.dot_dimension_numbers<[2], [2], [1], [1], [0, 0, 0, 1, 1, 1], [0], [0]>} : vector<2x8x8xbf16>, vector<2x8x8xbf16>, vector<2x8x8xf32> -> vector<2x8x8xf32>
    "tpu.trace_stop"() : () -> ()
    %cst_34 = arith.constant 0.353553385 : f32
    %82 = vector.broadcast %cst_34 : f32 to vector<2x8x8xf32>
    %83 = arith.mulf %81, %82 : vector<2x8x8xf32>
    %cst_35 = arith.constant 0.000000e+00 : f32
    %84 = vector.broadcast %cst_35 : f32 to vector<2x1x8xf32>
    %85 = arith.cmpf oeq, %0, %84 : vector<2x1x8xf32>
    %cst_36 = arith.constant -1.000000e+10 : f32
    %86 = vector.shape_cast %85 : vector<2x1x8xi1> to vector<2x1x8xi1>
    %87 = vector.broadcast %86 : vector<2x1x8xi1> to vector<2x8x8xi1>
    %88 = vector.broadcast %cst_36 : f32 to vector<2x8x8xf32>
    %89 = arith.select %87, %88, %83 : vector<2x8x8xi1>, vector<2x8x8xf32>
    %cst_37 = arith.constant dense<0xFF800000> : vector<2x8xf32>
    %90 = vector.multi_reduction <maximumf>, %89, %cst_37 [2] : vector<2x8x8xf32> to vector<2x8xf32>
    %91 = vector.shape_cast %90 : vector<2x8xf32> to vector<2x8x1xf32>
    %92 = vector.broadcast %91 : vector<2x8x1xf32> to vector<2x8x8xf32>
    %93 = arith.subf %89, %92 : vector<2x8x8xf32>
    %94 = math.exp %93 : vector<2x8x8xf32>
    %cst_38 = arith.constant dense<0.000000e+00> : vector<2x8xf32>
    %95 = vector.multi_reduction <add>, %94, %cst_38 [2] : vector<2x8x8xf32> to vector<2x8xf32>
    %96 = vector.shape_cast %95 : vector<2x8xf32> to vector<2x8x1xf32>
    %97 = tpu.reciprocal %96 {approx = true} : vector<2x8x1xf32> -> vector<2x8x1xf32>
    %98 = vector.broadcast %97 : vector<2x8x1xf32> to vector<2x8x8xf32>
    %99 = arith.mulf %94, %98 : vector<2x8x8xf32>
    %100 = arith.truncf %99 : vector<2x8x8xf32> to vector<2x8x8xbf16>
    "tpu.trace_start"() <{level = 10 : i32, message = "bqk,bkd->bqd"}> : () -> ()
    %cst_39 = arith.constant dense<0.000000e+00> : vector<2x8x8xf32>
    %101 = tpu.matmul %100, %80, %cst_39 {dimension_numbers = #tpu.dot_dimension_numbers<[2], [1], [1], [2], [0, 0, 0, 1, 1, 2], [0], [0]>} : vector<2x8x8xbf16>, vector<2x8x8xbf16>, vector<2x8x8xf32> -> vector<2x8x8xf32>
    "tpu.trace_stop"() : () -> ()
    %102 = vector.extract_strided_slice %45 {offsets = [0, 0, 16], sizes = [2, 8, 8], strides = [1, 1, 1]} : vector<2x8x32xf32> to vector<2x8x8xf32>
    %103 = arith.truncf %102 : vector<2x8x8xf32> to vector<2x8x8xbf16>
    %104 = vector.extract_strided_slice %46 {offsets = [0, 0, 16], sizes = [2, 8, 8], strides = [1, 1, 1]} : vector<2x8x32xf32> to vector<2x8x8xf32>
    %105 = arith.truncf %104 : vector<2x8x8xf32> to vector<2x8x8xbf16>
    %106 = vector.extract_strided_slice %47 {offsets = [0, 0, 16], sizes = [2, 8, 8], strides = [1, 1, 1]} : vector<2x8x32xf32> to vector<2x8x8xf32>
    %107 = arith.truncf %106 : vector<2x8x8xf32> to vector<2x8x8xbf16>
    "tpu.trace_start"() <{level = 10 : i32, message = "bqd,bkd->bqk"}> : () -> ()
    %cst_40 = arith.constant dense<0.000000e+00> : vector<2x8x8xf32>
    %108 = tpu.matmul %103, %105, %cst_40 {dimension_numbers = #tpu.dot_dimension_numbers<[2], [2], [1], [1], [0, 0, 0, 1, 1, 1], [0], [0]>} : vector<2x8x8xbf16>, vector<2x8x8xbf16>, vector<2x8x8xf32> -> vector<2x8x8xf32>
    "tpu.trace_stop"() : () -> ()
    %cst_41 = arith.constant 0.353553385 : f32
    %109 = vector.broadcast %cst_41 : f32 to vector<2x8x8xf32>
    %110 = arith.mulf %108, %109 : vector<2x8x8xf32>
    %cst_42 = arith.constant 0.000000e+00 : f32
    %111 = vector.broadcast %cst_42 : f32 to vector<2x1x8xf32>
    %112 = arith.cmpf oeq, %0, %111 : vector<2x1x8xf32>
    %cst_43 = arith.constant -1.000000e+10 : f32
    %113 = vector.shape_cast %112 : vector<2x1x8xi1> to vector<2x1x8xi1>
    %114 = vector.broadcast %113 : vector<2x1x8xi1> to vector<2x8x8xi1>
    %115 = vector.broadcast %cst_43 : f32 to vector<2x8x8xf32>
    %116 = arith.select %114, %115, %110 : vector<2x8x8xi1>, vector<2x8x8xf32>
    %cst_44 = arith.constant dense<0xFF800000> : vector<2x8xf32>
    %117 = vector.multi_reduction <maximumf>, %116, %cst_44 [2] : vector<2x8x8xf32> to vector<2x8xf32>
    %118 = vector.shape_cast %117 : vector<2x8xf32> to vector<2x8x1xf32>
    %119 = vector.broadcast %118 : vector<2x8x1xf32> to vector<2x8x8xf32>
    %120 = arith.subf %116, %119 : vector<2x8x8xf32>
    %121 = math.exp %120 : vector<2x8x8xf32>
    %cst_45 = arith.constant dense<0.000000e+00> : vector<2x8xf32>
    %122 = vector.multi_reduction <add>, %121, %cst_45 [2] : vector<2x8x8xf32> to vector<2x8xf32>
    %123 = vector.shape_cast %122 : vector<2x8xf32> to vector<2x8x1xf32>
    %124 = tpu.reciprocal %123 {approx = true} : vector<2x8x1xf32> -> vector<2x8x1xf32>
    %125 = vector.broadcast %124 : vector<2x8x1xf32> to vector<2x8x8xf32>
    %126 = arith.mulf %121, %125 : vector<2x8x8xf32>
    %127 = arith.truncf %126 : vector<2x8x8xf32> to vector<2x8x8xbf16>
    "tpu.trace_start"() <{level = 10 : i32, message = "bqk,bkd->bqd"}> : () -> ()
    %cst_46 = arith.constant dense<0.000000e+00> : vector<2x8x8xf32>
    %128 = tpu.matmul %127, %107, %cst_46 {dimension_numbers = #tpu.dot_dimension_numbers<[2], [1], [1], [2], [0, 0, 0, 1, 1, 2], [0], [0]>} : vector<2x8x8xbf16>, vector<2x8x8xbf16>, vector<2x8x8xf32> -> vector<2x8x8xf32>
    "tpu.trace_stop"() : () -> ()
    %129 = vector.extract_strided_slice %45 {offsets = [0, 0, 24], sizes = [2, 8, 8], strides = [1, 1, 1]} : vector<2x8x32xf32> to vector<2x8x8xf32>
    %130 = arith.truncf %129 : vector<2x8x8xf32> to vector<2x8x8xbf16>
    %131 = vector.extract_strided_slice %46 {offsets = [0, 0, 24], sizes = [2, 8, 8], strides = [1, 1, 1]} : vector<2x8x32xf32> to vector<2x8x8xf32>
    %132 = arith.truncf %131 : vector<2x8x8xf32> to vector<2x8x8xbf16>
    %133 = vector.extract_strided_slice %47 {offsets = [0, 0, 24], sizes = [2, 8, 8], strides = [1, 1, 1]} : vector<2x8x32xf32> to vector<2x8x8xf32>
    %134 = arith.truncf %133 : vector<2x8x8xf32> to vector<2x8x8xbf16>
    "tpu.trace_start"() <{level = 10 : i32, message = "bqd,bkd->bqk"}> : () -> ()
    %cst_47 = arith.constant dense<0.000000e+00> : vector<2x8x8xf32>
    %135 = tpu.matmul %130, %132, %cst_47 {dimension_numbers = #tpu.dot_dimension_numbers<[2], [2], [1], [1], [0, 0, 0, 1, 1, 1], [0], [0]>} : vector<2x8x8xbf16>, vector<2x8x8xbf16>, vector<2x8x8xf32> -> vector<2x8x8xf32>
    "tpu.trace_stop"() : () -> ()
    %cst_48 = arith.constant 0.353553385 : f32
    %136 = vector.broadcast %cst_48 : f32 to vector<2x8x8xf32>
    %137 = arith.mulf %135, %136 : vector<2x8x8xf32>
    %cst_49 = arith.constant 0.000000e+00 : f32
    %138 = vector.broadcast %cst_49 : f32 to vector<2x1x8xf32>
    %139 = arith.cmpf oeq, %0, %138 : vector<2x1x8xf32>
    %cst_50 = arith.constant -1.000000e+10 : f32
    %140 = vector.shape_cast %139 : vector<2x1x8xi1> to vector<2x1x8xi1>
    %141 = vector.broadcast %140 : vector<2x1x8xi1> to vector<2x8x8xi1>
    %142 = vector.broadcast %cst_50 : f32 to vector<2x8x8xf32>
    %143 = arith.select %141, %142, %137 : vector<2x8x8xi1>, vector<2x8x8xf32>
    %cst_51 = arith.constant dense<0xFF800000> : vector<2x8xf32>
    %144 = vector.multi_reduction <maximumf>, %143, %cst_51 [2] : vector<2x8x8xf32> to vector<2x8xf32>
    %145 = vector.shape_cast %144 : vector<2x8xf32> to vector<2x8x1xf32>
    %146 = vector.broadcast %145 : vector<2x8x1xf32> to vector<2x8x8xf32>
    %147 = arith.subf %143, %146 : vector<2x8x8xf32>
    %148 = math.exp %147 : vector<2x8x8xf32>
    %cst_52 = arith.constant dense<0.000000e+00> : vector<2x8xf32>
    %149 = vector.multi_reduction <add>, %148, %cst_52 [2] : vector<2x8x8xf32> to vector<2x8xf32>
    %150 = vector.shape_cast %149 : vector<2x8xf32> to vector<2x8x1xf32>
    %151 = tpu.reciprocal %150 {approx = true} : vector<2x8x1xf32> -> vector<2x8x1xf32>
    %152 = vector.broadcast %151 : vector<2x8x1xf32> to vector<2x8x8xf32>
    %153 = arith.mulf %148, %152 : vector<2x8x8xf32>
    %154 = arith.truncf %153 : vector<2x8x8xf32> to vector<2x8x8xbf16>
    "tpu.trace_start"() <{level = 10 : i32, message = "bqk,bkd->bqd"}> : () -> ()
    %cst_53 = arith.constant dense<0.000000e+00> : vector<2x8x8xf32>
    %155 = tpu.matmul %154, %134, %cst_53 {dimension_numbers = #tpu.dot_dimension_numbers<[2], [1], [1], [2], [0, 0, 0, 1, 1, 2], [0], [0]>} : vector<2x8x8xbf16>, vector<2x8x8xbf16>, vector<2x8x8xf32> -> vector<2x8x8xf32>
    "tpu.trace_stop"() : () -> ()
    %156 = tpu.concatenate %74, %101, %128, %155 in 2 : vector<2x8x8xf32>, vector<2x8x8xf32>, vector<2x8x8xf32>, vector<2x8x8xf32> -> vector<2x8x32xf32>
    %157 = vector.shape_cast %156 : vector<2x8x32xf32> to vector<16x32xf32>
    %158 = arith.truncf %157 : vector<16x32xf32> to vector<16x32xbf16>
    %c0_54 = arith.constant 0 : index
    %c0_55 = arith.constant 0 : index
    %159 = vector.load %arg8[%c0_54, %c0_55] : memref<32x32xbf16, #tpu.memory_space<vmem>>, vector<32x32xbf16>
    %cst_56 = arith.constant dense<0.000000e+00> : vector<16x32xf32>
    %160 = tpu.matmul %158, %159, %cst_56 {dimension_numbers = #tpu.dot_dimension_numbers<[1], [0], [0], [1], [0, 0, 1, 1], [], []>} : vector<16x32xbf16>, vector<32x32xbf16>, vector<16x32xf32> -> vector<16x32xf32>
    %c0_57 = arith.constant 0 : index
    %c0_58 = arith.constant 0 : index
    %161 = vector.load %arg9[%c0_57, %c0_58] : memref<1x32xf32, #tpu.memory_space<vmem>>, vector<1x32xf32>
    %162 = vector.broadcast %161 : vector<1x32xf32> to vector<16x32xf32>
    %163 = arith.addf %160, %162 : vector<16x32xf32>
    %164 = vector.shape_cast %163 : vector<16x32xf32> to vector<2x8x32xf32>
    %165 = arith.addf %1, %164 : vector<2x8x32xf32>
    %c0_59 = arith.constant 0 : index
    %c0_60 = arith.constant 0 : index
    %c0_61 = arith.constant 0 : index
    %166 = vector.load %arg11[%c0_59, %c0_60, %c0_61] : memref<2x8x32xf32, #tpu.memory_space<vmem>>, vector<2x8x32xf32>
    tpu.vector_store %arg11[%c0_59, %c0_60, %c0_61], %165 {strides = array<i32>} : memref<2x8x32xf32, #tpu.memory_space<vmem>>, vector<2x8x32xf32>,
    return
  }
}

module attributes {stable_mosaic.version = 11 : i64} {
  func.func @generator_kernel(%arg0: memref<2x8x32xf32, #tpu.memory_space<vmem>>, %arg1: memref<32x128xbf16, #tpu.memory_space<vmem>>, %arg2: memref<1x128xf32, #tpu.memory_space<vmem>>, %arg3: memref<128x128xbf16, #tpu.memory_space<vmem>>, %arg4: memref<1x128xf32, #tpu.memory_space<vmem>>, %arg5: memref<2x8x128xf32, #tpu.memory_space<vmem>>) attributes {dimension_semantics = [], scalar_prefetch = 0 : i64, scratch_operands = 0 : i64, tpu.core_type = #tpu.core_type<tc>} {
    %c0 = arith.constant 0 : index
    %c0_0 = arith.constant 0 : index
    %c0_1 = arith.constant 0 : index
    %0 = vector.load %arg0[%c0, %c0_0, %c0_1] : memref<2x8x32xf32, #tpu.memory_space<vmem>>, vector<2x8x32xf32>
    %1 = vector.shape_cast %0 : vector<2x8x32xf32> to vector<16x32xf32>
    %2 = arith.truncf %1 : vector<16x32xf32> to vector<16x32xbf16>
    %c0_2 = arith.constant 0 : index
    %c0_3 = arith.constant 0 : index
    %3 = vector.load %arg1[%c0_2, %c0_3] : memref<32x128xbf16, #tpu.memory_space<vmem>>, vector<32x128xbf16>
    %cst = arith.constant dense<0.000000e+00> : vector<16x128xf32>
    %4 = tpu.matmul %2, %3, %cst {dimension_numbers = #tpu.dot_dimension_numbers<[1], [0], [0], [1], [0, 0, 1, 1], [], []>} : vector<16x32xbf16>, vector<32x128xbf16>, vector<16x128xf32> -> vector<16x128xf32>
    %c0_4 = arith.constant 0 : index
    %c0_5 = arith.constant 0 : index
    %5 = vector.load %arg2[%c0_4, %c0_5] : memref<1x128xf32, #tpu.memory_space<vmem>>, vector<1x128xf32>
    %6 = vector.broadcast %5 : vector<1x128xf32> to vector<16x128xf32>
    %7 = arith.addf %4, %6 : vector<16x128xf32>
    %cst_6 = arith.constant 0.000000e+00 : f32
    %8 = vector.broadcast %cst_6 : f32 to vector<16x128xf32>
    %9 = arith.maximumf %7, %8 : vector<16x128xf32>
    %10 = arith.truncf %9 : vector<16x128xf32> to vector<16x128xbf16>
    %c0_7 = arith.constant 0 : index
    %c0_8 = arith.constant 0 : index
    %11 = vector.load %arg3[%c0_7, %c0_8] : memref<128x128xbf16, #tpu.memory_space<vmem>>, vector<128x128xbf16>
    %cst_9 = arith.constant dense<0.000000e+00> : vector<16x128xf32>
    %12 = tpu.matmul %10, %11, %cst_9 {dimension_numbers = #tpu.dot_dimension_numbers<[1], [0], [0], [1], [0, 0, 1, 1], [], []>} : vector<16x128xbf16>, vector<128x128xbf16>, vector<16x128xf32> -> vector<16x128xf32>
    %c0_10 = arith.constant 0 : index
    %c0_11 = arith.constant 0 : index
    %13 = vector.load %arg4[%c0_10, %c0_11] : memref<1x128xf32, #tpu.memory_space<vmem>>, vector<1x128xf32>
    %14 = vector.broadcast %13 : vector<1x128xf32> to vector<16x128xf32>
    %15 = arith.addf %12, %14 : vector<16x128xf32>
    %16 = tpu.iota {dimensions = array<i32: 1>} : vector<16x128xi32>
    %c64_i32 = arith.constant 64 : i32
    %17 = vector.broadcast %c64_i32 : i32 to vector<16x128xi32>
    %18 = arith.cmpi slt, %16, %17 : vector<16x128xi32>
    %cst_12 = arith.constant -1.000000e+30 : f32
    %19 = vector.broadcast %cst_12 : f32 to vector<16x128xf32>
    %20 = arith.select %18, %15, %19 : vector<16x128xi1>, vector<16x128xf32>
    %cst_13 = arith.constant dense<0xFF800000> : vector<16xf32>
    %21 = vector.multi_reduction <maximumf>, %20, %cst_13 [1] : vector<16x128xf32> to vector<16xf32>
    %22 = vector.shape_cast %21 : vector<16xf32> to vector<16x1xf32>
    %23 = vector.broadcast %22 : vector<16x1xf32> to vector<16x128xf32>
    %24 = arith.subf %20, %23 : vector<16x128xf32>
    %25 = math.exp %24 : vector<16x128xf32>
    %cst_14 = arith.constant dense<0.000000e+00> : vector<16xf32>
    %26 = vector.multi_reduction <add>, %25, %cst_14 [1] : vector<16x128xf32> to vector<16xf32>
    %27 = vector.shape_cast %26 : vector<16xf32> to vector<16x1xf32>
    %28 = math.log %27 : vector<16x1xf32>
    %29 = vector.broadcast %28 : vector<16x1xf32> to vector<16x128xf32>
    %30 = arith.subf %24, %29 : vector<16x128xf32>
    %31 = vector.shape_cast %30 : vector<16x128xf32> to vector<2x8x128xf32>
    %c0_15 = arith.constant 0 : index
    %c0_16 = arith.constant 0 : index
    %c0_17 = arith.constant 0 : index
    %32 = vector.load %arg5[%c0_15, %c0_16, %c0_17] : memref<2x8x128xf32, #tpu.memory_space<vmem>>, vector<2x8x128xf32>
    tpu.vector_store %arg5[%c0_15, %c0_16, %c0_17], %31 {strides = array<i32>} : memref<2x8x128xf32, #tpu.memory_space<vmem>>, vector<2x8x128xf32>,
    return
  }
}

</mosaic_0001>

<bundles_post_ra>
// kernel: tevc_forward.24
= control target key start
LH: loop header
LB: loop body
LE: loop exit
PB: predicated region body
PF: predicated region fallthrough
CT: control target
= control target key end

     0   :  { %vm16_vm0 = vcmask 261120   ;;  %s137_s0 = inlined_call_operand.vmem [shape: f32[2,8,32], index: 0, kind: input, shape index: {}]   ;;  %s138_s1 = inlined_call_operand.vmem [shape: f32[1,32], index: 1, kind: input, shape index: {}]   ;;  %s139_s2 = inlined_call_operand.vmem [shape: f32[1,32], index: 2, kind: input, shape index: {}]   ;;  %s140_s3 = inlined_call_operand.vmem [shape: f32[2,8,32], index: 3, kind: output, shape index: {}]  }
   0x1   :  { %v14_v0 = vld [vmem:[%s137_s0] sm:$0xff]  ;;  %v15_v1 = vld [vmem:[%s137_s0 + $0x8] sm:$0xff] }
   0x2   :  { %v17_v2 = vsel %vm16_vm0, %v14_v0, 0.0  ;;  %v20_v3 = vsel %vm16_vm0, %v15_v1, 0.0  ;;  %v83_v30 = vld [vmem:[%s138_s1] ss:$0 sm:$0xff] }
   0x3   :  { %18 = vadd.xlane.f32.xlu0 %v17_v2  ;;  %v84_v33 = vld [vmem:[%s139_s2] ss:$0 sm:$0xff] }
   0x7   :  { %21 = vadd.xlane.f32.xlu0 %v20_v3 }
  0x8c   :  { %v19_v4 = vpop.xlane.xlu0 %18 }
  0x8d   :  { %v24_v5 = vmul.f32 0.03125, %v19_v4 }
  0x8f   :  { %v26_v6 = vsub.f32 %v14_v0, %v24_v5 }
  0x90   :  { %v22_v7 = vpop.xlane.xlu0 %21 }
  0x91   :  { %v25_v8 = vmul.f32 0.03125, %v22_v7  ;;  %v28_v9 = vmul.f32 %v26_v6, %v26_v6  ;;  %v60_v31 = vmul.f32 %v83_v30, %v26_v6 }
  0x93   :  { %v27_v10 = vsub.f32 %v15_v1, %v25_v8  ;;  %v30_v11 = vsel %vm16_vm0, %v28_v9, 0.0 }
  0x94   :  { %31 = vadd.xlane.f32.xlu1 %v30_v11 }
  0x95   :  { %v29_v12 = vmul.f32 %v27_v10, %v27_v10  ;;  %v61_v35 = vmul.f32 %v83_v30, %v27_v10 }
  0x97   :  { %v33_v13 = vsel %vm16_vm0, %v29_v12, 0.0 }
  0x98   :  { %34 = vadd.xlane.f32.xlu1 %v33_v13 }
 0x11d   :  { %v32_v14 = vpop.xlane.xlu1 %31 }
 0x11e   :  { %v37_v15 = vmul.f32 0.032258064, %v32_v14 }
 0x120   :  { %85 = vrsqrt.f32 %v37_v15  ;;  %vm41_vm1 = vcmp.eq.f32.partialorder %v37_v15, inf  ;;  %v44_v20 = vand.u32 2147483648, %v37_v15  ;;  %vm43_vm2 = vcmp.eq.f32.partialorder %v37_v15, 0.0 }
 0x121   :  { %v35_v16 = vpop.xlane.xlu1 %34 }
 0x122   :  { %v38_v17 = vmul.f32 0.032258064, %v35_v16 }
 0x124   :  { %87 = vrsqrt.f32 %v38_v17  ;;  %vm48_vm3 = vcmp.eq.f32.partialorder %v38_v17, inf  ;;  %v51_v26 = vand.u32 2147483648, %v38_v17  ;;  %vm50_vm4 = vcmp.eq.f32.partialorder %v38_v17, 0.0 }
 0x12d   :  { %v86_v18 = vpop.eup %85 }
 0x12e   :  { %v40_v19 = vmul.f32 %v86_v18, %v37_v15 }
 0x130   :  { %v42_v21 = vsel %vm41_vm1, %v37_v15, %v40_v19 }
 0x131   :  { %v88_v22 = vpop.eup %87  ;;  %v45_v23 = vsel %vm43_vm2, %v44_v20, %v42_v21 }
 0x132   :  { %v62_v24 = vadd.f32 1e-06, %v45_v23  ;;  %v47_v25 = vmul.f32 %v88_v22, %v38_v17 }
 0x134   :  { %89 = vrcp.f32 %v62_v24  ;;  %v49_v27 = vsel %vm48_vm3, %v38_v17, %v47_v25 }
 0x135   :  { %v52_v28 = vsel %vm50_vm4, %v51_v26, %v49_v27 }
 0x136   :  { %v63_v29 = vadd.f32 1e-06, %v52_v28 }
 0x138   :  { %91 = vrcp.f32 %v63_v29 }
 0x141   :  { %v90_v32 = vpop.eup %89 }
 0x142   :  { %v65_v34 = vmul.f32 %v90_v32, %v60_v31 }
 0x144   :  { %v75_v36 = vadd.f32 %v84_v33, %v65_v34 }
 0x145   :  { %v92_v37 = vpop.eup %91 }
 0x146   :  { %77 = vst.msk [vmem:[%s140_s3] sm:$0xff] %vm16_vm0, %v75_v36  ;;  %v67_v38 = vmul.f32 %v92_v37, %v61_v35 }
 0x148   :  { %v76_v39 = vadd.f32 %v84_v33, %v67_v38 }
 0x14a   :  { %78 = vst.msk [vmem:[%s140_s3 + $0x8] sm:$0xff] %vm16_vm0, %v76_v39 }

// kernel: tevc_forward.21
= control target key start
LH: loop header
LB: loop body
LE: loop exit
PB: predicated region body
PF: predicated region fallthrough
CT: control target
= control target key end

     0   :  { %vm31_vm0 = vcmask 261120   ;;  %v290_v14 = vmov 0.0   ;;  %vm291_vm1 = vmmov 0   ;;  %vm185_vm2 = vcmask 523264   ;;  %s391_s0 = inlined_call_operand.vmem [shape: f32[2,8,32], index: 0, kind: input, shape index: {}]   ;;  %s392_s3 = inlined_call_operand.vmem [shape: bf16[32,64], index: 3, kind: input, shape index: {}]   ;;  %s393_s5 = inlined_call_operand.vmem [shape: bf16[64,32], index: 5, kind: input, shape index: {}]   ;;  %s394_s1 = inlined_call_operand.vmem [shape: f32[1,32], index: 1, kind: input, shape index: {}]   ;;  %s395_s2 = inlined_call_operand.vmem [shape: f32[1,32], index: 2, kind: input, shape index: {}]   ;;  %s396_s4 = inlined_call_operand.vmem [shape: f32[1,64], index: 4, kind: input, shape index: {}]   ;;  %s397_s6 = inlined_call_operand.vmem [shape: f32[1,32], index: 6, kind: input, shape index: {}]   ;;  %s398_s7 = inlined_call_operand.vmem [shape: f32[2,8,32], index: 7, kind: output, shape index: {}]  }
   0x1   :  { %v335_v0 = vld [vmem:[%s391_s0] sm:$0xff]  ;;  %v340_v1 = vld [vmem:[%s391_s0 + $0x8] sm:$0xff]  ;;  %258 = vmatprep.subr.bf16.mxu0 %v290_v14  ;;  %262 = vmatprep.mubr.msk.bf16.mxu0 %vm291_vm1, %v290_v14  ;;  %v282_v17 = vld [vmem:[%s393_s5 + $0x18] sm:$0xff]  }
   0x2   :  { %v32_v2 = vsel %vm31_vm0, %v335_v0, 0.0  ;;  %v35_v3 = vsel %vm31_vm0, %v340_v1, 0.0  ;;  %v280_v15 = vld [vmem:[%s392_s3 + $0x8] sm:$0xff]   ;;  %266 = vmatprep.subr.bf16.mxu1 %v290_v14  ;;  %274 = vmatprep.mubr.msk.bf16.mxu1 %vm291_vm1, %v290_v14  ;;  %v281_v16 = vld [vmem:[%s392_s3] sm:$0xff]   ;;  %v283_v35 = vld [vmem:[%s393_s5 + $0x10] sm:$0xff]  }
   0x3   :  { %33 = vadd.xlane.f32.xlu0 %v32_v2  ;;  %259 = vmatpush3.bf16.msra.mxu0 %v280_v15  ;;  %v238_v26 = vld [vmem:[%s394_s1] ss:$0 sm:$0xff]  ;;  %v284_v36 = vld [vmem:[%s393_s5 + $0x8] sm:$0xff]  }
   0x4   :  { %260 = vmatprep.subr.bf16.mxu0 %v290_v14  ;;  %267 = vmatpush3.bf16.msra.mxu1 %v282_v17  ;;  %v239_v30 = vld [vmem:[%s395_s2] ss:$0 sm:$0xff] }
   0x5   :  { %268 = vmatprep.subr.bf16.mxu1 %v290_v14  ;;  %v285_v37 = vld [vmem:[%s393_s5] sm:$0xff]  }
   0x6   :  { %v240_v38 = vld [vmem:[%s396_s4] ss:$0 sm:$0xff] }
   0x7   :  { %36 = vadd.xlane.f32.xlu0 %v35_v3  ;;  %261 = vmatpush3.bf16.msra.mxu0 %v281_v16  ;;  %v244_v48 = vld [vmem:[%s397_s6] ss:$0 sm:$0xff] }
   0x8   :  { %269 = vmatpush3.bf16.msra.mxu1 %v283_v35 }
   0x9   :  { %270 = vmatprep.subr.bf16.mxu1 %v290_v14 }
   0xc   :  { %271 = vmatpush3.bf16.msra.mxu1 %v284_v36 }
   0xd   :  { %272 = vmatprep.subr.bf16.mxu1 %v290_v14 }
  0x10   :  { %273 = vmatpush3.bf16.msra.mxu1 %v285_v37 }
  0x8c   :  { %v34_v4 = vpop.xlane.xlu0 %33 }
  0x8d   :  { %v39_v5 = vmul.f32 0.03125, %v34_v4 }
  0x8f   :  { %v41_v6 = vsub.f32 %v335_v0, %v39_v5 }
  0x90   :  { %v37_v7 = vpop.xlane.xlu0 %36 }
  0x91   :  { %v40_v8 = vmul.f32 0.03125, %v37_v7  ;;  %v43_v9 = vmul.f32 %v41_v6, %v41_v6 }
  0x93   :  { %v42_v10 = vsub.f32 %v340_v1, %v40_v8  ;;  %v45_v11 = vsel %vm31_vm0, %v43_v9, 0.0 }
  0x94   :  { %46 = vadd.xlane.f32.xlu1 %v45_v11 }
  0x95   :  { %v44_v12 = vmul.f32 %v42_v10, %v42_v10 }
  0x97   :  { %v48_v13 = vsel %vm31_vm0, %v44_v12, 0.0 }
  0x98   :  { %49 = vadd.xlane.f32.xlu1 %v48_v13 }
 0x11d   :  { %v47_v18 = vpop.xlane.xlu1 %46 }
 0x11e   :  { %v51_v19 = vmul.f32 0.03125, %v47_v18 }
 0x120   :  { %v53_v20 = vadd.f32 1e-05, %v51_v19 }
 0x121   :  { %v50_v21 = vpop.xlane.xlu1 %49 }
 0x122   :  { %286 = vrsqrt.f32 %v53_v20  ;;  %v52_v22 = vmul.f32 0.03125, %v50_v21 }
 0x124   :  { %v54_v23 = vadd.f32 1e-05, %v52_v22 }
 0x126   :  { %288 = vrsqrt.f32 %v54_v23 }
 0x12f   :  { %v287_v24 = vpop.eup %286 }
 0x130   :  { %v57_v25 = vmul.f32 %v287_v24, %v41_v6 }
 0x132   :  { %v65_v29 = vmul.f32 %v238_v26, %v57_v25 }
 0x133   :  { %v289_v27 = vpop.eup %288 }
 0x134   :  { %v58_v28 = vmul.f32 %v289_v27, %v42_v10  ;;  %v73_v32 = vadd.f32 %v239_v30, %v65_v29 }
 0x136   :  { %v66_v31 = vmul.f32 %v238_v26, %v58_v28 }
 0x138   :  { %v74_v33 = vadd.f32 %v239_v30, %v66_v31 }
 0x13a   :  { %v75_v34 = vpack.c.bf16 %v74_v33, %v73_v32 }
 0x13c   :  { %263 = vmatmul.mubr.msk.bf16.vlgmr.msra.gmra.mxu0 %vm31_vm0, %v75_v34 }
 0x1fc   :  { %v136_v39 = vpop.f32.mrf.mxu0 }
 0x1fd   :  { %v137_v41 = vadd.f32 %v240_v38, %v136_v39 }
 0x1fe   :  { %v264_v40 = vpop.f32.mrf.mxu0 }
 0x1ff   :  { %v143_v45 = vmax.f32 %v137_v41, 0.0 }
 0x200   :  { %v139_v42 = vpop.f32.mrf.mxu0 }
 0x201   :  { %v140_v43 = vadd.f32 %v240_v38, %v139_v42 }
 0x202   :  { %v265_v44 = vpop.f32.mrf.mxu0 }
 0x203   :  { %v144_v46 = vmax.f32 %v140_v43, 0.0 }
 0x205   :  { %v145_v47 = vpack.c.bf16 %v144_v46, %v143_v45 }
 0x207   :  { %275 = vmatmul.mubr.msk.bf16.vlgmr.msra.gmra.mxu1 %vm185_vm2, %v145_v47 }
 0x2c7   :  { %v223_v49 = vpop.f32.mrf.mxu1 }
 0x2c8   :  { %v224_v50 = vadd.f32 %v244_v48, %v223_v49 }
 0x2c9   :  { %v276_v51 = vpop.f32.mrf.mxu1 }
 0x2ca   :  { %v230_v52 = vadd.f32 %v224_v50, %v335_v0 }
 0x2cb   :  { %v226_v53 = vpop.f32.mrf.mxu1 }
 0x2cc   :  { %232 = vst.msk [vmem:[%s398_s7] sm:$0xff] %vm31_vm0, %v230_v52  ;;  %v227_v54 = vadd.f32 %v244_v48, %v226_v53 }
 0x2cd   :  { %v277_v55 = vpop.f32.mrf.mxu1 }
 0x2ce   :  { %v231_v56 = vadd.f32 %v227_v54, %v340_v1 }
 0x2d0   :  { %233 = vst.msk [vmem:[%s398_s7 + $0x8] sm:$0xff] %vm31_vm0, %v231_v56 }

// kernel: tevc_forward.20
= control target key start
LH: loop header
LB: loop body
LE: loop exit
PB: predicated region body
PF: predicated region fallthrough
CT: control target
= control target key end

     0   :  { %vm34_vm0 = vcmask 261120   ;;  %v1416_v14 = vmov 0.0   ;;  %vm1417_vm1 = vmmov 0   ;;  %vm153_vm2 = vcmask 64512   ;;  %s1421_s19 = smov 88   ;;  %s1422_s20 = smov 120   ;;  %s1709_s0 = inlined_call_operand.vmem [shape: f32[2,8,32], index: 0, kind: input, shape index: {}]   ;;  %s1710_s3 = inlined_call_operand.vmem [shape: bf16[32,96], index: 3, kind: input, shape index: {}]   ;;  %s1711_s1 = inlined_call_operand.vmem [shape: f32[1,32], index: 1, kind: input, shape index: {}]   ;;  %s1712_s2 = inlined_call_operand.vmem [shape: f32[1,32], index: 2, kind: input, shape index: {}]   ;;  %s1713_s4 = inlined_call_operand.vmem [shape: f32[1,96], index: 4, kind: input, shape index: {}]   ;;  %s1714_s7 = inlined_call_operand.vmem [shape: f32[2,1,8], index: 7, kind: input, shape index: {}]   ;;  %s1715_s5 = inlined_call_operand.vmem [shape: bf16[32,32], index: 5, kind: input, shape index: {}]   ;;  %s1716_s6 = inlined_call_operand.vmem [shape: f32[1,32], index: 6, kind: input, shape index: {}]   ;;  %s1717_s8 = inlined_call_operand.vmem [shape: f32[2,8,32], index: 8, kind: output, shape index: {}]  }
   0x1   :  { %v1481_v0 = vld [vmem:[%s1709_s0] sm:$0xff]  ;;  %v1486_v1 = vld [vmem:[%s1709_s0 + $0x8] sm:$0xff]  ;;  %1232 = vmatprep.subr.bf16.mxu0 %v1416_v14  ;;  %1236 = vmatprep.mubr.msk.bf16.mxu0 %vm1417_vm1, %v1416_v14  ;;  %v255_v47 = vlaneseq  ;;  %v1419_v52 = vmov 0   ;;  %vm296_vm7 = vcmask 1043456   ;;  %s1423_s21 = smov 56   ;;  %s1424_s22 = smov 80  }
   0x2   :  { %v35_v2 = vsel %vm34_vm0, %v1481_v0, 0.0  ;;  %v38_v3 = vsel %vm34_vm0, %v1486_v1, 0.0  ;;  %v1376_v15 = vld [vmem:[%s1710_s3 + $0x8] sm:$0xff]   ;;  %1240 = vmatprep.subr.bf16.mxu1 %v1416_v14  ;;  %1242 = vmatprep.mubr.msk.bf16.mxu1 %vm1417_vm1, %v1416_v14  ;;  %v1377_v16 = vld [vmem:[%s1710_s3] sm:$0xff]   ;;  %s1425_s23 = smov 112   ;;  %s1426_s24 = smov 48  }
   0x3   :  { %36 = vadd.xlane.f32.xlu0 %v35_v2  ;;  %1233 = vmatpush3.bf16.msra.mxu0 %v1376_v15  ;;  %v1168_v25 = vld [vmem:[%s1711_s1] ss:$0 sm:$0xff]  ;;  %s1418_s1 = smov 96   ;;  %v256_v49 = vshrl.u32 %v255_v47, 7  ;;  %v147_v50 = vld [vmem:[%s1714_s7 + $0x1] sm:$0x1] }
   0x4   :  { %1234 = vmatprep.subr.bf16.mxu0 %v1416_v14  ;;  %v1169_v29 = vld [vmem:[%s1712_s2] ss:$0 sm:$0xff]  ;;  %vm252_vm4 = vcmp.eq.f32.partialorder %v147_v50, 0.0  ;;  %s1427_s25 = smov 72   ;;  %s1428_s26 = smov 104   ;;  %vm1086_vm8 = vcmask 130048  }
   0x5   :  { %v1170_v34 = vld [vmem:[%s1713_s4] ss:$0 sm:$0xff]  ;;  %v257_v51 = vsub.s32 0, %v256_v49  ;;  %v254_v55 = vsel %vm252_vm4, 1, %v1419_v52  ;;  %s1429_s27 = smov 40   ;;  %s1430_s28 = smov 8  }
   0x6   :  { %v146_v48 = vld [vmem:[%s1714_s7] sm:$0x1]  ;;  %s1420_s7 = smov 64   ;;  %s1431_s29 = smov 16   ;;  %vm1089_vm9 = vcmask 195584  }
   0x7   :  { %39 = vadd.xlane.f32.xlu0 %v38_v3  ;;  %1235 = vmatpush3.bf16.msra.mxu0 %v1377_v16  ;;  %vm251_vm3 = vcmp.eq.f32.partialorder %v146_v48, 0.0  ;;  %v1549_v57 = vrot.slane %v254_v55, %v257_v51  ;;  %s1432_s11 = smov 24  }
   0x8   :  { %1246 = vmatprep.subr.bf16.mxu0 %v1416_v14  ;;  %v253_v53 = vsel %vm251_vm3, 1, %v1419_v52 }
   0x9   :  { %v1546_v54 = vrot.slane %v253_v53, %v257_v51  ;;  %vm264_vm6 = vcmp.eq.s32.totalorder %v1549_v57, 1 }
   0xb   :  { %vm263_vm5 = vcmp.eq.s32.totalorder %v1546_v54, 1 }
  0x8c   :  { %v37_v4 = vpop.xlane.xlu0 %36 }
  0x8d   :  { %v42_v5 = vmul.f32 0.03125, %v37_v4 }
  0x8f   :  { %v44_v6 = vsub.f32 %v1481_v0, %v42_v5 }
  0x90   :  { %v40_v7 = vpop.xlane.xlu0 %39 }
  0x91   :  { %v43_v8 = vmul.f32 0.03125, %v40_v7  ;;  %v46_v9 = vmul.f32 %v44_v6, %v44_v6 }
  0x93   :  { %v45_v10 = vsub.f32 %v1486_v1, %v43_v8  ;;  %v48_v11 = vsel %vm34_vm0, %v46_v9, 0.0 }
  0x94   :  { %49 = vadd.xlane.f32.xlu1 %v48_v11 }
  0x95   :  { %v47_v12 = vmul.f32 %v45_v10, %v45_v10 }
  0x97   :  { %v51_v13 = vsel %vm34_vm0, %v47_v12, 0.0 }
  0x98   :  { %52 = vadd.xlane.f32.xlu1 %v51_v13 }
 0x11d   :  { %v50_v17 = vpop.xlane.xlu1 %49 }
 0x11e   :  { %v54_v18 = vmul.f32 0.03125, %v50_v17 }
 0x120   :  { %v56_v19 = vadd.f32 1e-05, %v54_v18 }
 0x121   :  { %v53_v20 = vpop.xlane.xlu1 %52 }
 0x122   :  { %1380 = vrsqrt.f32 %v56_v19  ;;  %v55_v21 = vmul.f32 0.03125, %v53_v20 }
 0x124   :  { %v57_v22 = vadd.f32 1e-05, %v55_v21 }
 0x126   :  { %1382 = vrsqrt.f32 %v57_v22 }
 0x12f   :  { %v1381_v23 = vpop.eup %1380 }
 0x130   :  { %v60_v24 = vmul.f32 %v1381_v23, %v44_v6 }
 0x132   :  { %v68_v28 = vmul.f32 %v1168_v25, %v60_v24 }
 0x133   :  { %v1383_v26 = vpop.eup %1382 }
 0x134   :  { %v61_v27 = vmul.f32 %v1383_v26, %v45_v10  ;;  %v76_v31 = vadd.f32 %v1169_v29, %v68_v28 }
 0x136   :  { %v69_v30 = vmul.f32 %v1168_v25, %v61_v27 }
 0x138   :  { %v77_v32 = vadd.f32 %v1169_v29, %v69_v30 }
 0x13a   :  { %v78_v33 = vpack.c.bf16 %v77_v32, %v76_v31 }
 0x13c   :  { %1237 = vmatmul.mubr.msk.bf16.vlgmr.msra.gmra.mxu0 %vm34_vm0, %v78_v33 }
 0x13d   :  { %1248 = vmatprep.mubr.msk.bf16.mxu0 %vm1417_vm1, %v1416_v14 }
 0x1fc   :  { %v139_v35 = vpop.f32.mrf.mxu0 }
 0x1fd   :  { %v140_v36 = vadd.f32 %v1170_v34, %v139_v35 }
 0x1fe   :  { %v1238_v37 = vpop.f32.mrf.mxu0 }
 0x1ff   :  { %v1522_v38 = vpack.c.bf16 %v140_v36, %v140_v36 }
 0x200   :  { %v142_v39 = vpop.f32.mrf.mxu0 }
 0x201   :  { %v143_v40 = vadd.f32 %v1170_v34, %v142_v39  ;;  %151 = vrot.lane.b32.xlu0 %v1522_v38, %s1418_s1 }
 0x202   :  { %v1239_v41 = vpop.f32.mrf.mxu0 }
 0x203   :  { %v1525_v42 = vpack.c.bf16 %v143_v40, %v143_v40 }
 0x205   :  { %201 = vrot.lane.b32.xlu1 %v1525_v42, %s1418_s1 }
 0x273   :  { %v152_v43 = vpop.permute.xlu0 %151 }
 0x274   :  { %v158_v44 = vsel %vm153_vm2, %v152_v43, 0 }
 0x275   :  { %1241 = vmatpush3.bf16.xpose.msra.mxu1 %v158_v44 }
 0x276   :  { %1252 = vmatprep.subr.bf16.mxu1 %v1416_v14 }
 0x277   :  { %v202_v45 = vpop.permute.xlu1 %201 }
 0x278   :  { %v207_v46 = vsel %vm153_vm2, %v202_v45, 0 }
 0x279   :  { %1247 = vmatpush3.bf16.xpose.msra.mxu0 %v207_v46 }
 0x27a   :  { %1258 = vmatprep.subr.bf16.mxu0 %v1416_v14 }
 0x27c   :  { %1243 = vmatmul.mubr.msk.bf16.vlgmr.msra.gmra.mxu1 %vm153_vm2, %v1522_v38 }
 0x27d   :  { %1254 = vmatprep.mubr.msk.bf16.mxu1 %vm1417_vm1, %v1416_v14 }
 0x280   :  { %1249 = vmatmul.mubr.msk.bf16.vlgmr.msra.gmra.mxu0 %vm153_vm2, %v1525_v42 }
 0x281   :  { %1260 = vmatprep.mubr.msk.bf16.mxu0 %vm1417_vm1, %v1416_v14 }
 0x33c   :  { %v194_v56 = vpop.f32.mrf.mxu1 }
 0x33d   :  { %v249_v58 = vmul.f32 0.35355338, %v194_v56 }
 0x33e   :  { %v1244_v59 = vpop.f32.mrf.mxu1 }
 0x33f   :  { %v265_v60 = vsel %vm263_vm5, -1e+10, %v249_v58 }
 0x340   :  { %v197_v61 = vpop.f32.mrf.mxu1  ;;  %v243_v62 = vpop.f32.mrf.mxu0  ;;  %v267_v63 = vsel %vm153_vm2, %v265_v60, -inf }
 0x341   :  { %v250_v2 = vmul.f32 0.35355338, %v243_v62  ;;  %268 = vmax.xlane.f32.xlu1 %v267_v63 }
 0x342   :  { %v1245_v3 = vpop.f32.mrf.mxu1  ;;  %v1250_v4 = vpop.f32.mrf.mxu0 }
 0x343   :  { %v266_v5 = vsel %vm264_vm6, -1e+10, %v250_v2 }
 0x344   :  { %v246_v6 = vpop.f32.mrf.mxu0  ;;  %v270_v7 = vsel %vm153_vm2, %v266_v5, -inf }
 0x345   :  { %271 = vmax.xlane.f32.xlu0 %v270_v7 }
 0x346   :  { %v1251_v8 = vpop.f32.mrf.mxu0 }
 0x352   :  { %340 = vrot.lane.b32.xlu1 %v1525_v42, %s1420_s7 }
 0x356   :  { %390 = vrot.lane.b32.xlu1 %v1522_v38, %s1421_s19 }
 0x3ca   :  { %v269_v9 = vpop.xlane.xlu1 %268 }
 0x3cb   :  { %v273_v10 = vsub.f32 %v265_v60, %v269_v9 }
 0x3cd   :  { %v275_v11 = vmul.f32 1.442695, %v273_v10 }
 0x3ce   :  { %v341_v12 = vpop.permute.xlu1 %340  ;;  %v272_v13 = vpop.xlane.xlu0 %271 }
 0x3cf   :  { %1384 = vpow2.f32 %v275_v11  ;;  %v346_v15 = vsel %vm296_vm7, %v341_v12, 0  ;;  %v274_v16 = vsub.f32 %v266_v5, %v272_v13 }
 0x3d0   :  { %1259 = vmatpush3.bf16.msra.mxu0 %v346_v15 }
 0x3d1   :  { %v277_v17 = vmul.f32 1.442695, %v274_v16  ;;  %1270 = vmatprep.subr.bf16.mxu0 %v1416_v14 }
 0x3d2   :  { %v391_v22 = vpop.permute.xlu1 %390 }
 0x3d3   :  { %1386 = vpow2.f32 %v277_v17  ;;  %v396_v31 = vsel %vm153_vm2, %v391_v22, 0 }
 0x3dc   :  { %v1385_v18 = vpop.eup %1384 }
 0x3dd   :  { %v279_v19 = vsel %vm153_vm2, %v1385_v18, 0.0 }
 0x3de   :  { %280 = vadd.xlane.f32.xlu0 %v279_v19 }
 0x3e0   :  { %v1387_v20 = vpop.eup %1386 }
 0x3e1   :  { %v282_v21 = vsel %vm153_vm2, %v1387_v20, 0.0 }
 0x3e2   :  { %283 = vadd.xlane.f32.xlu1 %v282_v21 }
 0x3f3   :  { %440 = vrot.lane.b32.xlu1 %v1525_v42, %s1421_s19 }
 0x3f4   :  { %291 = vrot.lane.b32.xlu0 %v1522_v38, %s1420_s7 }
 0x3f7   :  { %438 = vrot.lane.b32.xlu1 %v1525_v42, %s1422_s20 }
 0x3f8   :  { %388 = vrot.lane.b32.xlu0 %v1522_v38, %s1422_s20 }
 0x467   :  { %v281_v23 = vpop.xlane.xlu0 %280 }
 0x468   :  { %1388 = vrcp.f32 %v281_v23 }
 0x46b   :  { %v284_v24 = vpop.xlane.xlu1 %283  ;;  %v292_v25 = vpop.permute.xlu0 %291 }
 0x46c   :  { %1390 = vrcp.f32 %v284_v24  ;;  %v298_v26 = vsel %vm296_vm7, %v292_v25, 0 }
 0x46d   :  { %1253 = vmatpush3.bf16.msra.mxu1 %v298_v26 }
 0x46e   :  { %1264 = vmatprep.subr.bf16.mxu1 %v1416_v14 }
 0x46f   :  { %v441_v33 = vpop.permute.xlu1 %440  ;;  %v389_v36 = vpop.permute.xlu0 %388 }
 0x470   :  { %v446_v35 = vsel %vm153_vm2, %v441_v33, 0 }
 0x473   :  { %v439_v37 = vpop.permute.xlu1 %438 }
 0x475   :  { %v1389_v27 = vpop.eup %1388 }
 0x476   :  { %v287_v28 = vmul.f32 %v1389_v27, %v1385_v18 }
 0x478   :  { %v289_v29 = vpack.c.bf16 %v287_v28, %v287_v28 }
 0x479   :  { %v1391_v30 = vpop.eup %1390 }
 0x47a   :  { %1255 = vmatmul.mubr.msk.bf16.vlgmr.msra.gmra.mxu1 %vm153_vm2, %v289_v29  ;;  %v288_v32 = vmul.f32 %v1391_v30, %v1387_v20 }
 0x47b   :  { %1265 = vmatpush3.bf16.xpose.msra.mxu1 %v396_v31  ;;  %1266 = vmatprep.mubr.msk.bf16.mxu1 %vm1417_vm1, %v1416_v14 }
 0x47c   :  { %v290_v34 = vpack.c.bf16 %v288_v32, %v288_v32  ;;  %1276 = vmatprep.subr.bf16.mxu1 %v1416_v14 }
 0x47e   :  { %1261 = vmatmul.mubr.msk.bf16.vlgmr.msra.gmra.mxu0 %vm153_vm2, %v290_v34 }
 0x47f   :  { %1271 = vmatpush3.bf16.xpose.msra.mxu0 %v446_v35  ;;  %1272 = vmatprep.mubr.msk.bf16.mxu0 %vm1417_vm1, %v1416_v14 }
 0x480   :  { %1282 = vmatprep.subr.bf16.mxu0 %v1416_v14 }
 0x482   :  { %1267 = vmatmul.mubr.msk.bf16.vlgmr.msra.gmra.mxu1 %vm153_vm2, %v389_v36 }
 0x483   :  { %1278 = vmatprep.mubr.msk.bf16.mxu1 %vm1417_vm1, %v1416_v14 }
 0x486   :  { %1273 = vmatmul.mubr.msk.bf16.vlgmr.msra.gmra.mxu0 %vm153_vm2, %v439_v37 }
 0x487   :  { %1284 = vmatprep.mubr.msk.bf16.mxu0 %vm1417_vm1, %v1416_v14 }
 0x53a   :  { %v1586_v39 = vpop.f32.mrf.mxu1 }
 0x53c   :  { %v1256_v40 = vpop.f32.mrf.mxu1 }
 0x53e   :  { %v337_v41 = vpop.f32.mrf.mxu1  ;;  %v1588_v43 = vpop.f32.mrf.mxu0 }
 0x540   :  { %v1257_v44 = vpop.f32.mrf.mxu1  ;;  %v1262_v45 = vpop.f32.mrf.mxu0 }
 0x542   :  { %v385_v46 = vpop.f32.mrf.mxu0  ;;  %v432_v47 = vpop.f32.mrf.mxu1 }
 0x543   :  { %v488_v48 = vmul.f32 0.35355338, %v432_v47 }
 0x544   :  { %v1263_v49 = vpop.f32.mrf.mxu0  ;;  %v1268_v50 = vpop.f32.mrf.mxu1 }
 0x545   :  { %v490_v51 = vsel %vm263_vm5, -1e+10, %v488_v48 }
 0x546   :  { %v435_v52 = vpop.f32.mrf.mxu1  ;;  %v482_v53 = vpop.f32.mrf.mxu0  ;;  %v492_v55 = vsel %vm153_vm2, %v490_v51, -inf }
 0x547   :  { %v489_v56 = vmul.f32 0.35355338, %v482_v53  ;;  %493 = vmax.xlane.f32.xlu0 %v492_v55 }
 0x548   :  { %v1269_v58 = vpop.f32.mrf.mxu1  ;;  %v1274_v59 = vpop.f32.mrf.mxu0 }
 0x549   :  { %v491_v60 = vsel %vm264_vm6, -1e+10, %v489_v56 }
 0x54a   :  { %v485_v61 = vpop.f32.mrf.mxu0  ;;  %v495_v62 = vsel %vm153_vm2, %v491_v60, -inf }
 0x54b   :  { %496 = vmax.xlane.f32.xlu1 %v495_v62 }
 0x54c   :  { %v1275_v63 = vpop.f32.mrf.mxu0 }
 0x55c   :  { %564 = vrot.lane.b32.xlu1 %v1525_v42, %s1423_s21 }
 0x560   :  { %614 = vrot.lane.b32.xlu1 %v1522_v38, %s1424_s22 }
 0x564   :  { %664 = vrot.lane.b32.xlu1 %v1525_v42, %s1424_s22 }
 0x568   :  { %662 = vrot.lane.b32.xlu1 %v1525_v42, %s1425_s23 }
 0x5d0   :  { %v494_v2 = vpop.xlane.xlu0 %493 }
 0x5d1   :  { %v498_v3 = vsub.f32 %v490_v51, %v494_v2 }
 0x5d3   :  { %v500_v4 = vmul.f32 1.442695, %v498_v3 }
 0x5d4   :  { %v497_v5 = vpop.xlane.xlu1 %496 }
 0x5d5   :  { %1392 = vpow2.f32 %v500_v4  ;;  %v499_v6 = vsub.f32 %v491_v60, %v497_v5 }
 0x5d7   :  { %v502_v7 = vmul.f32 1.442695, %v499_v6 }
 0x5d8   :  { %v565_v8 = vpop.permute.xlu1 %564 }
 0x5d9   :  { %1394 = vpow2.f32 %v502_v7  ;;  %v570_v9 = vsel %vm296_vm7, %v565_v8, 0 }
 0x5da   :  { %1283 = vmatpush3.bf16.msra.mxu0 %v570_v9 }
 0x5db   :  { %1294 = vmatprep.subr.bf16.mxu0 %v1416_v14 }
 0x5dc   :  { %v615_v20 = vpop.permute.xlu1 %614 }
 0x5dd   :  { %v620_v24 = vsel %vm153_vm2, %v615_v20, 0 }
 0x5e0   :  { %v665_v26 = vpop.permute.xlu1 %664 }
 0x5e1   :  { %v670_v28 = vsel %vm153_vm2, %v665_v26, 0 }
 0x5e2   :  { %v1393_v10 = vpop.eup %1392 }
 0x5e3   :  { %v504_v11 = vsel %vm153_vm2, %v1393_v10, 0.0 }
 0x5e4   :  { %505 = vadd.xlane.f32.xlu0 %v504_v11  ;;  %v663_v30 = vpop.permute.xlu1 %662 }
 0x5e6   :  { %v1395_v12 = vpop.eup %1394 }
 0x5e7   :  { %v507_v13 = vsel %vm153_vm2, %v1395_v12, 0.0 }
 0x5e8   :  { %508 = vadd.xlane.f32.xlu0 %v507_v13 }
 0x5fe   :  { %516 = vrot.lane.b32.xlu0 %v1522_v38, %s1423_s21 }
 0x602   :  { %612 = vrot.lane.b32.xlu0 %v1522_v38, %s1425_s23 }
 0x66d   :  { %v506_v15 = vpop.xlane.xlu0 %505 }
 0x66e   :  { %1396 = vrcp.f32 %v506_v15 }
 0x671   :  { %v509_v16 = vpop.xlane.xlu0 %508 }
 0x672   :  { %1398 = vrcp.f32 %v509_v16 }
 0x675   :  { %v517_v17 = vpop.permute.xlu0 %516 }
 0x676   :  { %v522_v18 = vsel %vm296_vm7, %v517_v17, 0 }
 0x677   :  { %1277 = vmatpush3.bf16.msra.mxu1 %v522_v18 }
 0x678   :  { %1288 = vmatprep.subr.bf16.mxu1 %v1416_v14 }
 0x679   :  { %v613_v29 = vpop.permute.xlu0 %612 }
 0x67b   :  { %v1397_v19 = vpop.eup %1396 }
 0x67c   :  { %v512_v21 = vmul.f32 %v1397_v19, %v1393_v10 }
 0x67e   :  { %v514_v22 = vpack.c.bf16 %v512_v21, %v512_v21 }
 0x67f   :  { %v1399_v23 = vpop.eup %1398 }
 0x680   :  { %1279 = vmatmul.mubr.msk.bf16.vlgmr.msra.gmra.mxu1 %vm153_vm2, %v514_v22  ;;  %v513_v25 = vmul.f32 %v1399_v23, %v1395_v12 }
 0x681   :  { %1289 = vmatpush3.bf16.xpose.msra.mxu1 %v620_v24  ;;  %1290 = vmatprep.mubr.msk.bf16.mxu1 %vm1417_vm1, %v1416_v14 }
 0x682   :  { %v515_v27 = vpack.c.bf16 %v513_v25, %v513_v25  ;;  %1300 = vmatprep.subr.bf16.mxu1 %v1416_v14 }
 0x684   :  { %1285 = vmatmul.mubr.msk.bf16.vlgmr.msra.gmra.mxu0 %vm153_vm2, %v515_v27 }
 0x685   :  { %1295 = vmatpush3.bf16.xpose.msra.mxu0 %v670_v28  ;;  %1296 = vmatprep.mubr.msk.bf16.mxu0 %vm1417_vm1, %v1416_v14 }
 0x686   :  { %1306 = vmatprep.subr.bf16.mxu0 %v1416_v14 }
 0x688   :  { %1291 = vmatmul.mubr.msk.bf16.vlgmr.msra.gmra.mxu1 %vm153_vm2, %v613_v29 }
 0x689   :  { %1302 = vmatprep.mubr.msk.bf16.mxu1 %vm1417_vm1, %v1416_v14 }
 0x68c   :  { %1297 = vmatmul.mubr.msk.bf16.vlgmr.msra.gmra.mxu0 %vm153_vm2, %v663_v30 }
 0x68d   :  { %1308 = vmatprep.mubr.msk.bf16.mxu0 %vm1417_vm1, %v1416_v14 }
 0x740   :  { %v1624_v31 = vpop.f32.mrf.mxu1 }
 0x742   :  { %v1280_v32 = vpop.f32.mrf.mxu1 }
 0x744   :  { %v561_v33 = vpop.f32.mrf.mxu1  ;;  %v1626_v34 = vpop.f32.mrf.mxu0 }
 0x745   :  { %v1361_v35 = vpack.i.bf16 %v1626_v34, %v1624_v31 }
 0x746   :  { %v1281_v36 = vpop.f32.mrf.mxu1  ;;  %v1286_v37 = vpop.f32.mrf.mxu0 }
 0x748   :  { %v609_v40 = vpop.f32.mrf.mxu0  ;;  %v656_v41 = vpop.f32.mrf.mxu1 }
 0x749   :  { %v712_v44 = vmul.f32 0.35355338, %v656_v41 }
 0x74a   :  { %v1287_v45 = vpop.f32.mrf.mxu0  ;;  %v1292_v46 = vpop.f32.mrf.mxu1 }
 0x74b   :  { %v714_v47 = vsel %vm263_vm5, -1e+10, %v712_v44 }
 0x74c   :  { %v659_v48 = vpop.f32.mrf.mxu1  ;;  %v706_v49 = vpop.f32.mrf.mxu0  ;;  %v716_v50 = vsel %vm153_vm2, %v714_v47, -inf }
 0x74d   :  { %v713_v51 = vmul.f32 0.35355338, %v706_v49  ;;  %717 = vmax.xlane.f32.xlu0 %v716_v50 }
 0x74e   :  { %v1293_v52 = vpop.f32.mrf.mxu1  ;;  %v1298_v53 = vpop.f32.mrf.mxu0 }
 0x74f   :  { %v715_v55 = vsel %vm264_vm6, -1e+10, %v713_v51 }
 0x750   :  { %v709_v56 = vpop.f32.mrf.mxu0  ;;  %v719_v58 = vsel %vm153_vm2, %v715_v55, -inf }
 0x751   :  { %720 = vmax.xlane.f32.xlu1 %v719_v58 }
 0x752   :  { %v1299_v59 = vpop.f32.mrf.mxu0 }
 0x762   :  { %788 = vrot.lane.b32.xlu1 %v1525_v42, %s1426_s24 }
 0x766   :  { %838 = vrot.lane.b32.xlu1 %v1522_v38, %s1427_s25 }
 0x76a   :  { %888 = vrot.lane.b32.xlu1 %v1525_v42, %s1427_s25 }
 0x76e   :  { %886 = vrot.lane.b32.xlu1 %v1525_v42, %s1428_s26 }
 0x7d6   :  { %v718_v60 = vpop.xlane.xlu0 %717 }
 0x7d7   :  { %v722_v61 = vsub.f32 %v714_v47, %v718_v60 }
 0x7d9   :  { %v724_v62 = vmul.f32 1.442695, %v722_v61 }
 0x7da   :  { %v721_v63 = vpop.xlane.xlu1 %720 }
 0x7db   :  { %1400 = vpow2.f32 %v724_v62  ;;  %v723_v2 = vsub.f32 %v715_v55, %v721_v63 }
 0x7dd   :  { %v726_v3 = vmul.f32 1.442695, %v723_v2 }
 0x7de   :  { %v789_v4 = vpop.permute.xlu1 %788 }
 0x7df   :  { %1402 = vpow2.f32 %v726_v3  ;;  %v794_v5 = vsel %vm296_vm7, %v789_v4, 0 }
 0x7e0   :  { %1307 = vmatpush3.bf16.msra.mxu0 %v794_v5 }
 0x7e1   :  { %1318 = vmatprep.subr.bf16.mxu0 %v1416_v14 }
 0x7e2   :  { %v839_v16 = vpop.permute.xlu1 %838 }
 0x7e3   :  { %v844_v20 = vsel %vm153_vm2, %v839_v16, 0 }
 0x7e6   :  { %v889_v22 = vpop.permute.xlu1 %888 }
 0x7e7   :  { %v894_v24 = vsel %vm153_vm2, %v889_v22, 0 }
 0x7e8   :  { %v1401_v6 = vpop.eup %1400 }
 0x7e9   :  { %v728_v7 = vsel %vm153_vm2, %v1401_v6, 0.0 }
 0x7ea   :  { %729 = vadd.xlane.f32.xlu0 %v728_v7  ;;  %v887_v26 = vpop.permute.xlu1 %886 }
 0x7ec   :  { %v1403_v8 = vpop.eup %1402 }
 0x7ed   :  { %v731_v9 = vsel %vm153_vm2, %v1403_v8, 0.0 }
 0x7ee   :  { %732 = vadd.xlane.f32.xlu0 %v731_v9 }
 0x804   :  { %740 = vrot.lane.b32.xlu0 %v1522_v38, %s1426_s24 }
 0x808   :  { %836 = vrot.lane.b32.xlu0 %v1522_v38, %s1428_s26 }
 0x873   :  { %v730_v10 = vpop.xlane.xlu0 %729 }
 0x874   :  { %1404 = vrcp.f32 %v730_v10 }
 0x877   :  { %v733_v11 = vpop.xlane.xlu0 %732 }
 0x878   :  { %1406 = vrcp.f32 %v733_v11 }
 0x87b   :  { %v741_v12 = vpop.permute.xlu0 %740 }
 0x87c   :  { %v746_v13 = vsel %vm296_vm7, %v741_v12, 0  ;;  %v1378_v12 = vld [vmem:[%s1715_s5 + $0x8] sm:$0xff]  }
 0x87d   :  { %1301 = vmatpush3.bf16.msra.mxu1 %v746_v13  ;;  %v1379_v13 = vld [vmem:[%s1715_s5] sm:$0xff]  }
 0x87e   :  { %1312 = vmatprep.subr.bf16.mxu1 %v1416_v14 }
 0x87f   :  { %v837_v25 = vpop.permute.xlu0 %836 }
 0x881   :  { %v1405_v15 = vpop.eup %1404 }
 0x882   :  { %v736_v17 = vmul.f32 %v1405_v15, %v1401_v6 }
 0x884   :  { %v738_v18 = vpack.c.bf16 %v736_v17, %v736_v17 }
 0x885   :  { %v1407_v19 = vpop.eup %1406 }
 0x886   :  { %1303 = vmatmul.mubr.msk.bf16.vlgmr.msra.gmra.mxu1 %vm153_vm2, %v738_v18  ;;  %v737_v21 = vmul.f32 %v1407_v19, %v1403_v8 }
 0x887   :  { %1313 = vmatpush3.bf16.xpose.msra.mxu1 %v844_v20  ;;  %1314 = vmatprep.mubr.msk.bf16.mxu1 %vm1417_vm1, %v1416_v14 }
 0x888   :  { %v739_v23 = vpack.c.bf16 %v737_v21, %v737_v21  ;;  %1324 = vmatprep.subr.bf16.mxu1 %v1416_v14 }
 0x88a   :  { %1309 = vmatmul.mubr.msk.bf16.vlgmr.msra.gmra.mxu0 %vm153_vm2, %v739_v23 }
 0x88b   :  { %1319 = vmatpush3.bf16.xpose.msra.mxu0 %v894_v24  ;;  %1320 = vmatprep.mubr.msk.bf16.mxu0 %vm1417_vm1, %v1416_v14 }
 0x88c   :  { %1330 = vmatprep.subr.bf16.mxu0 %v1416_v14 }
 0x88e   :  { %1315 = vmatmul.mubr.msk.bf16.vlgmr.msra.gmra.mxu1 %vm153_vm2, %v837_v25 }
 0x88f   :  { %1326 = vmatprep.mubr.msk.bf16.mxu1 %vm1417_vm1, %v1416_v14 }
 0x892   :  { %1321 = vmatmul.mubr.msk.bf16.vlgmr.msra.gmra.mxu0 %vm153_vm2, %v887_v26 }
 0x893   :  { %1332 = vmatprep.mubr.msk.bf16.mxu0 %vm1417_vm1, %v1416_v14 }
 0x946   :  { %v782_v27 = vpop.f32.mrf.mxu1 }
 0x948   :  { %v1304_v28 = vpop.f32.mrf.mxu1 }
 0x94a   :  { %v785_v29 = vpop.f32.mrf.mxu1  ;;  %v830_v30 = vpop.f32.mrf.mxu0 }
 0x94b   :  { %v1366_v54 = vpack.i.bf16 %v830_v30, %v782_v27 }
 0x94c   :  { %v1305_v32 = vpop.f32.mrf.mxu1  ;;  %v1310_v33 = vpop.f32.mrf.mxu0 }
 0x94e   :  { %v833_v36 = vpop.f32.mrf.mxu0  ;;  %v880_v37 = vpop.f32.mrf.mxu1 }
 0x94f   :  { %v936_v40 = vmul.f32 0.35355338, %v880_v37 }
 0x950   :  { %v1311_v41 = vpop.f32.mrf.mxu0  ;;  %v1316_v44 = vpop.f32.mrf.mxu1 }
 0x951   :  { %v938_v45 = vsel %vm263_vm5, -1e+10, %v936_v40 }
 0x952   :  { %v883_v46 = vpop.f32.mrf.mxu1  ;;  %v930_v47 = vpop.f32.mrf.mxu0  ;;  %v940_v48 = vsel %vm153_vm2, %v938_v45, -inf }
 0x953   :  { %v937_v49 = vmul.f32 0.35355338, %v930_v47  ;;  %941 = vmax.xlane.f32.xlu0 %v940_v48  ;;  %v1190_v46 = vld [vmem:[%s1716_s6] ss:$0 sm:$0xff] }
 0x954   :  { %v1317_v50 = vpop.f32.mrf.mxu1  ;;  %v1322_v51 = vpop.f32.mrf.mxu0 }
 0x955   :  { %v939_v52 = vsel %vm264_vm6, -1e+10, %v937_v49 }
 0x956   :  { %v933_v53 = vpop.f32.mrf.mxu0  ;;  %v943_v55 = vsel %vm153_vm2, %v939_v52, -inf }
 0x957   :  { %944 = vmax.xlane.f32.xlu1 %v943_v55 }
 0x958   :  { %v1323_v56 = vpop.f32.mrf.mxu0 }
 0x968   :  { %1012 = vrot.lane.b32.xlu1 %v1525_v42, %s1429_s27 }
 0x96c   :  { %1362 = vrot.lane.b32.xlu1 %v1361_v35, %s1430_s28 }
 0x970   :  { %1367 = vrot.lane.b32.xlu1 %v1366_v54, %s1431_s29 }
 0x9dc   :  { %v942_v58 = vpop.xlane.xlu0 %941 }
 0x9dd   :  { %v946_v59 = vsub.f32 %v938_v45, %v942_v58 }
 0x9df   :  { %v948_v57 = vmul.f32 1.442695, %v946_v59 }
 0x9e0   :  { %v945_v60 = vpop.xlane.xlu1 %944 }
 0x9e1   :  { %1408 = vpow2.f32 %v948_v57  ;;  %v947_v61 = vsub.f32 %v939_v52, %v945_v60 }
 0x9e3   :  { %v950_v62 = vmul.f32 1.442695, %v947_v61 }
 0x9e4   :  { %v1013_v63 = vpop.permute.xlu1 %1012 }
 0x9e5   :  { %1410 = vpow2.f32 %v950_v62  ;;  %v1018_v2 = vsel %vm296_vm7, %v1013_v63, 0 }
 0x9e6   :  { %1331 = vmatpush3.bf16.msra.mxu0 %v1018_v2 }
 0x9e8   :  { %v1363_v24 = vpop.permute.xlu1 %1362 }
 0x9e9   :  { %v1365_v26 = vunpack.i.h.bf16 %v1363_v24 }
 0x9eb   :  { %v1085_v30 = vsel %vm153_vm2, %v1588_v43, %v1365_v26 }
 0x9ec   :  { %v1368_v25 = vpop.permute.xlu1 %1367 }
 0x9ed   :  { %v1370_v27 = vunpack.i.h.bf16 %v1368_v25  ;;  %v1369_v28 = vunpack.i.l.bf16 %v1368_v25 }
 0x9ee   :  { %v1409_v42 = vpop.eup %1408 }
 0x9ef   :  { %v952_v3 = vsel %vm153_vm2, %v1409_v42, 0.0  ;;  %v1088_v40 = vsel %vm1086_vm8, %v1085_v30, %v1370_v27 }
 0x9f0   :  { %953 = vadd.xlane.f32.xlu0 %v952_v3 }
 0x9f2   :  { %v1411_v31 = vpop.eup %1410 }
 0x9f3   :  { %v955_v34 = vsel %vm153_vm2, %v1411_v31, 0.0 }
 0x9f4   :  { %956 = vadd.xlane.f32.xlu0 %v955_v34 }
 0xa0a   :  { %964 = vrot.lane.b32.xlu0 %v1522_v38, %s1429_s27 }
 0xa79   :  { %v954_v35 = vpop.xlane.xlu0 %953 }
 0xa7a   :  { %1412 = vrcp.f32 %v954_v35 }
 0xa7d   :  { %v957_v4 = vpop.xlane.xlu0 %956 }
 0xa7e   :  { %1414 = vrcp.f32 %v957_v4 }
 0xa81   :  { %v965_v5 = vpop.permute.xlu0 %964 }
 0xa82   :  { %v970_v6 = vsel %vm296_vm7, %v965_v5, 0 }
 0xa83   :  { %1325 = vmatpush3.bf16.msra.mxu1 %v970_v6 }
 0xa84   :  { %1336 = vmatprep.subr.bf16.mxu1 %v1416_v14 }
 0xa87   :  { %v1413_v7 = vpop.eup %1412 }
 0xa88   :  { %v960_v8 = vmul.f32 %v1413_v7, %v1409_v42 }
 0xa8a   :  { %v962_v9 = vpack.c.bf16 %v960_v8, %v960_v8 }
 0xa8b   :  { %v1415_v10 = vpop.eup %1414 }
 0xa8c   :  { %1327 = vmatmul.mubr.msk.bf16.vlgmr.msra.gmra.mxu1 %vm153_vm2, %v962_v9  ;;  %v961_v11 = vmul.f32 %v1415_v10, %v1411_v31 }
 0xa8d   :  { %1340 = vmatprep.mubr.msk.bf16.mxu1 %vm1417_vm1, %v1416_v14  ;;  %1337 = vmatpush3.bf16.msra.mxu1 %v1378_v12 }
 0xa8e   :  { %v963_v38 = vpack.c.bf16 %v961_v11, %v961_v11  ;;  %1338 = vmatprep.subr.bf16.mxu1 %v1416_v14  ;;  %v1364_v14 = vunpack.i.l.bf16 %v1363_v24 }
 0xa90   :  { %1333 = vmatmul.mubr.msk.bf16.vlgmr.msra.gmra.mxu0 %vm153_vm2, %v963_v38  ;;  %v1084_v32 = vsel %vm153_vm2, %v1586_v39, %v1364_v14 }
 0xa91   :  { %1339 = vmatpush3.bf16.msra.mxu1 %v1379_v13  ;;  %v1087_v37 = vsel %vm1086_vm8, %v1084_v32, %v1369_v28 }
 0xb4c   :  { %v1006_v15 = vpop.f32.mrf.mxu1 }
 0xb4e   :  { %v1328_v16 = vpop.f32.mrf.mxu1 }
 0xb50   :  { %v1009_v17 = vpop.f32.mrf.mxu1  ;;  %v1054_v18 = vpop.f32.mrf.mxu0 }
 0xb51   :  { %v1371_v19 = vpack.i.bf16 %v1054_v18, %v1006_v15 }
 0xb52   :  { %v1329_v20 = vpop.f32.mrf.mxu1  ;;  %v1334_v21 = vpop.f32.mrf.mxu0 }
 0xb53   :  { %1372 = vrot.lane.b32.xlu0 %v1371_v19, %s1432_s11 }
 0xb54   :  { %v1057_v22 = vpop.f32.mrf.mxu0 }
 0xb56   :  { %v1335_v23 = vpop.f32.mrf.mxu0 }
 0xbc5   :  { %v1373_v29 = vpop.permute.xlu0 %1372 }
 0xbc6   :  { %v1375_v33 = vunpack.i.h.bf16 %v1373_v29  ;;  %v1374_v36 = vunpack.i.l.bf16 %v1373_v29 }
 0xbc8   :  { %v1091_v41 = vsel %vm1089_vm9, %v1088_v40, %v1375_v33  ;;  %v1090_v44 = vsel %vm1089_vm9, %v1087_v37, %v1374_v36 }
 0xbc9   :  { %v1092_v45 = vpack.c.bf16 %v1091_v41, %v1090_v44 }
 0xbcb   :  { %1341 = vmatmul.mubr.msk.bf16.vlgmr.msra.gmra.mxu1 %vm34_vm0, %v1092_v45 }
 0xc8b   :  { %v1153_v47 = vpop.f32.mrf.mxu1 }
 0xc8c   :  { %v1154_v48 = vadd.f32 %v1190_v46, %v1153_v47 }
 0xc8d   :  { %v1342_v49 = vpop.f32.mrf.mxu1 }
 0xc8e   :  { %v1160_v43 = vadd.f32 %v1154_v48, %v1481_v0 }
 0xc8f   :  { %v1156_v50 = vpop.f32.mrf.mxu1 }
 0xc90   :  { %1162 = vst.msk [vmem:[%s1717_s8] sm:$0xff] %vm34_vm0, %v1160_v43  ;;  %v1157_v39 = vadd.f32 %v1190_v46, %v1156_v50 }
 0xc91   :  { %v1343_v51 = vpop.f32.mrf.mxu1 }
 0xc92   :  { %v1161_v52 = vadd.f32 %v1157_v39, %v1486_v1 }
 0xc94   :  { %1163 = vst.msk [vmem:[%s1717_s8 + $0x8] sm:$0xff] %vm34_vm0, %v1161_v52 }

// kernel: tevc_forward.32
= control target key start
LH: loop header
LB: loop body
LE: loop exit
PB: predicated region body
PF: predicated region fallthrough
CT: control target
= control target key end

     0   :  { %vm34_vm0 = vcmask 261120   ;;  %v1403_v14 = vmov 0.0   ;;  %vm1404_vm1 = vmmov 0   ;;  %vm153_vm2 = vcmask 64512   ;;  %s1407_s19 = smov 88   ;;  %s1408_s20 = smov 120   ;;  %s1695_s0 = inlined_call_operand.vmem [shape: f32[2,8,32], index: 0, kind: input, shape index: {}]   ;;  %s1696_s3 = inlined_call_operand.vmem [shape: bf16[32,96], index: 3, kind: input, shape index: {}]   ;;  %s1697_s1 = inlined_call_operand.vmem [shape: f32[1,32], index: 1, kind: input, shape index: {}]   ;;  %s1698_s2 = inlined_call_operand.vmem [shape: f32[1,32], index: 2, kind: input, shape index: {}]   ;;  %s1699_s4 = inlined_call_operand.vmem [shape: f32[1,96], index: 4, kind: input, shape index: {}]   ;;  %s1700_s7 = inlined_call_operand.vmem [shape: f32[2,8,8], index: 7, kind: input, shape index: {}]   ;;  %s1701_s5 = inlined_call_operand.vmem [shape: bf16[32,32], index: 5, kind: input, shape index: {}]   ;;  %s1702_s6 = inlined_call_operand.vmem [shape: f32[1,32], index: 6, kind: input, shape index: {}]   ;;  %s1703_s8 = inlined_call_operand.vmem [shape: f32[2,8,32], index: 8, kind: output, shape index: {}]  }
   0x1   :  { %v1467_v0 = vld [vmem:[%s1695_s0] sm:$0xff]  ;;  %v1472_v1 = vld [vmem:[%s1695_s0 + $0x8] sm:$0xff]  ;;  %1220 = vmatprep.subr.bf16.mxu0 %v1403_v14  ;;  %1224 = vmatprep.mubr.msk.bf16.mxu0 %vm1404_vm1, %v1403_v14  ;;  %vm284_vm5 = vcmask 1043456   ;;  %s1409_s21 = smov 56   ;;  %s1410_s22 = smov 80   ;;  %vm1074_vm6 = vcmask 130048  }
   0x2   :  { %v35_v2 = vsel %vm34_vm0, %v1467_v0, 0.0  ;;  %v38_v3 = vsel %vm34_vm0, %v1472_v1, 0.0  ;;  %v1363_v15 = vld [vmem:[%s1696_s3 + $0x8] sm:$0xff]   ;;  %1228 = vmatprep.subr.bf16.mxu1 %v1403_v14  ;;  %1230 = vmatprep.mubr.msk.bf16.mxu1 %vm1404_vm1, %v1403_v14  ;;  %v1364_v16 = vld [vmem:[%s1696_s3] sm:$0xff]   ;;  %s1411_s23 = smov 112   ;;  %s1412_s24 = smov 48  }
   0x3   :  { %36 = vadd.xlane.f32.xlu0 %v35_v2  ;;  %1221 = vmatpush3.bf16.msra.mxu0 %v1363_v15  ;;  %v1156_v25 = vld [vmem:[%s1697_s1] ss:$0 sm:$0xff]  ;;  %s1405_s1 = smov 96   ;;  %v1535_v50 = vld [vmem:[%s1700_s7 + $0x8] sm:$0xff]  ;;  %s1413_s25 = smov 72   ;;  %vm1077_vm7 = vcmask 195584  }
   0x4   :  { %1222 = vmatprep.subr.bf16.mxu0 %v1403_v14  ;;  %v1157_v29 = vld [vmem:[%s1698_s2] ss:$0 sm:$0xff]  ;;  %vm252_vm4 = vcmp.eq.f32.partialorder %v1535_v50, 0.0  ;;  %s1414_s26 = smov 104   ;;  %s1415_s27 = smov 40  }
   0x5   :  { %v1158_v34 = vld [vmem:[%s1699_s4] ss:$0 sm:$0xff]  ;;  %s1416_s28 = smov 8   ;;  %s1417_s29 = smov 16  }
   0x6   :  { %v1529_v47 = vld [vmem:[%s1700_s7] sm:$0xff]  ;;  %s1406_s7 = smov 64   ;;  %s1418_s11 = smov 24  }
   0x7   :  { %39 = vadd.xlane.f32.xlu0 %v38_v3  ;;  %1223 = vmatpush3.bf16.msra.mxu0 %v1364_v16  ;;  %vm251_vm3 = vcmp.eq.f32.partialorder %v1529_v47, 0.0 }
   0x8   :  { %1234 = vmatprep.subr.bf16.mxu0 %v1403_v14 }
  0x8c   :  { %v37_v4 = vpop.xlane.xlu0 %36 }
  0x8d   :  { %v42_v5 = vmul.f32 0.03125, %v37_v4 }
  0x8f   :  { %v44_v6 = vsub.f32 %v1467_v0, %v42_v5 }
  0x90   :  { %v40_v7 = vpop.xlane.xlu0 %39 }
  0x91   :  { %v43_v8 = vmul.f32 0.03125, %v40_v7  ;;  %v46_v9 = vmul.f32 %v44_v6, %v44_v6 }
  0x93   :  { %v45_v10 = vsub.f32 %v1472_v1, %v43_v8  ;;  %v48_v11 = vsel %vm34_vm0, %v46_v9, 0.0 }
  0x94   :  { %49 = vadd.xlane.f32.xlu1 %v48_v11 }
  0x95   :  { %v47_v12 = vmul.f32 %v45_v10, %v45_v10 }
  0x97   :  { %v51_v13 = vsel %vm34_vm0, %v47_v12, 0.0 }
  0x98   :  { %52 = vadd.xlane.f32.xlu1 %v51_v13 }
 0x11d   :  { %v50_v17 = vpop.xlane.xlu1 %49 }
 0x11e   :  { %v54_v18 = vmul.f32 0.03125, %v50_v17 }
 0x120   :  { %v56_v19 = vadd.f32 1e-05, %v54_v18 }
 0x121   :  { %v53_v20 = vpop.xlane.xlu1 %52 }
 0x122   :  { %1367 = vrsqrt.f32 %v56_v19  ;;  %v55_v21 = vmul.f32 0.03125, %v53_v20 }
 0x124   :  { %v57_v22 = vadd.f32 1e-05, %v55_v21 }
 0x126   :  { %1369 = vrsqrt.f32 %v57_v22 }
 0x12f   :  { %v1368_v23 = vpop.eup %1367 }
 0x130   :  { %v60_v24 = vmul.f32 %v1368_v23, %v44_v6 }
 0x132   :  { %v68_v28 = vmul.f32 %v1156_v25, %v60_v24 }
 0x133   :  { %v1370_v26 = vpop.eup %1369 }
 0x134   :  { %v61_v27 = vmul.f32 %v1370_v26, %v45_v10  ;;  %v76_v31 = vadd.f32 %v1157_v29, %v68_v28 }
 0x136   :  { %v69_v30 = vmul.f32 %v1156_v25, %v61_v27 }
 0x138   :  { %v77_v32 = vadd.f32 %v1157_v29, %v69_v30 }
 0x13a   :  { %v78_v33 = vpack.c.bf16 %v77_v32, %v76_v31 }
 0x13c   :  { %1225 = vmatmul.mubr.msk.bf16.vlgmr.msra.gmra.mxu0 %vm34_vm0, %v78_v33 }
 0x13d   :  { %1236 = vmatprep.mubr.msk.bf16.mxu0 %vm1404_vm1, %v1403_v14 }
 0x1fc   :  { %v139_v35 = vpop.f32.mrf.mxu0 }
 0x1fd   :  { %v140_v36 = vadd.f32 %v1158_v34, %v139_v35 }
 0x1fe   :  { %v1226_v37 = vpop.f32.mrf.mxu0 }
 0x1ff   :  { %v1508_v38 = vpack.c.bf16 %v140_v36, %v140_v36 }
 0x200   :  { %v142_v39 = vpop.f32.mrf.mxu0 }
 0x201   :  { %v143_v40 = vadd.f32 %v1158_v34, %v142_v39  ;;  %151 = vrot.lane.b32.xlu0 %v1508_v38, %s1405_s1 }
 0x202   :  { %v1227_v41 = vpop.f32.mrf.mxu0 }
 0x203   :  { %v1511_v42 = vpack.c.bf16 %v143_v40, %v143_v40 }
 0x205   :  { %201 = vrot.lane.b32.xlu1 %v1511_v42, %s1405_s1 }
 0x273   :  { %v152_v43 = vpop.permute.xlu0 %151 }
 0x274   :  { %v158_v44 = vsel %vm153_vm2, %v152_v43, 0 }
 0x275   :  { %1229 = vmatpush3.bf16.xpose.msra.mxu1 %v158_v44 }
 0x276   :  { %1240 = vmatprep.subr.bf16.mxu1 %v1403_v14 }
 0x277   :  { %v202_v45 = vpop.permute.xlu1 %201 }
 0x278   :  { %v207_v46 = vsel %vm153_vm2, %v202_v45, 0 }
 0x279   :  { %1235 = vmatpush3.bf16.xpose.msra.mxu0 %v207_v46 }
 0x27a   :  { %1246 = vmatprep.subr.bf16.mxu0 %v1403_v14 }
 0x27c   :  { %1231 = vmatmul.mubr.msk.bf16.vlgmr.msra.gmra.mxu1 %vm153_vm2, %v1508_v38 }
 0x27d   :  { %1242 = vmatprep.mubr.msk.bf16.mxu1 %vm1404_vm1, %v1403_v14 }
 0x280   :  { %1237 = vmatmul.mubr.msk.bf16.vlgmr.msra.gmra.mxu0 %vm153_vm2, %v1511_v42 }
 0x281   :  { %1248 = vmatprep.mubr.msk.bf16.mxu0 %vm1404_vm1, %v1403_v14 }
 0x33c   :  { %v194_v48 = vpop.f32.mrf.mxu1 }
 0x33d   :  { %v249_v49 = vmul.f32 0.35355338, %v194_v48 }
 0x33e   :  { %v1232_v51 = vpop.f32.mrf.mxu1 }
 0x33f   :  { %v253_v52 = vsel %vm251_vm3, -1e+10, %v249_v49 }
 0x340   :  { %v197_v53 = vpop.f32.mrf.mxu1  ;;  %v243_v54 = vpop.f32.mrf.mxu0  ;;  %v255_v55 = vsel %vm153_vm2, %v253_v52, -inf }
 0x341   :  { %v250_v56 = vmul.f32 0.35355338, %v243_v54  ;;  %256 = vmax.xlane.f32.xlu1 %v255_v55 }
 0x342   :  { %v1233_v57 = vpop.f32.mrf.mxu1  ;;  %v1238_v58 = vpop.f32.mrf.mxu0 }
 0x343   :  { %v254_v59 = vsel %vm252_vm4, -1e+10, %v250_v56 }
 0x344   :  { %v246_v60 = vpop.f32.mrf.mxu0  ;;  %v258_v61 = vsel %vm153_vm2, %v254_v59, -inf }
 0x345   :  { %259 = vmax.xlane.f32.xlu0 %v258_v61 }
 0x346   :  { %v1239_v62 = vpop.f32.mrf.mxu0 }
 0x352   :  { %328 = vrot.lane.b32.xlu1 %v1511_v42, %s1406_s7 }
 0x356   :  { %378 = vrot.lane.b32.xlu1 %v1508_v38, %s1407_s19 }
 0x3ca   :  { %v257_v63 = vpop.xlane.xlu1 %256 }
 0x3cb   :  { %v261_v2 = vsub.f32 %v253_v52, %v257_v63 }
 0x3cd   :  { %v263_v3 = vmul.f32 1.442695, %v261_v2 }
 0x3ce   :  { %v329_v4 = vpop.permute.xlu1 %328  ;;  %v260_v5 = vpop.xlane.xlu0 %259 }
 0x3cf   :  { %1371 = vpow2.f32 %v263_v3  ;;  %v334_v6 = vsel %vm284_vm5, %v329_v4, 0  ;;  %v262_v7 = vsub.f32 %v254_v59, %v260_v5 }
 0x3d0   :  { %1247 = vmatpush3.bf16.msra.mxu0 %v334_v6 }
 0x3d1   :  { %v265_v8 = vmul.f32 1.442695, %v262_v7  ;;  %1258 = vmatprep.subr.bf16.mxu0 %v1403_v14 }
 0x3d2   :  { %v379_v13 = vpop.permute.xlu1 %378 }
 0x3d3   :  { %1373 = vpow2.f32 %v265_v8  ;;  %v384_v23 = vsel %vm153_vm2, %v379_v13, 0 }
 0x3dc   :  { %v1372_v9 = vpop.eup %1371 }
 0x3dd   :  { %v267_v10 = vsel %vm153_vm2, %v1372_v9, 0.0 }
 0x3de   :  { %268 = vadd.xlane.f32.xlu0 %v267_v10 }
 0x3e0   :  { %v1374_v11 = vpop.eup %1373 }
 0x3e1   :  { %v270_v12 = vsel %vm153_vm2, %v1374_v11, 0.0 }
 0x3e2   :  { %271 = vadd.xlane.f32.xlu1 %v270_v12 }
 0x3f3   :  { %428 = vrot.lane.b32.xlu1 %v1511_v42, %s1407_s19 }
 0x3f4   :  { %279 = vrot.lane.b32.xlu0 %v1508_v38, %s1406_s7 }
 0x3f7   :  { %426 = vrot.lane.b32.xlu1 %v1511_v42, %s1408_s20 }
 0x3f8   :  { %376 = vrot.lane.b32.xlu0 %v1508_v38, %s1408_s20 }
 0x467   :  { %v269_v15 = vpop.xlane.xlu0 %268 }
 0x468   :  { %1375 = vrcp.f32 %v269_v15 }
 0x46b   :  { %v272_v16 = vpop.xlane.xlu1 %271  ;;  %v280_v17 = vpop.permute.xlu0 %279 }
 0x46c   :  { %1377 = vrcp.f32 %v272_v16  ;;  %v286_v18 = vsel %vm284_vm5, %v280_v17, 0 }
 0x46d   :  { %1241 = vmatpush3.bf16.msra.mxu1 %v286_v18 }
 0x46e   :  { %1252 = vmatprep.subr.bf16.mxu1 %v1403_v14 }
 0x46f   :  { %v429_v25 = vpop.permute.xlu1 %428  ;;  %v377_v28 = vpop.permute.xlu0 %376 }
 0x470   :  { %v434_v27 = vsel %vm153_vm2, %v429_v25, 0 }
 0x473   :  { %v427_v29 = vpop.permute.xlu1 %426 }
 0x475   :  { %v1376_v19 = vpop.eup %1375 }
 0x476   :  { %v275_v20 = vmul.f32 %v1376_v19, %v1372_v9 }
 0x478   :  { %v277_v21 = vpack.c.bf16 %v275_v20, %v275_v20 }
 0x479   :  { %v1378_v22 = vpop.eup %1377 }
 0x47a   :  { %1243 = vmatmul.mubr.msk.bf16.vlgmr.msra.gmra.mxu1 %vm153_vm2, %v277_v21  ;;  %v276_v24 = vmul.f32 %v1378_v22, %v1374_v11 }
 0x47b   :  { %1253 = vmatpush3.bf16.xpose.msra.mxu1 %v384_v23  ;;  %1254 = vmatprep.mubr.msk.bf16.mxu1 %vm1404_vm1, %v1403_v14 }
 0x47c   :  { %v278_v26 = vpack.c.bf16 %v276_v24, %v276_v24  ;;  %1264 = vmatprep.subr.bf16.mxu1 %v1403_v14 }
 0x47e   :  { %1249 = vmatmul.mubr.msk.bf16.vlgmr.msra.gmra.mxu0 %vm153_vm2, %v278_v26 }
 0x47f   :  { %1259 = vmatpush3.bf16.xpose.msra.mxu0 %v434_v27  ;;  %1260 = vmatprep.mubr.msk.bf16.mxu0 %vm1404_vm1, %v1403_v14 }
 0x480   :  { %1270 = vmatprep.subr.bf16.mxu0 %v1403_v14 }
 0x482   :  { %1255 = vmatmul.mubr.msk.bf16.vlgmr.msra.gmra.mxu1 %vm153_vm2, %v377_v28 }
 0x483   :  { %1266 = vmatprep.mubr.msk.bf16.mxu1 %vm1404_vm1, %v1403_v14 }
 0x486   :  { %1261 = vmatmul.mubr.msk.bf16.vlgmr.msra.gmra.mxu0 %vm153_vm2, %v427_v29 }
 0x487   :  { %1272 = vmatprep.mubr.msk.bf16.mxu0 %vm1404_vm1, %v1403_v14 }
 0x53a   :  { %v1572_v30 = vpop.f32.mrf.mxu1 }
 0x53c   :  { %v1244_v31 = vpop.f32.mrf.mxu1 }
 0x53e   :  { %v325_v32 = vpop.f32.mrf.mxu1  ;;  %v1574_v33 = vpop.f32.mrf.mxu0 }
 0x540   :  { %v1245_v34 = vpop.f32.mrf.mxu1  ;;  %v1250_v35 = vpop.f32.mrf.mxu0 }
 0x542   :  { %v373_v36 = vpop.f32.mrf.mxu0  ;;  %v420_v37 = vpop.f32.mrf.mxu1 }
 0x543   :  { %v476_v39 = vmul.f32 0.35355338, %v420_v37 }
 0x544   :  { %v1251_v40 = vpop.f32.mrf.mxu0  ;;  %v1256_v41 = vpop.f32.mrf.mxu1 }
 0x545   :  { %v478_v43 = vsel %vm251_vm3, -1e+10, %v476_v39 }
 0x546   :  { %v423_v44 = vpop.f32.mrf.mxu1  ;;  %v470_v45 = vpop.f32.mrf.mxu0  ;;  %v480_v46 = vsel %vm153_vm2, %v478_v43, -inf }
 0x547   :  { %v477_v48 = vmul.f32 0.35355338, %v470_v45  ;;  %481 = vmax.xlane.f32.xlu0 %v480_v46 }
 0x548   :  { %v1257_v49 = vpop.f32.mrf.mxu1  ;;  %v1262_v51 = vpop.f32.mrf.mxu0 }
 0x549   :  { %v479_v52 = vsel %vm252_vm4, -1e+10, %v477_v48 }
 0x54a   :  { %v473_v53 = vpop.f32.mrf.mxu0  ;;  %v483_v54 = vsel %vm153_vm2, %v479_v52, -inf }
 0x54b   :  { %484 = vmax.xlane.f32.xlu1 %v483_v54 }
 0x54c   :  { %v1263_v55 = vpop.f32.mrf.mxu0 }
 0x55c   :  { %552 = vrot.lane.b32.xlu1 %v1511_v42, %s1409_s21 }
 0x560   :  { %602 = vrot.lane.b32.xlu1 %v1508_v38, %s1410_s22 }
 0x564   :  { %652 = vrot.lane.b32.xlu1 %v1511_v42, %s1410_s22 }
 0x568   :  { %650 = vrot.lane.b32.xlu1 %v1511_v42, %s1411_s23 }
 0x5d0   :  { %v482_v56 = vpop.xlane.xlu0 %481 }
 0x5d1   :  { %v486_v57 = vsub.f32 %v478_v43, %v482_v56 }
 0x5d3   :  { %v488_v58 = vmul.f32 1.442695, %v486_v57 }
 0x5d4   :  { %v485_v59 = vpop.xlane.xlu1 %484 }
 0x5d5   :  { %1379 = vpow2.f32 %v488_v58  ;;  %v487_v60 = vsub.f32 %v479_v52, %v485_v59 }
 0x5d7   :  { %v490_v61 = vmul.f32 1.442695, %v487_v60 }
 0x5d8   :  { %v553_v62 = vpop.permute.xlu1 %552 }
 0x5d9   :  { %1381 = vpow2.f32 %v490_v61  ;;  %v558_v63 = vsel %vm284_vm5, %v553_v62, 0 }
 0x5da   :  { %1271 = vmatpush3.bf16.msra.mxu0 %v558_v63 }
 0x5db   :  { %1282 = vmatprep.subr.bf16.mxu0 %v1403_v14 }
 0x5dc   :  { %v603_v11 = vpop.permute.xlu1 %602 }
 0x5dd   :  { %v608_v16 = vsel %vm153_vm2, %v603_v11, 0 }
 0x5e0   :  { %v653_v18 = vpop.permute.xlu1 %652 }
 0x5e1   :  { %v658_v20 = vsel %vm153_vm2, %v653_v18, 0 }
 0x5e2   :  { %v1380_v2 = vpop.eup %1379 }
 0x5e3   :  { %v492_v3 = vsel %vm153_vm2, %v1380_v2, 0.0 }
 0x5e4   :  { %493 = vadd.xlane.f32.xlu0 %v492_v3  ;;  %v651_v22 = vpop.permute.xlu1 %650 }
 0x5e6   :  { %v1382_v4 = vpop.eup %1381 }
 0x5e7   :  { %v495_v5 = vsel %vm153_vm2, %v1382_v4, 0.0 }
 0x5e8   :  { %496 = vadd.xlane.f32.xlu0 %v495_v5 }
 0x5fe   :  { %504 = vrot.lane.b32.xlu0 %v1508_v38, %s1409_s21 }
 0x602   :  { %600 = vrot.lane.b32.xlu0 %v1508_v38, %s1411_s23 }
 0x66d   :  { %v494_v6 = vpop.xlane.xlu0 %493 }
 0x66e   :  { %1383 = vrcp.f32 %v494_v6 }
 0x671   :  { %v497_v7 = vpop.xlane.xlu0 %496 }
 0x672   :  { %1385 = vrcp.f32 %v497_v7 }
 0x675   :  { %v505_v8 = vpop.permute.xlu0 %504 }
 0x676   :  { %v510_v9 = vsel %vm284_vm5, %v505_v8, 0 }
 0x677   :  { %1265 = vmatpush3.bf16.msra.mxu1 %v510_v9 }
 0x678   :  { %1276 = vmatprep.subr.bf16.mxu1 %v1403_v14 }
 0x679   :  { %v601_v21 = vpop.permute.xlu0 %600 }
 0x67b   :  { %v1384_v10 = vpop.eup %1383 }
 0x67c   :  { %v500_v12 = vmul.f32 %v1384_v10, %v1380_v2 }
 0x67e   :  { %v502_v13 = vpack.c.bf16 %v500_v12, %v500_v12 }
 0x67f   :  { %v1386_v15 = vpop.eup %1385 }
 0x680   :  { %1267 = vmatmul.mubr.msk.bf16.vlgmr.msra.gmra.mxu1 %vm153_vm2, %v502_v13  ;;  %v501_v17 = vmul.f32 %v1386_v15, %v1382_v4 }
 0x681   :  { %1277 = vmatpush3.bf16.xpose.msra.mxu1 %v608_v16  ;;  %1278 = vmatprep.mubr.msk.bf16.mxu1 %vm1404_vm1, %v1403_v14 }
 0x682   :  { %v503_v19 = vpack.c.bf16 %v501_v17, %v501_v17  ;;  %1288 = vmatprep.subr.bf16.mxu1 %v1403_v14 }
 0x684   :  { %1273 = vmatmul.mubr.msk.bf16.vlgmr.msra.gmra.mxu0 %vm153_vm2, %v503_v19 }
 0x685   :  { %1283 = vmatpush3.bf16.xpose.msra.mxu0 %v658_v20  ;;  %1284 = vmatprep.mubr.msk.bf16.mxu0 %vm1404_vm1, %v1403_v14 }
 0x686   :  { %1294 = vmatprep.subr.bf16.mxu0 %v1403_v14 }
 0x688   :  { %1279 = vmatmul.mubr.msk.bf16.vlgmr.msra.gmra.mxu1 %vm153_vm2, %v601_v21 }
 0x689   :  { %1290 = vmatprep.mubr.msk.bf16.mxu1 %vm1404_vm1, %v1403_v14 }
 0x68c   :  { %1285 = vmatmul.mubr.msk.bf16.vlgmr.msra.gmra.mxu0 %vm153_vm2, %v651_v22 }
 0x68d   :  { %1296 = vmatprep.mubr.msk.bf16.mxu0 %vm1404_vm1, %v1403_v14 }
 0x740   :  { %v1610_v23 = vpop.f32.mrf.mxu1 }
 0x742   :  { %v1268_v24 = vpop.f32.mrf.mxu1 }
 0x744   :  { %v549_v25 = vpop.f32.mrf.mxu1  ;;  %v1612_v26 = vpop.f32.mrf.mxu0 }
 0x745   :  { %v1348_v27 = vpack.i.bf16 %v1612_v26, %v1610_v23 }
 0x746   :  { %v1269_v28 = vpop.f32.mrf.mxu1  ;;  %v1274_v29 = vpop.f32.mrf.mxu0 }
 0x748   :  { %v597_v31 = vpop.f32.mrf.mxu0  ;;  %v644_v32 = vpop.f32.mrf.mxu1 }
 0x749   :  { %v700_v34 = vmul.f32 0.35355338, %v644_v32 }
 0x74a   :  { %v1275_v35 = vpop.f32.mrf.mxu0  ;;  %v1280_v36 = vpop.f32.mrf.mxu1 }
 0x74b   :  { %v702_v37 = vsel %vm251_vm3, -1e+10, %v700_v34 }
 0x74c   :  { %v647_v39 = vpop.f32.mrf.mxu1  ;;  %v694_v40 = vpop.f32.mrf.mxu0  ;;  %v704_v41 = vsel %vm153_vm2, %v702_v37, -inf }
 0x74d   :  { %v701_v43 = vmul.f32 0.35355338, %v694_v40  ;;  %705 = vmax.xlane.f32.xlu0 %v704_v41 }
 0x74e   :  { %v1281_v44 = vpop.f32.mrf.mxu1  ;;  %v1286_v45 = vpop.f32.mrf.mxu0 }
 0x74f   :  { %v703_v46 = vsel %vm252_vm4, -1e+10, %v701_v43 }
 0x750   :  { %v697_v48 = vpop.f32.mrf.mxu0  ;;  %v707_v49 = vsel %vm153_vm2, %v703_v46, -inf }
 0x751   :  { %708 = vmax.xlane.f32.xlu1 %v707_v49 }
 0x752   :  { %v1287_v51 = vpop.f32.mrf.mxu0 }
 0x762   :  { %776 = vrot.lane.b32.xlu1 %v1511_v42, %s1412_s24 }
 0x766   :  { %826 = vrot.lane.b32.xlu1 %v1508_v38, %s1413_s25 }
 0x76a   :  { %876 = vrot.lane.b32.xlu1 %v1511_v42, %s1413_s25 }
 0x76e   :  { %874 = vrot.lane.b32.xlu1 %v1511_v42, %s1414_s26 }
 0x7d6   :  { %v706_v52 = vpop.xlane.xlu0 %705 }
 0x7d7   :  { %v710_v53 = vsub.f32 %v702_v37, %v706_v52 }
 0x7d9   :  { %v712_v54 = vmul.f32 1.442695, %v710_v53 }
 0x7da   :  { %v709_v55 = vpop.xlane.xlu1 %708 }
 0x7db   :  { %1387 = vpow2.f32 %v712_v54  ;;  %v711_v56 = vsub.f32 %v703_v46, %v709_v55 }
 0x7dd   :  { %v714_v57 = vmul.f32 1.442695, %v711_v56 }
 0x7de   :  { %v777_v58 = vpop.permute.xlu1 %776 }
 0x7df   :  { %1389 = vpow2.f32 %v714_v57  ;;  %v782_v59 = vsel %vm284_vm5, %v777_v58, 0 }
 0x7e0   :  { %1295 = vmatpush3.bf16.msra.mxu0 %v782_v59 }
 0x7e1   :  { %1306 = vmatprep.subr.bf16.mxu0 %v1403_v14 }
 0x7e2   :  { %v827_v7 = vpop.permute.xlu1 %826 }
 0x7e3   :  { %v832_v11 = vsel %vm153_vm2, %v827_v7, 0 }
 0x7e6   :  { %v877_v13 = vpop.permute.xlu1 %876 }
 0x7e7   :  { %v882_v16 = vsel %vm153_vm2, %v877_v13, 0 }
 0x7e8   :  { %v1388_v60 = vpop.eup %1387 }
 0x7e9   :  { %v716_v61 = vsel %vm153_vm2, %v1388_v60, 0.0 }
 0x7ea   :  { %717 = vadd.xlane.f32.xlu0 %v716_v61  ;;  %v875_v18 = vpop.permute.xlu1 %874 }
 0x7ec   :  { %v1390_v62 = vpop.eup %1389 }
 0x7ed   :  { %v719_v63 = vsel %vm153_vm2, %v1390_v62, 0.0 }
 0x7ee   :  { %720 = vadd.xlane.f32.xlu0 %v719_v63 }
 0x804   :  { %728 = vrot.lane.b32.xlu0 %v1508_v38, %s1412_s24 }
 0x808   :  { %824 = vrot.lane.b32.xlu0 %v1508_v38, %s1414_s26 }
 0x873   :  { %v718_v2 = vpop.xlane.xlu0 %717 }
 0x874   :  { %1391 = vrcp.f32 %v718_v2 }
 0x877   :  { %v721_v3 = vpop.xlane.xlu0 %720 }
 0x878   :  { %1393 = vrcp.f32 %v721_v3 }
 0x87b   :  { %v729_v4 = vpop.permute.xlu0 %728 }
 0x87c   :  { %v734_v5 = vsel %vm284_vm5, %v729_v4, 0  ;;  %v1365_v4 = vld [vmem:[%s1701_s5 + $0x8] sm:$0xff]  }
 0x87d   :  { %1289 = vmatpush3.bf16.msra.mxu1 %v734_v5  ;;  %v1366_v5 = vld [vmem:[%s1701_s5] sm:$0xff]  }
 0x87e   :  { %1300 = vmatprep.subr.bf16.mxu1 %v1403_v14 }
 0x87f   :  { %v825_v17 = vpop.permute.xlu0 %824 }
 0x881   :  { %v1392_v6 = vpop.eup %1391 }
 0x882   :  { %v724_v8 = vmul.f32 %v1392_v6, %v1388_v60 }
 0x884   :  { %v726_v9 = vpack.c.bf16 %v724_v8, %v724_v8 }
 0x885   :  { %v1394_v10 = vpop.eup %1393 }
 0x886   :  { %1291 = vmatmul.mubr.msk.bf16.vlgmr.msra.gmra.mxu1 %vm153_vm2, %v726_v9  ;;  %v725_v12 = vmul.f32 %v1394_v10, %v1390_v62 }
 0x887   :  { %1301 = vmatpush3.bf16.xpose.msra.mxu1 %v832_v11  ;;  %1302 = vmatprep.mubr.msk.bf16.mxu1 %vm1404_vm1, %v1403_v14 }
 0x888   :  { %v727_v15 = vpack.c.bf16 %v725_v12, %v725_v12  ;;  %1312 = vmatprep.subr.bf16.mxu1 %v1403_v14 }
 0x88a   :  { %1297 = vmatmul.mubr.msk.bf16.vlgmr.msra.gmra.mxu0 %vm153_vm2, %v727_v15 }
 0x88b   :  { %1307 = vmatpush3.bf16.xpose.msra.mxu0 %v882_v16  ;;  %1308 = vmatprep.mubr.msk.bf16.mxu0 %vm1404_vm1, %v1403_v14 }
 0x88c   :  { %1318 = vmatprep.subr.bf16.mxu0 %v1403_v14 }
 0x88e   :  { %1303 = vmatmul.mubr.msk.bf16.vlgmr.msra.gmra.mxu1 %vm153_vm2, %v825_v17 }
 0x88f   :  { %1314 = vmatprep.mubr.msk.bf16.mxu1 %vm1404_vm1, %v1403_v14 }
 0x892   :  { %1309 = vmatmul.mubr.msk.bf16.vlgmr.msra.gmra.mxu0 %vm153_vm2, %v875_v18 }
 0x893   :  { %1320 = vmatprep.mubr.msk.bf16.mxu0 %vm1404_vm1, %v1403_v14 }
 0x946   :  { %v770_v19 = vpop.f32.mrf.mxu1 }
 0x948   :  { %v1292_v20 = vpop.f32.mrf.mxu1 }
 0x94a   :  { %v773_v21 = vpop.f32.mrf.mxu1  ;;  %v818_v22 = vpop.f32.mrf.mxu0 }
 0x94b   :  { %v1353_v47 = vpack.i.bf16 %v818_v22, %v770_v19 }
 0x94c   :  { %v1293_v24 = vpop.f32.mrf.mxu1  ;;  %v1298_v25 = vpop.f32.mrf.mxu0 }
 0x94e   :  { %v821_v28 = vpop.f32.mrf.mxu0  ;;  %v868_v29 = vpop.f32.mrf.mxu1 }
 0x94f   :  { %v924_v31 = vmul.f32 0.35355338, %v868_v29 }
 0x950   :  { %v1299_v32 = vpop.f32.mrf.mxu0  ;;  %v1304_v34 = vpop.f32.mrf.mxu1 }
 0x951   :  { %v926_v35 = vsel %vm251_vm3, -1e+10, %v924_v31 }
 0x952   :  { %v871_v36 = vpop.f32.mrf.mxu1  ;;  %v918_v37 = vpop.f32.mrf.mxu0  ;;  %v928_v39 = vsel %vm153_vm2, %v926_v35, -inf }
 0x953   :  { %v925_v40 = vmul.f32 0.35355338, %v918_v37  ;;  %929 = vmax.xlane.f32.xlu0 %v928_v39  ;;  %v1178_v36 = vld [vmem:[%s1702_s6] ss:$0 sm:$0xff] }
 0x954   :  { %v1305_v41 = vpop.f32.mrf.mxu1  ;;  %v1310_v43 = vpop.f32.mrf.mxu0 }
 0x955   :  { %v927_v44 = vsel %vm252_vm4, -1e+10, %v925_v40 }
 0x956   :  { %v921_v45 = vpop.f32.mrf.mxu0  ;;  %v931_v46 = vsel %vm153_vm2, %v927_v44, -inf }
 0x957   :  { %932 = vmax.xlane.f32.xlu1 %v931_v46 }
 0x958   :  { %v1311_v48 = vpop.f32.mrf.mxu0 }
 0x968   :  { %1000 = vrot.lane.b32.xlu1 %v1511_v42, %s1415_s27 }
 0x96c   :  { %1349 = vrot.lane.b32.xlu1 %v1348_v27, %s1416_s28 }
 0x970   :  { %1354 = vrot.lane.b32.xlu1 %v1353_v47, %s1417_s29 }
 0x9dc   :  { %v930_v49 = vpop.xlane.xlu0 %929 }
 0x9dd   :  { %v934_v51 = vsub.f32 %v926_v35, %v930_v49 }
 0x9df   :  { %v936_v50 = vmul.f32 1.442695, %v934_v51 }
 0x9e0   :  { %v933_v52 = vpop.xlane.xlu1 %932 }
 0x9e1   :  { %1395 = vpow2.f32 %v936_v50  ;;  %v935_v53 = vsub.f32 %v927_v44, %v933_v52 }
 0x9e3   :  { %v938_v54 = vmul.f32 1.442695, %v935_v53 }
 0x9e4   :  { %v1001_v55 = vpop.permute.xlu1 %1000 }
 0x9e5   :  { %1397 = vpow2.f32 %v938_v54  ;;  %v1006_v56 = vsel %vm284_vm5, %v1001_v55, 0 }
 0x9e6   :  { %1319 = vmatpush3.bf16.msra.mxu0 %v1006_v56 }
 0x9e8   :  { %v1350_v16 = vpop.permute.xlu1 %1349 }
 0x9e9   :  { %v1352_v18 = vunpack.i.h.bf16 %v1350_v16 }
 0x9eb   :  { %v1073_v22 = vsel %vm153_vm2, %v1574_v33, %v1352_v18 }
 0x9ec   :  { %v1355_v17 = vpop.permute.xlu1 %1354 }
 0x9ed   :  { %v1357_v19 = vunpack.i.h.bf16 %v1355_v17  ;;  %v1356_v20 = vunpack.i.l.bf16 %v1355_v17 }
 0x9ee   :  { %v1396_v42 = vpop.eup %1395 }
 0x9ef   :  { %v940_v57 = vsel %vm153_vm2, %v1396_v42, 0.0  ;;  %v1076_v31 = vsel %vm1074_vm6, %v1073_v22, %v1357_v19 }
 0x9f0   :  { %941 = vadd.xlane.f32.xlu0 %v940_v57 }
 0x9f2   :  { %v1398_v23 = vpop.eup %1397 }
 0x9f3   :  { %v943_v26 = vsel %vm153_vm2, %v1398_v23, 0.0 }
 0x9f4   :  { %944 = vadd.xlane.f32.xlu0 %v943_v26 }
 0xa0a   :  { %952 = vrot.lane.b32.xlu0 %v1508_v38, %s1415_s27 }
 0xa79   :  { %v942_v27 = vpop.xlane.xlu0 %941 }
 0xa7a   :  { %1399 = vrcp.f32 %v942_v27 }
 0xa7d   :  { %v945_v58 = vpop.xlane.xlu0 %944 }
 0xa7e   :  { %1401 = vrcp.f32 %v945_v58 }
 0xa81   :  { %v953_v59 = vpop.permute.xlu0 %952 }
 0xa82   :  { %v958_v60 = vsel %vm284_vm5, %v953_v59, 0 }
 0xa83   :  { %1313 = vmatpush3.bf16.msra.mxu1 %v958_v60 }
 0xa84   :  { %1324 = vmatprep.subr.bf16.mxu1 %v1403_v14 }
 0xa87   :  { %v1400_v61 = vpop.eup %1399 }
 0xa88   :  { %v948_v62 = vmul.f32 %v1400_v61, %v1396_v42 }
 0xa8a   :  { %v950_v63 = vpack.c.bf16 %v948_v62, %v948_v62 }
 0xa8b   :  { %v1402_v2 = vpop.eup %1401 }
 0xa8c   :  { %1315 = vmatmul.mubr.msk.bf16.vlgmr.msra.gmra.mxu1 %vm153_vm2, %v950_v63  ;;  %v949_v3 = vmul.f32 %v1402_v2, %v1398_v23 }
 0xa8d   :  { %1328 = vmatprep.mubr.msk.bf16.mxu1 %vm1404_vm1, %v1403_v14  ;;  %1325 = vmatpush3.bf16.msra.mxu1 %v1365_v4 }
 0xa8e   :  { %v951_v38 = vpack.c.bf16 %v949_v3, %v949_v3  ;;  %1326 = vmatprep.subr.bf16.mxu1 %v1403_v14  ;;  %v1351_v14 = vunpack.i.l.bf16 %v1350_v16 }
 0xa90   :  { %1321 = vmatmul.mubr.msk.bf16.vlgmr.msra.gmra.mxu0 %vm153_vm2, %v951_v38  ;;  %v1072_v24 = vsel %vm153_vm2, %v1572_v30, %v1351_v14 }
 0xa91   :  { %1327 = vmatpush3.bf16.msra.mxu1 %v1366_v5  ;;  %v1075_v29 = vsel %vm1074_vm6, %v1072_v24, %v1356_v20 }
 0xb4c   :  { %v994_v6 = vpop.f32.mrf.mxu1 }
 0xb4e   :  { %v1316_v7 = vpop.f32.mrf.mxu1 }
 0xb50   :  { %v997_v8 = vpop.f32.mrf.mxu1  ;;  %v1042_v9 = vpop.f32.mrf.mxu0 }
 0xb51   :  { %v1358_v10 = vpack.i.bf16 %v1042_v9, %v994_v6 }
 0xb52   :  { %v1317_v11 = vpop.f32.mrf.mxu1  ;;  %v1322_v12 = vpop.f32.mrf.mxu0 }
 0xb53   :  { %1359 = vrot.lane.b32.xlu0 %v1358_v10, %s1418_s11 }
 0xb54   :  { %v1045_v13 = vpop.f32.mrf.mxu0 }
 0xb56   :  { %v1323_v15 = vpop.f32.mrf.mxu0 }
 0xbc5   :  { %v1360_v21 = vpop.permute.xlu0 %1359 }
 0xbc6   :  { %v1362_v25 = vunpack.i.h.bf16 %v1360_v21  ;;  %v1361_v28 = vunpack.i.l.bf16 %v1360_v21 }
 0xbc8   :  { %v1079_v32 = vsel %vm1077_vm7, %v1076_v31, %v1362_v25  ;;  %v1078_v34 = vsel %vm1077_vm7, %v1075_v29, %v1361_v28 }
 0xbc9   :  { %v1080_v35 = vpack.c.bf16 %v1079_v32, %v1078_v34 }
 0xbcb   :  { %1329 = vmatmul.mubr.msk.bf16.vlgmr.msra.gmra.mxu1 %vm34_vm0, %v1080_v35 }
 0xc8b   :  { %v1141_v37 = vpop.f32.mrf.mxu1 }
 0xc8c   :  { %v1142_v39 = vadd.f32 %v1178_v36, %v1141_v37 }
 0xc8d   :  { %v1330_v40 = vpop.f32.mrf.mxu1 }
 0xc8e   :  { %v1148_v33 = vadd.f32 %v1142_v39, %v1467_v0 }
 0xc8f   :  { %v1144_v41 = vpop.f32.mrf.mxu1 }
 0xc90   :  { %1150 = vst.msk [vmem:[%s1703_s8] sm:$0xff] %vm34_vm0, %v1148_v33  ;;  %v1145_v30 = vadd.f32 %v1178_v36, %v1144_v41 }
 0xc91   :  { %v1331_v43 = vpop.f32.mrf.mxu1 }
 0xc92   :  { %v1149_v44 = vadd.f32 %v1145_v30, %v1472_v1 }
 0xc94   :  { %1151 = vst.msk [vmem:[%s1703_s8 + $0x8] sm:$0xff] %vm34_vm0, %v1149_v44 }

// kernel: tevc_forward.26
= control target key start
LH: loop header
LB: loop body
LE: loop exit
PB: predicated region body
PF: predicated region fallthrough
CT: control target
= control target key end

     0   :  { %vm42_vm0 = vcmask 261120   ;;  %v1480_v15 = vmov 0.0   ;;  %vm1481_vm1 = vmmov 0   ;;  %vm226_vm2 = vcmask 64512   ;;  %s1484_s11 = smov 88   ;;  %s1485_s12 = smov 112   ;;  %s1774_s0 = inlined_call_operand.vmem [shape: f32[2,8,32], index: 0, kind: input, shape index: {}]   ;;  %s1775_s6 = inlined_call_operand.vmem [shape: bf16[32,64], index: 6, kind: input, shape index: {}]   ;;  %s1776_s1 = inlined_call_operand.vmem [shape: f32[2,8,32], index: 1, kind: input, shape index: {}]   ;;  %s1777_s4 = inlined_call_operand.vmem [shape: bf16[32,32], index: 4, kind: input, shape index: {}]   ;;  %s1778_s2 = inlined_call_operand.vmem [shape: f32[1,32], index: 2, kind: input, shape index: {}]   ;;  %s1779_s3 = inlined_call_operand.vmem [shape: f32[1,32], index: 3, kind: input, shape index: {}]   ;;  %s1780_s7 = inlined_call_operand.vmem [shape: f32[1,64], index: 7, kind: input, shape index: {}]   ;;  %s1781_s5 = inlined_call_operand.vmem [shape: f32[1,32], index: 5, kind: input, shape index: {}]   ;;  %s1782_s8 = inlined_call_operand.vmem [shape: bf16[32,32], index: 8, kind: input, shape index: {}]   ;;  %s1783_s9 = inlined_call_operand.vmem [shape: f32[1,32], index: 9, kind: input, shape index: {}]   ;;  %s1784_s10 = inlined_call_operand.vmem [shape: f32[2,8,32], index: 10, kind: output, shape index: {}]  }
   0x1   :  { %v1550_v0 = vld [vmem:[%s1774_s0] sm:$0xff]  ;;  %v1555_v1 = vld [vmem:[%s1774_s0 + $0x8] sm:$0xff]  ;;  %1299 = vmatprep.subr.bf16.mxu1 %v1480_v15  ;;  %1291 = vmatprep.subr.bf16.mxu0 %v1480_v15  ;;  %vm351_vm3 = vcmask 1043456   ;;  %s1486_s13 = smov 80   ;;  %s1487_s14 = smov 104   ;;  %vm1138_vm4 = vcmask 130048  }
   0x2   :  { %v43_v2 = vsel %vm42_vm0, %v1550_v0, 0.0  ;;  %v46_v3 = vsel %vm42_vm0, %v1555_v1, 0.0  ;;  %v1438_v14 = vld [vmem:[%s1775_s6 + $0x8] sm:$0xff]   ;;  %v1439_v16 = vld [vmem:[%s1775_s6] sm:$0xff]   ;;  %1303 = vmatprep.mubr.msk.bf16.mxu1 %vm1481_vm1, %v1480_v15  ;;  %1295 = vmatprep.mubr.msk.bf16.mxu0 %vm1481_vm1, %v1480_v15  ;;  %s1488_s15 = smov 72   ;;  %s1489_s16 = smov 8  }
   0x3   :  { %44 = vadd.xlane.f32.xlu0 %v43_v2  ;;  %1300 = vmatpush3.bf16.msra.mxu1 %v1438_v14  ;;  %v38_v17 = vld [vmem:[%s1776_s1] sm:$0xff]  ;;  %v39_v18 = vld [vmem:[%s1776_s1 + $0x8] sm:$0xff]  ;;  %s1490_s0 = smov 16   ;;  %s1491_s21 = smov 24   ;;  %vm1141_vm5 = vcmask 195584  }
   0x4   :  { %1301 = vmatprep.subr.bf16.mxu1 %v1480_v15  ;;  %v1440_v19 = vld [vmem:[%s1777_s4 + $0x8] sm:$0xff]   ;;  %v154_v20 = vpack.c.bf16 %v39_v18, %v38_v17  ;;  %v1441_v21 = vld [vmem:[%s1777_s4] sm:$0xff]  }
   0x5   :  { %1292 = vmatpush3.bf16.msra.mxu0 %v1440_v19  ;;  %v1220_v30 = vld [vmem:[%s1778_s2] ss:$0 sm:$0xff] }
   0x6   :  { %1293 = vmatprep.subr.bf16.mxu0 %v1480_v15  ;;  %v1221_v34 = vld [vmem:[%s1779_s3] ss:$0 sm:$0xff] }
   0x7   :  { %47 = vadd.xlane.f32.xlu0 %v46_v3  ;;  %1302 = vmatpush3.bf16.msra.mxu1 %v1439_v16  ;;  %v1226_v39 = vld [vmem:[%s1780_s7] ss:$0 sm:$0xff]  ;;  %s1483_s7 = smov 120  }
   0x8   :  { %1313 = vmatprep.subr.bf16.mxu1 %v1480_v15  ;;  %v1222_v50 = vld [vmem:[%s1781_s5] ss:$0 sm:$0xff]  ;;  %s1482_s5 = smov 96  }
   0x9   :  { %1294 = vmatpush3.bf16.msra.mxu0 %v1441_v21 }
   0xa   :  { %1304 = vmatmul.mubr.msk.bf16.vlgmr.msra.gmra.mxu1 %vm42_vm0, %v154_v20  ;;  %1307 = vmatprep.subr.bf16.mxu0 %v1480_v15 }
   0xb   :  { %1315 = vmatprep.mubr.msk.bf16.mxu1 %vm1481_vm1, %v1480_v15 }
  0x8c   :  { %v45_v4 = vpop.xlane.xlu0 %44 }
  0x8d   :  { %v50_v5 = vmul.f32 0.03125, %v45_v4 }
  0x8f   :  { %v52_v6 = vsub.f32 %v1550_v0, %v50_v5 }
  0x90   :  { %v48_v7 = vpop.xlane.xlu0 %47 }
  0x91   :  { %v51_v8 = vmul.f32 0.03125, %v48_v7  ;;  %v54_v9 = vmul.f32 %v52_v6, %v52_v6 }
  0x93   :  { %v53_v10 = vsub.f32 %v1555_v1, %v51_v8  ;;  %v56_v11 = vsel %vm42_vm0, %v54_v9, 0.0 }
  0x94   :  { %57 = vadd.xlane.f32.xlu1 %v56_v11 }
  0x95   :  { %v55_v12 = vmul.f32 %v53_v10, %v53_v10 }
  0x97   :  { %v59_v13 = vsel %vm42_vm0, %v55_v12, 0.0 }
  0x98   :  { %60 = vadd.xlane.f32.xlu1 %v59_v13 }
  0xca   :  { %v215_v40 = vpop.f32.mrf.mxu1 }
  0xcb   :  { %v216_v41 = vadd.f32 %v1226_v39, %v215_v40 }
  0xcc   :  { %v1305_v42 = vpop.f32.mrf.mxu1 }
  0xcd   :  { %v1608_v43 = vpack.c.bf16 %v216_v41, %v216_v41 }
  0xce   :  { %v218_v44 = vpop.f32.mrf.mxu1 }
  0xcf   :  { %v219_v45 = vadd.f32 %v1226_v39, %v218_v44  ;;  %v231_v46 = vsel %vm226_vm2, %v1608_v43, 0 }
  0xd0   :  { %v1306_v47 = vpop.f32.mrf.mxu1 }
  0xd1   :  { %v1612_v48 = vpack.c.bf16 %v219_v45, %v219_v45 }
  0xd3   :  { %v277_v49 = vsel %vm226_vm2, %v1612_v48, 0 }
  0xd4   :  { %1314 = vmatpush3.bf16.xpose.msra.mxu1 %v277_v49 }
  0xd5   :  { %1325 = vmatprep.subr.bf16.mxu1 %v1480_v15 }
 0x11d   :  { %v58_v22 = vpop.xlane.xlu1 %57 }
 0x11e   :  { %v62_v23 = vmul.f32 0.03125, %v58_v22 }
 0x120   :  { %v64_v24 = vadd.f32 1e-05, %v62_v23 }
 0x121   :  { %v61_v25 = vpop.xlane.xlu1 %60 }
 0x122   :  { %1444 = vrsqrt.f32 %v64_v24  ;;  %v63_v26 = vmul.f32 0.03125, %v61_v25 }
 0x124   :  { %v65_v27 = vadd.f32 1e-05, %v63_v26 }
 0x126   :  { %1446 = vrsqrt.f32 %v65_v27 }
 0x12f   :  { %v1445_v28 = vpop.eup %1444 }
 0x130   :  { %v68_v29 = vmul.f32 %v1445_v28, %v52_v6 }
 0x132   :  { %v76_v33 = vmul.f32 %v1220_v30, %v68_v29 }
 0x133   :  { %v1447_v31 = vpop.eup %1446 }
 0x134   :  { %v69_v32 = vmul.f32 %v1447_v31, %v53_v10  ;;  %v84_v36 = vadd.f32 %v1221_v34, %v76_v33 }
 0x136   :  { %v77_v35 = vmul.f32 %v1220_v30, %v69_v32 }
 0x138   :  { %v85_v37 = vadd.f32 %v1221_v34, %v77_v35 }
 0x13a   :  { %v86_v38 = vpack.c.bf16 %v85_v37, %v84_v36 }
 0x13c   :  { %1296 = vmatmul.mubr.msk.bf16.vlgmr.msra.gmra.mxu0 %vm42_vm0, %v86_v38 }
 0x13d   :  { %1309 = vmatprep.mubr.msk.bf16.mxu0 %vm1481_vm1, %v1480_v15  ;;  %1308 = vmatpush3.bf16.xpose.msra.mxu0 %v231_v46 }
 0x13e   :  { %1319 = vmatprep.subr.bf16.mxu0 %v1480_v15 }
 0x1fc   :  { %v147_v51 = vpop.f32.mrf.mxu0 }
 0x1fd   :  { %v148_v52 = vadd.f32 %v1222_v50, %v147_v51 }
 0x1fe   :  { %v1297_v53 = vpop.f32.mrf.mxu0 }
 0x1ff   :  { %v1621_v54 = vpack.c.bf16 %v148_v52, %v148_v52 }
 0x200   :  { %v150_v55 = vpop.f32.mrf.mxu0 }
 0x201   :  { %v151_v56 = vadd.f32 %v1222_v50, %v150_v55  ;;  %1310 = vmatmul.mubr.msk.bf16.vlgmr.msra.gmra.mxu0 %vm226_vm2, %v1621_v54 }
 0x202   :  { %v1298_v57 = vpop.f32.mrf.mxu0  ;;  %1321 = vmatprep.mubr.msk.bf16.mxu0 %vm1481_vm1, %v1480_v15 }
 0x203   :  { %v1627_v58 = vpack.c.bf16 %v151_v56, %v151_v56 }
 0x205   :  { %1316 = vmatmul.mubr.msk.bf16.vlgmr.msra.gmra.mxu1 %vm226_vm2, %v1627_v58 }
 0x206   :  { %1327 = vmatprep.mubr.msk.bf16.mxu1 %vm1481_vm1, %v1480_v15 }
 0x2c1   :  { %v267_v59 = vpop.f32.mrf.mxu0 }
 0x2c2   :  { %v319_v60 = vmul.f32 0.35355338, %v267_v59 }
 0x2c3   :  { %v1311_v61 = vpop.f32.mrf.mxu0 }
 0x2c4   :  { %v321_v62 = vsel %vm226_vm2, %v319_v60, -inf }
 0x2c5   :  { %v313_v63 = vpop.f32.mrf.mxu1  ;;  %322 = vmax.xlane.f32.xlu0 %v321_v62  ;;  %v270_v2 = vpop.f32.mrf.mxu0 }
 0x2c6   :  { %v320_v3 = vmul.f32 0.35355338, %v313_v63 }
 0x2c7   :  { %v1312_v4 = vpop.f32.mrf.mxu0  ;;  %v1317_v5 = vpop.f32.mrf.mxu1 }
 0x2c8   :  { %v324_v6 = vsel %vm226_vm2, %v320_v3, -inf }
 0x2c9   :  { %325 = vmax.xlane.f32.xlu1 %v324_v6  ;;  %v316_v7 = vpop.f32.mrf.mxu1 }
 0x2cb   :  { %v1318_v8 = vpop.f32.mrf.mxu1 }
 0x2da   :  { %396 = vrot.lane.b32.xlu1 %v1612_v48, %s1482_s5 }
 0x2de   :  { %447 = vrot.lane.b32.xlu1 %v1608_v43, %s1483_s7 }
 0x34e   :  { %v323_v9 = vpop.xlane.xlu0 %322 }
 0x34f   :  { %v327_v10 = vsub.f32 %v319_v60, %v323_v9 }
 0x351   :  { %v329_v11 = vmul.f32 1.442695, %v327_v10 }
 0x352   :  { %v326_v12 = vpop.xlane.xlu1 %325 }
 0x353   :  { %1448 = vpow2.f32 %v329_v11  ;;  %v328_v13 = vsub.f32 %v320_v3, %v326_v12 }
 0x355   :  { %v331_v14 = vmul.f32 1.442695, %v328_v13 }
 0x356   :  { %v397_v16 = vpop.permute.xlu1 %396 }
 0x357   :  { %1450 = vpow2.f32 %v331_v14  ;;  %v402_v17 = vsel %vm351_vm3, %v397_v16, 0 }
 0x358   :  { %1326 = vmatpush3.bf16.msra.mxu1 %v402_v17 }
 0x359   :  { %1337 = vmatprep.subr.bf16.mxu1 %v1480_v15 }
 0x35a   :  { %v448_v22 = vpop.permute.xlu1 %447 }
 0x35b   :  { %v453_v31 = vsel %vm226_vm2, %v448_v22, 0 }
 0x360   :  { %v1449_v18 = vpop.eup %1448 }
 0x361   :  { %v333_v19 = vsel %vm226_vm2, %v1449_v18, 0.0 }
 0x362   :  { %334 = vadd.xlane.f32.xlu0 %v333_v19 }
 0x364   :  { %v1451_v20 = vpop.eup %1450 }
 0x365   :  { %v336_v21 = vsel %vm226_vm2, %v1451_v20, 0.0 }
 0x366   :  { %337 = vadd.xlane.f32.xlu1 %v336_v21 }
 0x377   :  { %498 = vrot.lane.b32.xlu1 %v1612_v48, %s1483_s7 }
 0x378   :  { %346 = vrot.lane.b32.xlu0 %v1608_v43, %s1482_s5 }
 0x37b   :  { %496 = vrot.lane.b32.xlu1 %v1627_v58, %s1483_s7 }
 0x37c   :  { %445 = vrot.lane.b32.xlu0 %v1621_v54, %s1483_s7 }
 0x3eb   :  { %v335_v23 = vpop.xlane.xlu0 %334 }
 0x3ec   :  { %1452 = vrcp.f32 %v335_v23 }
 0x3ef   :  { %v338_v24 = vpop.xlane.xlu1 %337  ;;  %v347_v25 = vpop.permute.xlu0 %346 }
 0x3f0   :  { %1454 = vrcp.f32 %v338_v24  ;;  %v353_v26 = vsel %vm351_vm3, %v347_v25, 0 }
 0x3f1   :  { %1320 = vmatpush3.bf16.msra.mxu0 %v353_v26 }
 0x3f2   :  { %1331 = vmatprep.subr.bf16.mxu0 %v1480_v15 }
 0x3f3   :  { %v499_v33 = vpop.permute.xlu1 %498  ;;  %v446_v36 = vpop.permute.xlu0 %445 }
 0x3f4   :  { %v504_v35 = vsel %vm226_vm2, %v499_v33, 0 }
 0x3f7   :  { %v497_v37 = vpop.permute.xlu1 %496 }
 0x3f9   :  { %v1453_v27 = vpop.eup %1452 }
 0x3fa   :  { %v341_v28 = vmul.f32 %v1453_v27, %v1449_v18 }
 0x3fc   :  { %v343_v29 = vpack.c.bf16 %v341_v28, %v341_v28 }
 0x3fd   :  { %v1455_v30 = vpop.eup %1454 }
 0x3fe   :  { %1322 = vmatmul.mubr.msk.bf16.vlgmr.msra.gmra.mxu0 %vm226_vm2, %v343_v29  ;;  %v342_v32 = vmul.f32 %v1455_v30, %v1451_v20 }
 0x3ff   :  { %1332 = vmatpush3.bf16.xpose.msra.mxu0 %v453_v31  ;;  %1333 = vmatprep.mubr.msk.bf16.mxu0 %vm1481_vm1, %v1480_v15 }
 0x400   :  { %v344_v34 = vpack.c.bf16 %v342_v32, %v342_v32  ;;  %1343 = vmatprep.subr.bf16.mxu0 %v1480_v15 }
 0x402   :  { %1328 = vmatmul.mubr.msk.bf16.vlgmr.msra.gmra.mxu1 %vm226_vm2, %v344_v34 }
 0x403   :  { %1338 = vmatpush3.bf16.xpose.msra.mxu1 %v504_v35  ;;  %1339 = vmatprep.mubr.msk.bf16.mxu1 %vm1481_vm1, %v1480_v15 }
 0x404   :  { %1349 = vmatprep.subr.bf16.mxu1 %v1480_v15 }
 0x406   :  { %1334 = vmatmul.mubr.msk.bf16.vlgmr.msra.gmra.mxu0 %vm226_vm2, %v446_v36 }
 0x407   :  { %1345 = vmatprep.mubr.msk.bf16.mxu0 %vm1481_vm1, %v1480_v15 }
 0x40a   :  { %1340 = vmatmul.mubr.msk.bf16.vlgmr.msra.gmra.mxu1 %vm226_vm2, %v497_v37 }
 0x40b   :  { %1351 = vmatprep.mubr.msk.bf16.mxu1 %vm1481_vm1, %v1480_v15 }
 0x4be   :  { %v1663_v38 = vpop.f32.mrf.mxu0 }
 0x4c0   :  { %v1323_v39 = vpop.f32.mrf.mxu0 }
 0x4c2   :  { %v392_v40 = vpop.f32.mrf.mxu0  ;;  %v1665_v41 = vpop.f32.mrf.mxu1 }
 0x4c4   :  { %v1324_v42 = vpop.f32.mrf.mxu0  ;;  %v1329_v44 = vpop.f32.mrf.mxu1 }
 0x4c6   :  { %v441_v45 = vpop.f32.mrf.mxu1  ;;  %v489_v46 = vpop.f32.mrf.mxu0 }
 0x4c7   :  { %v546_v47 = vmul.f32 0.35355338, %v489_v46 }
 0x4c8   :  { %v1330_v49 = vpop.f32.mrf.mxu1  ;;  %v1335_v50 = vpop.f32.mrf.mxu0 }
 0x4c9   :  { %v548_v51 = vsel %vm226_vm2, %v546_v47, -inf }
 0x4ca   :  { %v540_v52 = vpop.f32.mrf.mxu1  ;;  %549 = vmax.xlane.f32.xlu0 %v548_v51  ;;  %v492_v53 = vpop.f32.mrf.mxu0 }
 0x4cb   :  { %v547_v55 = vmul.f32 0.35355338, %v540_v52 }
 0x4cc   :  { %v1336_v56 = vpop.f32.mrf.mxu0  ;;  %v1341_v57 = vpop.f32.mrf.mxu1 }
 0x4cd   :  { %v551_v59 = vsel %vm226_vm2, %v547_v55, -inf }
 0x4ce   :  { %552 = vmax.xlane.f32.xlu1 %v551_v59  ;;  %v543_v60 = vpop.f32.mrf.mxu1 }
 0x4d0   :  { %v1342_v61 = vpop.f32.mrf.mxu1 }
 0x4df   :  { %620 = vrot.lane.b32.xlu1 %v1612_v48, %s1484_s11 }
 0x4e3   :  { %670 = vrot.lane.b32.xlu1 %v1608_v43, %s1485_s12 }
 0x4e7   :  { %720 = vrot.lane.b32.xlu1 %v1612_v48, %s1485_s12 }
 0x4eb   :  { %718 = vrot.lane.b32.xlu1 %v1627_v58, %s1485_s12 }
 0x553   :  { %v550_v62 = vpop.xlane.xlu0 %549 }
 0x554   :  { %v554_v63 = vsub.f32 %v546_v47, %v550_v62 }
 0x556   :  { %v556_v2 = vmul.f32 1.442695, %v554_v63 }
 0x557   :  { %v553_v3 = vpop.xlane.xlu1 %552 }
 0x558   :  { %1456 = vpow2.f32 %v556_v2  ;;  %v555_v4 = vsub.f32 %v547_v55, %v553_v3 }
 0x55a   :  { %v558_v5 = vmul.f32 1.442695, %v555_v4 }
 0x55b   :  { %v621_v6 = vpop.permute.xlu1 %620 }
 0x55c   :  { %1458 = vpow2.f32 %v558_v5  ;;  %v626_v7 = vsel %vm351_vm3, %v621_v6, 0 }
 0x55d   :  { %1350 = vmatpush3.bf16.msra.mxu1 %v626_v7 }
 0x55e   :  { %1361 = vmatprep.subr.bf16.mxu1 %v1480_v15 }
 0x55f   :  { %v671_v18 = vpop.permute.xlu1 %670 }
 0x560   :  { %v676_v22 = vsel %vm226_vm2, %v671_v18, 0 }
 0x563   :  { %v721_v24 = vpop.permute.xlu1 %720 }
 0x564   :  { %v726_v26 = vsel %vm226_vm2, %v721_v24, 0 }
 0x565   :  { %v1457_v8 = vpop.eup %1456 }
 0x566   :  { %v560_v9 = vsel %vm226_vm2, %v1457_v8, 0.0 }
 0x567   :  { %561 = vadd.xlane.f32.xlu0 %v560_v9  ;;  %v719_v28 = vpop.permute.xlu1 %718 }
 0x569   :  { %v1459_v10 = vpop.eup %1458 }
 0x56a   :  { %v563_v11 = vsel %vm226_vm2, %v1459_v10, 0.0 }
 0x56b   :  { %564 = vadd.xlane.f32.xlu0 %v563_v11 }
 0x581   :  { %572 = vrot.lane.b32.xlu0 %v1608_v43, %s1484_s11 }
 0x585   :  { %668 = vrot.lane.b32.xlu0 %v1621_v54, %s1485_s12 }
 0x5f0   :  { %v562_v12 = vpop.xlane.xlu0 %561 }
 0x5f1   :  { %1460 = vrcp.f32 %v562_v12 }
 0x5f4   :  { %v565_v13 = vpop.xlane.xlu0 %564 }
 0x5f5   :  { %1462 = vrcp.f32 %v565_v13 }
 0x5f8   :  { %v573_v14 = vpop.permute.xlu0 %572 }
 0x5f9   :  { %v578_v16 = vsel %vm351_vm3, %v573_v14, 0 }
 0x5fa   :  { %1344 = vmatpush3.bf16.msra.mxu0 %v578_v16 }
 0x5fb   :  { %1355 = vmatprep.subr.bf16.mxu0 %v1480_v15 }
 0x5fc   :  { %v669_v27 = vpop.permute.xlu0 %668 }
 0x5fe   :  { %v1461_v17 = vpop.eup %1460 }
 0x5ff   :  { %v568_v19 = vmul.f32 %v1461_v17, %v1457_v8 }
 0x601   :  { %v570_v20 = vpack.c.bf16 %v568_v19, %v568_v19 }
 0x602   :  { %v1463_v21 = vpop.eup %1462 }
 0x603   :  { %1346 = vmatmul.mubr.msk.bf16.vlgmr.msra.gmra.mxu0 %vm226_vm2, %v570_v20  ;;  %v569_v23 = vmul.f32 %v1463_v21, %v1459_v10 }
 0x604   :  { %1356 = vmatpush3.bf16.xpose.msra.mxu0 %v676_v22  ;;  %1357 = vmatprep.mubr.msk.bf16.mxu0 %vm1481_vm1, %v1480_v15 }
 0x605   :  { %v571_v25 = vpack.c.bf16 %v569_v23, %v569_v23  ;;  %1367 = vmatprep.subr.bf16.mxu0 %v1480_v15 }
 0x607   :  { %1352 = vmatmul.mubr.msk.bf16.vlgmr.msra.gmra.mxu1 %vm226_vm2, %v571_v25 }
 0x608   :  { %1362 = vmatpush3.bf16.xpose.msra.mxu1 %v726_v26  ;;  %1363 = vmatprep.mubr.msk.bf16.mxu1 %vm1481_vm1, %v1480_v15 }
 0x609   :  { %1373 = vmatprep.subr.bf16.mxu1 %v1480_v15 }
 0x60b   :  { %1358 = vmatmul.mubr.msk.bf16.vlgmr.msra.gmra.mxu0 %vm226_vm2, %v669_v27 }
 0x60c   :  { %1369 = vmatprep.mubr.msk.bf16.mxu0 %vm1481_vm1, %v1480_v15 }
 0x60f   :  { %1364 = vmatmul.mubr.msk.bf16.vlgmr.msra.gmra.mxu1 %vm226_vm2, %v719_v28 }
 0x610   :  { %1375 = vmatprep.mubr.msk.bf16.mxu1 %vm1481_vm1, %v1480_v15 }
 0x6c3   :  { %v1697_v29 = vpop.f32.mrf.mxu0 }
 0x6c5   :  { %v1347_v30 = vpop.f32.mrf.mxu0 }
 0x6c7   :  { %v617_v31 = vpop.f32.mrf.mxu0  ;;  %v1699_v32 = vpop.f32.mrf.mxu1 }
 0x6c8   :  { %v1423_v33 = vpack.i.bf16 %v1699_v32, %v1697_v29 }
 0x6c9   :  { %v1348_v34 = vpop.f32.mrf.mxu0  ;;  %v1353_v35 = vpop.f32.mrf.mxu1 }
 0x6cb   :  { %v665_v36 = vpop.f32.mrf.mxu1  ;;  %v712_v37 = vpop.f32.mrf.mxu0 }
 0x6cc   :  { %v768_v39 = vmul.f32 0.35355338, %v712_v37 }
 0x6cd   :  { %v1354_v40 = vpop.f32.mrf.mxu1  ;;  %v1359_v42 = vpop.f32.mrf.mxu0 }
 0x6ce   :  { %v770_v44 = vsel %vm226_vm2, %v768_v39, -inf }
 0x6cf   :  { %v762_v45 = vpop.f32.mrf.mxu1  ;;  %771 = vmax.xlane.f32.xlu0 %v770_v44  ;;  %v715_v46 = vpop.f32.mrf.mxu0 }
 0x6d0   :  { %v769_v47 = vmul.f32 0.35355338, %v762_v45 }
 0x6d1   :  { %v1360_v49 = vpop.f32.mrf.mxu0  ;;  %v1365_v50 = vpop.f32.mrf.mxu1 }
 0x6d2   :  { %v773_v51 = vsel %vm226_vm2, %v769_v47, -inf }
 0x6d3   :  { %774 = vmax.xlane.f32.xlu1 %v773_v51  ;;  %v765_v52 = vpop.f32.mrf.mxu1 }
 0x6d5   :  { %v1366_v53 = vpop.f32.mrf.mxu1 }
 0x6e4   :  { %842 = vrot.lane.b32.xlu1 %v1612_v48, %s1486_s13 }
 0x6e8   :  { %892 = vrot.lane.b32.xlu1 %v1608_v43, %s1487_s14 }
 0x6ec   :  { %942 = vrot.lane.b32.xlu1 %v1612_v48, %s1487_s14 }
 0x6f0   :  { %940 = vrot.lane.b32.xlu1 %v1627_v58, %s1487_s14 }
 0x758   :  { %v772_v55 = vpop.xlane.xlu0 %771 }
 0x759   :  { %v776_v56 = vsub.f32 %v768_v39, %v772_v55 }
 0x75b   :  { %v778_v57 = vmul.f32 1.442695, %v776_v56 }
 0x75c   :  { %v775_v59 = vpop.xlane.xlu1 %774 }
 0x75d   :  { %1464 = vpow2.f32 %v778_v57  ;;  %v777_v60 = vsub.f32 %v769_v47, %v775_v59 }
 0x75f   :  { %v780_v61 = vmul.f32 1.442695, %v777_v60 }
 0x760   :  { %v843_v62 = vpop.permute.xlu1 %842 }
 0x761   :  { %1466 = vpow2.f32 %v780_v61  ;;  %v848_v63 = vsel %vm351_vm3, %v843_v62, 0 }
 0x762   :  { %1374 = vmatpush3.bf16.msra.mxu1 %v848_v63 }
 0x763   :  { %1385 = vmatprep.subr.bf16.mxu1 %v1480_v15 }
 0x764   :  { %v893_v10 = vpop.permute.xlu1 %892 }
 0x765   :  { %v898_v14 = vsel %vm226_vm2, %v893_v10, 0 }
 0x768   :  { %v943_v16 = vpop.permute.xlu1 %942 }
 0x769   :  { %v948_v18 = vsel %vm226_vm2, %v943_v16, 0 }
 0x76a   :  { %v1465_v2 = vpop.eup %1464 }
 0x76b   :  { %v782_v3 = vsel %vm226_vm2, %v1465_v2, 0.0 }
 0x76c   :  { %783 = vadd.xlane.f32.xlu0 %v782_v3  ;;  %v941_v20 = vpop.permute.xlu1 %940 }
 0x76e   :  { %v1467_v4 = vpop.eup %1466 }
 0x76f   :  { %v785_v58 = vsel %vm226_vm2, %v1467_v4, 0.0 }
 0x770   :  { %786 = vadd.xlane.f32.xlu0 %v785_v58 }
 0x786   :  { %794 = vrot.lane.b32.xlu0 %v1608_v43, %s1486_s13 }
 0x78a   :  { %890 = vrot.lane.b32.xlu0 %v1621_v54, %s1487_s14 }
 0x7f5   :  { %v784_v5 = vpop.xlane.xlu0 %783 }
 0x7f6   :  { %1468 = vrcp.f32 %v784_v5  ;;  %v1442_v5 = vld [vmem:[%s1782_s8 + $0x8] sm:$0xff]  }
 0x7f9   :  { %v787_v6 = vpop.xlane.xlu0 %786 }
 0x7fa   :  { %1470 = vrcp.f32 %v787_v6  ;;  %v1443_v6 = vld [vmem:[%s1782_s8] sm:$0xff]  }
 0x7fd   :  { %v795_v7 = vpop.permute.xlu0 %794 }
 0x7fe   :  { %v800_v8 = vsel %vm351_vm3, %v795_v7, 0 }
 0x7ff   :  { %1368 = vmatpush3.bf16.msra.mxu0 %v800_v8 }
 0x800   :  { %1379 = vmatprep.subr.bf16.mxu0 %v1480_v15 }
 0x801   :  { %v891_v19 = vpop.permute.xlu0 %890 }
 0x803   :  { %v1469_v9 = vpop.eup %1468 }
 0x804   :  { %v790_v11 = vmul.f32 %v1469_v9, %v1465_v2 }
 0x806   :  { %v792_v12 = vpack.c.bf16 %v790_v11, %v790_v11 }
 0x807   :  { %v1471_v13 = vpop.eup %1470 }
 0x808   :  { %1370 = vmatmul.mubr.msk.bf16.vlgmr.msra.gmra.mxu0 %vm226_vm2, %v792_v12  ;;  %v791_v54 = vmul.f32 %v1471_v13, %v1467_v4 }
 0x809   :  { %1380 = vmatpush3.bf16.xpose.msra.mxu0 %v898_v14  ;;  %1381 = vmatprep.mubr.msk.bf16.mxu0 %vm1481_vm1, %v1480_v15 }
 0x80a   :  { %v793_v17 = vpack.c.bf16 %v791_v54, %v791_v54  ;;  %1391 = vmatprep.subr.bf16.mxu0 %v1480_v15 }
 0x80c   :  { %1376 = vmatmul.mubr.msk.bf16.vlgmr.msra.gmra.mxu1 %vm226_vm2, %v793_v17 }
 0x80d   :  { %1386 = vmatpush3.bf16.xpose.msra.mxu1 %v948_v18  ;;  %1387 = vmatprep.mubr.msk.bf16.mxu1 %vm1481_vm1, %v1480_v15 }
 0x80e   :  { %1397 = vmatprep.subr.bf16.mxu1 %v1480_v15 }
 0x810   :  { %1382 = vmatmul.mubr.msk.bf16.vlgmr.msra.gmra.mxu0 %vm226_vm2, %v891_v19 }
 0x811   :  { %1393 = vmatprep.mubr.msk.bf16.mxu0 %vm1481_vm1, %v1480_v15 }
 0x814   :  { %1388 = vmatmul.mubr.msk.bf16.vlgmr.msra.gmra.mxu1 %vm226_vm2, %v941_v20 }
 0x815   :  { %1399 = vmatprep.mubr.msk.bf16.mxu1 %vm1481_vm1, %v1480_v15 }
 0x8c8   :  { %v836_v21 = vpop.f32.mrf.mxu0 }
 0x8ca   :  { %v1371_v22 = vpop.f32.mrf.mxu0 }
 0x8cc   :  { %v839_v23 = vpop.f32.mrf.mxu0  ;;  %v884_v24 = vpop.f32.mrf.mxu1 }
 0x8cd   :  { %v1428_v47 = vpack.i.bf16 %v884_v24, %v836_v21 }
 0x8ce   :  { %v1372_v25 = vpop.f32.mrf.mxu0  ;;  %v1377_v26 = vpop.f32.mrf.mxu1 }
 0x8d0   :  { %v887_v27 = vpop.f32.mrf.mxu1  ;;  %v934_v28 = vpop.f32.mrf.mxu0 }
 0x8d1   :  { %v990_v30 = vmul.f32 0.35355338, %v934_v28 }
 0x8d2   :  { %v1378_v31 = vpop.f32.mrf.mxu1  ;;  %v1383_v34 = vpop.f32.mrf.mxu0 }
 0x8d3   :  { %v992_v35 = vsel %vm226_vm2, %v990_v30, -inf  ;;  %v1246_v34 = vld [vmem:[%s1783_s9] ss:$0 sm:$0xff] }
 0x8d4   :  { %v984_v36 = vpop.f32.mrf.mxu1  ;;  %993 = vmax.xlane.f32.xlu0 %v992_v35  ;;  %v937_v37 = vpop.f32.mrf.mxu0 }
 0x8d5   :  { %v991_v39 = vmul.f32 0.35355338, %v984_v36 }
 0x8d6   :  { %v1384_v40 = vpop.f32.mrf.mxu0  ;;  %v1389_v42 = vpop.f32.mrf.mxu1 }
 0x8d7   :  { %v995_v44 = vsel %vm226_vm2, %v991_v39, -inf }
 0x8d8   :  { %996 = vmax.xlane.f32.xlu1 %v995_v44  ;;  %v987_v45 = vpop.f32.mrf.mxu1 }
 0x8da   :  { %v1390_v46 = vpop.f32.mrf.mxu1 }
 0x8e9   :  { %1064 = vrot.lane.b32.xlu1 %v1612_v48, %s1488_s15 }
 0x8ed   :  { %1424 = vrot.lane.b32.xlu1 %v1423_v33, %s1489_s16 }
 0x8f1   :  { %1429 = vrot.lane.b32.xlu1 %v1428_v47, %s1490_s0 }
 0x95d   :  { %v994_v49 = vpop.xlane.xlu0 %993 }
 0x95e   :  { %v998_v50 = vsub.f32 %v990_v30, %v994_v49 }
 0x960   :  { %v1000_v51 = vmul.f32 1.442695, %v998_v50 }
 0x961   :  { %v997_v52 = vpop.xlane.xlu1 %996 }
 0x962   :  { %1472 = vpow2.f32 %v1000_v51  ;;  %v999_v53 = vsub.f32 %v991_v39, %v997_v52 }
 0x964   :  { %v1002_v55 = vmul.f32 1.442695, %v999_v53 }
 0x965   :  { %v1065_v56 = vpop.permute.xlu1 %1064 }
 0x966   :  { %1474 = vpow2.f32 %v1002_v55  ;;  %v1070_v57 = vsel %vm351_vm3, %v1065_v56, 0 }
 0x967   :  { %1398 = vmatpush3.bf16.msra.mxu1 %v1070_v57 }
 0x969   :  { %v1425_v16 = vpop.permute.xlu1 %1424 }
 0x96a   :  { %v1427_v18 = vunpack.i.h.bf16 %v1425_v16 }
 0x96c   :  { %v1137_v22 = vsel %vm226_vm2, %v1665_v41, %v1427_v18 }
 0x96d   :  { %v1430_v17 = vpop.permute.xlu1 %1429 }
 0x96e   :  { %v1432_v19 = vunpack.i.h.bf16 %v1430_v17  ;;  %v1431_v20 = vunpack.i.l.bf16 %v1430_v17 }
 0x96f   :  { %v1473_v48 = vpop.eup %1472 }
 0x970   :  { %v1004_v59 = vsel %vm226_vm2, %v1473_v48, 0.0  ;;  %v1140_v26 = vsel %vm1138_vm4, %v1137_v22, %v1432_v19 }
 0x971   :  { %1005 = vadd.xlane.f32.xlu0 %v1004_v59 }
 0x973   :  { %v1475_v29 = vpop.eup %1474 }
 0x974   :  { %v1007_v32 = vsel %vm226_vm2, %v1475_v29, 0.0 }
 0x975   :  { %1008 = vadd.xlane.f32.xlu0 %v1007_v32 }
 0x98b   :  { %1016 = vrot.lane.b32.xlu0 %v1608_v43, %s1488_s15 }
 0x9fa   :  { %v1006_v33 = vpop.xlane.xlu0 %1005 }
 0x9fb   :  { %1476 = vrcp.f32 %v1006_v33 }
 0x9fe   :  { %v1009_v60 = vpop.xlane.xlu0 %1008 }
 0x9ff   :  { %1478 = vrcp.f32 %v1009_v60 }
 0xa02   :  { %v1017_v61 = vpop.permute.xlu0 %1016 }
 0xa03   :  { %v1022_v62 = vsel %vm351_vm3, %v1017_v61, 0 }
 0xa04   :  { %1392 = vmatpush3.bf16.msra.mxu0 %v1022_v62 }
 0xa05   :  { %1403 = vmatprep.subr.bf16.mxu0 %v1480_v15 }
 0xa08   :  { %v1477_v63 = vpop.eup %1476 }
 0xa09   :  { %v1012_v2 = vmul.f32 %v1477_v63, %v1473_v48 }
 0xa0b   :  { %v1014_v3 = vpack.c.bf16 %v1012_v2, %v1012_v2 }
 0xa0c   :  { %v1479_v4 = vpop.eup %1478 }
 0xa0d   :  { %1394 = vmatmul.mubr.msk.bf16.vlgmr.msra.gmra.mxu0 %vm226_vm2, %v1014_v3  ;;  %v1013_v58 = vmul.f32 %v1479_v4, %v1475_v29 }
 0xa0e   :  { %1407 = vmatprep.mubr.msk.bf16.mxu0 %vm1481_vm1, %v1480_v15  ;;  %1404 = vmatpush3.bf16.msra.mxu0 %v1442_v5 }
 0xa0f   :  { %v1015_v43 = vpack.c.bf16 %v1013_v58, %v1013_v58  ;;  %1405 = vmatprep.subr.bf16.mxu0 %v1480_v15  ;;  %v1426_v15 = vunpack.i.l.bf16 %v1425_v16 }
 0xa11   :  { %1400 = vmatmul.mubr.msk.bf16.vlgmr.msra.gmra.mxu1 %vm226_vm2, %v1015_v43  ;;  %v1136_v23 = vsel %vm226_vm2, %v1663_v38, %v1426_v15 }
 0xa12   :  { %1406 = vmatpush3.bf16.msra.mxu0 %v1443_v6  ;;  %v1139_v27 = vsel %vm1138_vm4, %v1136_v23, %v1431_v20 }
 0xacd   :  { %v1058_v7 = vpop.f32.mrf.mxu0 }
 0xacf   :  { %v1395_v8 = vpop.f32.mrf.mxu0 }
 0xad1   :  { %v1061_v9 = vpop.f32.mrf.mxu0  ;;  %v1106_v10 = vpop.f32.mrf.mxu1 }
 0xad2   :  { %v1433_v11 = vpack.i.bf16 %v1106_v10, %v1058_v7 }
 0xad3   :  { %v1396_v12 = vpop.f32.mrf.mxu0  ;;  %v1401_v13 = vpop.f32.mrf.mxu1 }
 0xad4   :  { %1434 = vrot.lane.b32.xlu0 %v1433_v11, %s1491_s21 }
 0xad5   :  { %v1109_v14 = vpop.f32.mrf.mxu1 }
 0xad7   :  { %v1402_v54 = vpop.f32.mrf.mxu1 }
 0xb46   :  { %v1435_v21 = vpop.permute.xlu0 %1434 }
 0xb47   :  { %v1437_v24 = vunpack.i.h.bf16 %v1435_v21  ;;  %v1436_v25 = vunpack.i.l.bf16 %v1435_v21 }
 0xb49   :  { %v1143_v28 = vsel %vm1141_vm5, %v1140_v26, %v1437_v24  ;;  %v1142_v30 = vsel %vm1141_vm5, %v1139_v27, %v1436_v25 }
 0xb4a   :  { %v1144_v31 = vpack.c.bf16 %v1143_v28, %v1142_v30 }
 0xb4c   :  { %1408 = vmatmul.mubr.msk.bf16.vlgmr.msra.gmra.mxu0 %vm42_vm0, %v1144_v31 }
 0xc0c   :  { %v1205_v35 = vpop.f32.mrf.mxu0 }
 0xc0d   :  { %v1206_v36 = vadd.f32 %v1246_v34, %v1205_v35 }
 0xc0e   :  { %v1409_v37 = vpop.f32.mrf.mxu0 }
 0xc0f   :  { %v1212_v41 = vadd.f32 %v1206_v36, %v1550_v0 }
 0xc10   :  { %v1208_v39 = vpop.f32.mrf.mxu0 }
 0xc11   :  { %1214 = vst.msk [vmem:[%s1784_s10] sm:$0xff] %vm42_vm0, %v1212_v41  ;;  %v1209_v38 = vadd.f32 %v1246_v34, %v1208_v39 }
 0xc12   :  { %v1410_v40 = vpop.f32.mrf.mxu0 }
 0xc13   :  { %v1213_v42 = vadd.f32 %v1209_v38, %v1555_v1 }
 0xc15   :  { %1215 = vst.msk [vmem:[%s1784_s10 + $0x8] sm:$0xff] %vm42_vm0, %v1213_v42 }

// kernel: tevc_forward.33
= control target key start
LH: loop header
LB: loop body
LE: loop exit
PB: predicated region body
PF: predicated region fallthrough
CT: control target
= control target key end

     0   :  { %vm47_vm0 = vcmask 261120   ;;  %v1508_v15 = vmov 0.0   ;;  %vm1509_vm1 = vmmov 0   ;;  %vm231_vm2 = vcmask 64512   ;;  %s1512_s18 = smov 120   ;;  %s1513_s19 = smov 88   ;;  %s1836_s0 = inlined_call_operand.vmem [shape: f32[2,8,32], index: 0, kind: input, shape index: {}]   ;;  %s1837_s6 = inlined_call_operand.vmem [shape: bf16[32,64], index: 6, kind: input, shape index: {}]   ;;  %s1838_s1 = inlined_call_operand.vmem [shape: f32[2,8,32], index: 1, kind: input, shape index: {}]   ;;  %s1839_s4 = inlined_call_operand.vmem [shape: bf16[32,32], index: 4, kind: input, shape index: {}]   ;;  %s1840_s2 = inlined_call_operand.vmem [shape: f32[1,32], index: 2, kind: input, shape index: {}]   ;;  %s1841_s3 = inlined_call_operand.vmem [shape: f32[1,32], index: 3, kind: input, shape index: {}]   ;;  %s1842_s7 = inlined_call_operand.vmem [shape: f32[1,64], index: 7, kind: input, shape index: {}]   ;;  %s1843_s5 = inlined_call_operand.vmem [shape: f32[1,32], index: 5, kind: input, shape index: {}]   ;;  %s1844_s10 = inlined_call_operand.vmem [shape: f32[2,1,8], index: 10, kind: input, shape index: {}]   ;;  %s1845_s8 = inlined_call_operand.vmem [shape: bf16[32,32], index: 8, kind: input, shape index: {}]   ;;  %s1846_s9 = inlined_call_operand.vmem [shape: f32[1,32], index: 9, kind: input, shape index: {}]   ;;  %s1847_s11 = inlined_call_operand.vmem [shape: f32[2,8,32], index: 11, kind: output, shape index: {}]  }
   0x1   :  { %v1584_v0 = vld [vmem:[%s1836_s0] sm:$0xff]  ;;  %v1589_v1 = vld [vmem:[%s1836_s0 + $0x8] sm:$0xff]  ;;  %1326 = vmatprep.subr.bf16.mxu1 %v1508_v15  ;;  %1318 = vmatprep.subr.bf16.mxu0 %v1508_v15  ;;  %v330_v59 = vlaneseq  ;;  %vm372_vm7 = vcmask 1043456   ;;  %s1514_s20 = smov 112   ;;  %s1515_s0 = smov 80   ;;  %vm1165_vm8 = vcmask 130048  }
   0x2   :  { %v48_v2 = vsel %vm47_vm0, %v1584_v0, 0.0  ;;  %v51_v3 = vsel %vm47_vm0, %v1589_v1, 0.0  ;;  %v1466_v14 = vld [vmem:[%s1837_s6 + $0x8] sm:$0xff]   ;;  %v1467_v16 = vld [vmem:[%s1837_s6] sm:$0xff]   ;;  %1330 = vmatprep.mubr.msk.bf16.mxu1 %vm1509_vm1, %v1508_v15  ;;  %1322 = vmatprep.mubr.msk.bf16.mxu0 %vm1509_vm1, %v1508_v15  ;;  %s1516_s21 = smov 104   ;;  %s1517_s22 = smov 72  }
   0x3   :  { %49 = vadd.xlane.f32.xlu0 %v48_v2  ;;  %1327 = vmatpush3.bf16.msra.mxu1 %v1466_v14  ;;  %v43_v17 = vld [vmem:[%s1838_s1] sm:$0xff]  ;;  %v44_v18 = vld [vmem:[%s1838_s1 + $0x8] sm:$0xff]  ;;  %v331_v61 = vshrl.u32 %v330_v59, 7  ;;  %v1510_v2 = vmov 0   ;;  %s1518_s23 = smov 8   ;;  %s1519_s24 = smov 16  }
   0x4   :  { %1328 = vmatprep.subr.bf16.mxu1 %v1508_v15  ;;  %v1468_v19 = vld [vmem:[%s1839_s4 + $0x8] sm:$0xff]   ;;  %v159_v20 = vpack.c.bf16 %v44_v18, %v43_v17  ;;  %v1469_v21 = vld [vmem:[%s1839_s4] sm:$0xff]   ;;  %s1520_s29 = smov 24   ;;  %vm1168_vm9 = vcmask 195584  }
   0x5   :  { %1319 = vmatpush3.bf16.msra.mxu0 %v1468_v19  ;;  %v1247_v30 = vld [vmem:[%s1840_s2] ss:$0 sm:$0xff]  ;;  %v40_v62 = vld [vmem:[%s1844_s10 + $0x1] sm:$0x1]  ;;  %v332_v63 = vsub.s32 0, %v331_v61 }
   0x6   :  { %1320 = vmatprep.subr.bf16.mxu0 %v1508_v15  ;;  %v1248_v34 = vld [vmem:[%s1841_s3] ss:$0 sm:$0xff]  ;;  %vm327_vm4 = vcmp.eq.f32.partialorder %v40_v62, 0.0 }
   0x7   :  { %52 = vadd.xlane.f32.xlu0 %v51_v3  ;;  %1329 = vmatpush3.bf16.msra.mxu1 %v1467_v16  ;;  %v1253_v39 = vld [vmem:[%s1842_s7] ss:$0 sm:$0xff] }
   0x8   :  { %1340 = vmatprep.subr.bf16.mxu1 %v1508_v15  ;;  %v1249_v50 = vld [vmem:[%s1843_s5] ss:$0 sm:$0xff] }
   0x9   :  { %1321 = vmatpush3.bf16.msra.mxu0 %v1469_v21  ;;  %v39_v60 = vld [vmem:[%s1844_s10] sm:$0x1]  ;;  %s1511_s10 = smov 96  }
   0xa   :  { %1331 = vmatmul.mubr.msk.bf16.vlgmr.msra.gmra.mxu1 %vm47_vm0, %v159_v20  ;;  %1334 = vmatprep.subr.bf16.mxu0 %v1508_v15  ;;  %vm326_vm3 = vcmp.eq.f32.partialorder %v39_v60, 0.0 }
   0xb   :  { %1342 = vmatprep.mubr.msk.bf16.mxu1 %vm1509_vm1, %v1508_v15  ;;  %v328_v3 = vsel %vm326_vm3, 1, %v1510_v2 }
  0x8c   :  { %v50_v4 = vpop.xlane.xlu0 %49 }
  0x8d   :  { %v55_v5 = vmul.f32 0.03125, %v50_v4  ;;  %v1673_v4 = vrot.slane %v328_v3, %v332_v63 }
  0x8f   :  { %v57_v6 = vsub.f32 %v1584_v0, %v55_v5  ;;  %v329_v5 = vsel %vm327_vm4, 1, %v1510_v2  ;;  %vm338_vm5 = vcmp.eq.s32.totalorder %v1673_v4, 1 }
  0x90   :  { %v53_v7 = vpop.xlane.xlu0 %52 }
  0x91   :  { %v56_v8 = vmul.f32 0.03125, %v53_v7  ;;  %v59_v9 = vmul.f32 %v57_v6, %v57_v6  ;;  %v1676_v7 = vrot.slane %v329_v5, %v332_v63 }
  0x93   :  { %v58_v10 = vsub.f32 %v1589_v1, %v56_v8  ;;  %v61_v11 = vsel %vm47_vm0, %v59_v9, 0.0  ;;  %vm339_vm6 = vcmp.eq.s32.totalorder %v1676_v7, 1 }
  0x94   :  { %62 = vadd.xlane.f32.xlu1 %v61_v11 }
  0x95   :  { %v60_v12 = vmul.f32 %v58_v10, %v58_v10 }
  0x97   :  { %v64_v13 = vsel %vm47_vm0, %v60_v12, 0.0 }
  0x98   :  { %65 = vadd.xlane.f32.xlu1 %v64_v13 }
  0xca   :  { %v220_v40 = vpop.f32.mrf.mxu1 }
  0xcb   :  { %v221_v41 = vadd.f32 %v1253_v39, %v220_v40 }
  0xcc   :  { %v1332_v42 = vpop.f32.mrf.mxu1 }
  0xcd   :  { %v1642_v43 = vpack.c.bf16 %v221_v41, %v221_v41 }
  0xce   :  { %v223_v44 = vpop.f32.mrf.mxu1 }
  0xcf   :  { %v224_v45 = vadd.f32 %v1253_v39, %v223_v44  ;;  %v236_v46 = vsel %vm231_vm2, %v1642_v43, 0 }
  0xd0   :  { %v1333_v47 = vpop.f32.mrf.mxu1 }
  0xd1   :  { %v1646_v48 = vpack.c.bf16 %v224_v45, %v224_v45 }
  0xd3   :  { %v282_v49 = vsel %vm231_vm2, %v1646_v48, 0 }
  0xd4   :  { %1341 = vmatpush3.bf16.xpose.msra.mxu1 %v282_v49 }
  0xd5   :  { %1352 = vmatprep.subr.bf16.mxu1 %v1508_v15 }
 0x11d   :  { %v63_v22 = vpop.xlane.xlu1 %62 }
 0x11e   :  { %v67_v23 = vmul.f32 0.03125, %v63_v22 }
 0x120   :  { %v69_v24 = vadd.f32 1e-05, %v67_v23 }
 0x121   :  { %v66_v25 = vpop.xlane.xlu1 %65 }
 0x122   :  { %1472 = vrsqrt.f32 %v69_v24  ;;  %v68_v26 = vmul.f32 0.03125, %v66_v25 }
 0x124   :  { %v70_v27 = vadd.f32 1e-05, %v68_v26 }
 0x126   :  { %1474 = vrsqrt.f32 %v70_v27 }
 0x12f   :  { %v1473_v28 = vpop.eup %1472 }
 0x130   :  { %v73_v29 = vmul.f32 %v1473_v28, %v57_v6 }
 0x132   :  { %v81_v33 = vmul.f32 %v1247_v30, %v73_v29 }
 0x133   :  { %v1475_v31 = vpop.eup %1474 }
 0x134   :  { %v74_v32 = vmul.f32 %v1475_v31, %v58_v10  ;;  %v89_v36 = vadd.f32 %v1248_v34, %v81_v33 }
 0x136   :  { %v82_v35 = vmul.f32 %v1247_v30, %v74_v32 }
 0x138   :  { %v90_v37 = vadd.f32 %v1248_v34, %v82_v35 }
 0x13a   :  { %v91_v38 = vpack.c.bf16 %v90_v37, %v89_v36 }
 0x13c   :  { %1323 = vmatmul.mubr.msk.bf16.vlgmr.msra.gmra.mxu0 %vm47_vm0, %v91_v38 }
 0x13d   :  { %1336 = vmatprep.mubr.msk.bf16.mxu0 %vm1509_vm1, %v1508_v15  ;;  %1335 = vmatpush3.bf16.xpose.msra.mxu0 %v236_v46 }
 0x13e   :  { %1346 = vmatprep.subr.bf16.mxu0 %v1508_v15 }
 0x1fc   :  { %v152_v51 = vpop.f32.mrf.mxu0 }
 0x1fd   :  { %v153_v52 = vadd.f32 %v1249_v50, %v152_v51 }
 0x1fe   :  { %v1324_v53 = vpop.f32.mrf.mxu0 }
 0x1ff   :  { %v1655_v54 = vpack.c.bf16 %v153_v52, %v153_v52 }
 0x200   :  { %v155_v55 = vpop.f32.mrf.mxu0 }
 0x201   :  { %v156_v56 = vadd.f32 %v1249_v50, %v155_v55  ;;  %1337 = vmatmul.mubr.msk.bf16.vlgmr.msra.gmra.mxu0 %vm231_vm2, %v1655_v54 }
 0x202   :  { %v1325_v57 = vpop.f32.mrf.mxu0  ;;  %1348 = vmatprep.mubr.msk.bf16.mxu0 %vm1509_vm1, %v1508_v15 }
 0x203   :  { %v1661_v58 = vpack.c.bf16 %v156_v56, %v156_v56 }
 0x205   :  { %1343 = vmatmul.mubr.msk.bf16.vlgmr.msra.gmra.mxu1 %vm231_vm2, %v1661_v58 }
 0x206   :  { %1354 = vmatprep.mubr.msk.bf16.mxu1 %vm1509_vm1, %v1508_v15 }
 0x2c1   :  { %v272_v6 = vpop.f32.mrf.mxu0 }
 0x2c2   :  { %v324_v8 = vmul.f32 0.35355338, %v272_v6 }
 0x2c3   :  { %v1338_v9 = vpop.f32.mrf.mxu0 }
 0x2c4   :  { %v340_v10 = vsel %vm338_vm5, -1e+10, %v324_v8 }
 0x2c5   :  { %v275_v11 = vpop.f32.mrf.mxu0  ;;  %v318_v12 = vpop.f32.mrf.mxu1  ;;  %v342_v13 = vsel %vm231_vm2, %v340_v10, -inf }
 0x2c6   :  { %v325_v14 = vmul.f32 0.35355338, %v318_v12  ;;  %343 = vmax.xlane.f32.xlu0 %v342_v13 }
 0x2c7   :  { %v1339_v16 = vpop.f32.mrf.mxu0  ;;  %v1344_v17 = vpop.f32.mrf.mxu1 }
 0x2c8   :  { %v341_v18 = vsel %vm339_vm6, -1e+10, %v325_v14 }
 0x2c9   :  { %v321_v19 = vpop.f32.mrf.mxu1  ;;  %v345_v20 = vsel %vm231_vm2, %v341_v18, -inf }
 0x2ca   :  { %346 = vmax.xlane.f32.xlu1 %v345_v20 }
 0x2cb   :  { %v1345_v21 = vpop.f32.mrf.mxu1 }
 0x2db   :  { %417 = vrot.lane.b32.xlu1 %v1646_v48, %s1511_s10 }
 0x2df   :  { %468 = vrot.lane.b32.xlu1 %v1642_v43, %s1512_s18 }
 0x34f   :  { %v344_v22 = vpop.xlane.xlu0 %343 }
 0x350   :  { %v348_v23 = vsub.f32 %v340_v10, %v344_v22 }
 0x352   :  { %v350_v24 = vmul.f32 1.442695, %v348_v23 }
 0x353   :  { %v347_v25 = vpop.xlane.xlu1 %346 }
 0x354   :  { %1476 = vpow2.f32 %v350_v24  ;;  %v349_v26 = vsub.f32 %v341_v18, %v347_v25 }
 0x356   :  { %v352_v27 = vmul.f32 1.442695, %v349_v26 }
 0x357   :  { %v418_v28 = vpop.permute.xlu1 %417 }
 0x358   :  { %1478 = vpow2.f32 %v352_v27  ;;  %v423_v29 = vsel %vm372_vm7, %v418_v28, 0 }
 0x359   :  { %1353 = vmatpush3.bf16.msra.mxu1 %v423_v29 }
 0x35a   :  { %1364 = vmatprep.subr.bf16.mxu1 %v1508_v15 }
 0x35b   :  { %v469_v34 = vpop.permute.xlu1 %468 }
 0x35c   :  { %v474_v44 = vsel %vm231_vm2, %v469_v34, 0 }
 0x361   :  { %v1477_v30 = vpop.eup %1476 }
 0x362   :  { %v354_v31 = vsel %vm231_vm2, %v1477_v30, 0.0 }
 0x363   :  { %355 = vadd.xlane.f32.xlu0 %v354_v31 }
 0x365   :  { %v1479_v32 = vpop.eup %1478 }
 0x366   :  { %v357_v33 = vsel %vm231_vm2, %v1479_v32, 0.0 }
 0x367   :  { %358 = vadd.xlane.f32.xlu1 %v357_v33 }
 0x378   :  { %519 = vrot.lane.b32.xlu1 %v1646_v48, %s1512_s18 }
 0x379   :  { %367 = vrot.lane.b32.xlu0 %v1642_v43, %s1511_s10 }
 0x37c   :  { %517 = vrot.lane.b32.xlu1 %v1661_v58, %s1512_s18 }
 0x37d   :  { %466 = vrot.lane.b32.xlu0 %v1655_v54, %s1512_s18 }
 0x3ec   :  { %v356_v35 = vpop.xlane.xlu0 %355 }
 0x3ed   :  { %1480 = vrcp.f32 %v356_v35 }
 0x3f0   :  { %v359_v36 = vpop.xlane.xlu1 %358  ;;  %v368_v37 = vpop.permute.xlu0 %367 }
 0x3f1   :  { %1482 = vrcp.f32 %v359_v36  ;;  %v374_v38 = vsel %vm372_vm7, %v368_v37, 0 }
 0x3f2   :  { %1347 = vmatpush3.bf16.msra.mxu0 %v374_v38 }
 0x3f3   :  { %1358 = vmatprep.subr.bf16.mxu0 %v1508_v15 }
 0x3f4   :  { %v520_v46 = vpop.permute.xlu1 %519  ;;  %v467_v50 = vpop.permute.xlu0 %466 }
 0x3f5   :  { %v525_v49 = vsel %vm231_vm2, %v520_v46, 0 }
 0x3f8   :  { %v518_v51 = vpop.permute.xlu1 %517 }
 0x3fa   :  { %v1481_v39 = vpop.eup %1480 }
 0x3fb   :  { %v362_v40 = vmul.f32 %v1481_v39, %v1477_v30 }
 0x3fd   :  { %v364_v41 = vpack.c.bf16 %v362_v40, %v362_v40 }
 0x3fe   :  { %v1483_v42 = vpop.eup %1482 }
 0x3ff   :  { %1349 = vmatmul.mubr.msk.bf16.vlgmr.msra.gmra.mxu0 %vm231_vm2, %v364_v41  ;;  %v363_v45 = vmul.f32 %v1483_v42, %v1479_v32 }
 0x400   :  { %1359 = vmatpush3.bf16.xpose.msra.mxu0 %v474_v44  ;;  %1360 = vmatprep.mubr.msk.bf16.mxu0 %vm1509_vm1, %v1508_v15 }
 0x401   :  { %v365_v47 = vpack.c.bf16 %v363_v45, %v363_v45  ;;  %1370 = vmatprep.subr.bf16.mxu0 %v1508_v15 }
 0x403   :  { %1355 = vmatmul.mubr.msk.bf16.vlgmr.msra.gmra.mxu1 %vm231_vm2, %v365_v47 }
 0x404   :  { %1365 = vmatpush3.bf16.xpose.msra.mxu1 %v525_v49  ;;  %1366 = vmatprep.mubr.msk.bf16.mxu1 %vm1509_vm1, %v1508_v15 }
 0x405   :  { %1376 = vmatprep.subr.bf16.mxu1 %v1508_v15 }
 0x407   :  { %1361 = vmatmul.mubr.msk.bf16.vlgmr.msra.gmra.mxu0 %vm231_vm2, %v467_v50 }
 0x408   :  { %1372 = vmatprep.mubr.msk.bf16.mxu0 %vm1509_vm1, %v1508_v15 }
 0x40b   :  { %1367 = vmatmul.mubr.msk.bf16.vlgmr.msra.gmra.mxu1 %vm231_vm2, %v518_v51 }
 0x40c   :  { %1378 = vmatprep.mubr.msk.bf16.mxu1 %vm1509_vm1, %v1508_v15 }
 0x4bf   :  { %v1713_v52 = vpop.f32.mrf.mxu0 }
 0x4c1   :  { %v1350_v53 = vpop.f32.mrf.mxu0 }
 0x4c3   :  { %v413_v55 = vpop.f32.mrf.mxu0  ;;  %v1715_v56 = vpop.f32.mrf.mxu1 }
 0x4c5   :  { %v1351_v57 = vpop.f32.mrf.mxu0  ;;  %v1356_v59 = vpop.f32.mrf.mxu1 }
 0x4c7   :  { %v462_v60 = vpop.f32.mrf.mxu1  ;;  %v510_v61 = vpop.f32.mrf.mxu0 }
 0x4c8   :  { %v567_v62 = vmul.f32 0.35355338, %v510_v61 }
 0x4c9   :  { %v1357_v63 = vpop.f32.mrf.mxu1  ;;  %v1362_v2 = vpop.f32.mrf.mxu0 }
 0x4ca   :  { %v569_v3 = vsel %vm338_vm5, -1e+10, %v567_v62 }
 0x4cb   :  { %v513_v5 = vpop.f32.mrf.mxu0  ;;  %v561_v6 = vpop.f32.mrf.mxu1  ;;  %v571_v8 = vsel %vm231_vm2, %v569_v3, -inf }
 0x4cc   :  { %v568_v9 = vmul.f32 0.35355338, %v561_v6  ;;  %572 = vmax.xlane.f32.xlu0 %v571_v8 }
 0x4cd   :  { %v1363_v10 = vpop.f32.mrf.mxu0  ;;  %v1368_v11 = vpop.f32.mrf.mxu1 }
 0x4ce   :  { %v570_v12 = vsel %vm339_vm6, -1e+10, %v568_v9 }
 0x4cf   :  { %v564_v13 = vpop.f32.mrf.mxu1  ;;  %v574_v14 = vsel %vm231_vm2, %v570_v12, -inf }
 0x4d0   :  { %575 = vmax.xlane.f32.xlu1 %v574_v14 }
 0x4d1   :  { %v1369_v16 = vpop.f32.mrf.mxu1 }
 0x4e1   :  { %643 = vrot.lane.b32.xlu1 %v1646_v48, %s1513_s19 }
 0x4e5   :  { %693 = vrot.lane.b32.xlu1 %v1642_v43, %s1514_s20 }
 0x4e9   :  { %743 = vrot.lane.b32.xlu1 %v1646_v48, %s1514_s20 }
 0x4ed   :  { %741 = vrot.lane.b32.xlu1 %v1661_v58, %s1514_s20 }
 0x555   :  { %v573_v17 = vpop.xlane.xlu0 %572 }
 0x556   :  { %v577_v18 = vsub.f32 %v569_v3, %v573_v17 }
 0x558   :  { %v579_v19 = vmul.f32 1.442695, %v577_v18 }
 0x559   :  { %v576_v20 = vpop.xlane.xlu1 %575 }
 0x55a   :  { %1484 = vpow2.f32 %v579_v19  ;;  %v578_v21 = vsub.f32 %v570_v12, %v576_v20 }
 0x55c   :  { %v581_v22 = vmul.f32 1.442695, %v578_v21 }
 0x55d   :  { %v644_v23 = vpop.permute.xlu1 %643 }
 0x55e   :  { %1486 = vpow2.f32 %v581_v22  ;;  %v649_v24 = vsel %vm372_vm7, %v644_v23, 0 }
 0x55f   :  { %1377 = vmatpush3.bf16.msra.mxu1 %v649_v24 }
 0x560   :  { %1388 = vmatprep.subr.bf16.mxu1 %v1508_v15 }
 0x561   :  { %v694_v34 = vpop.permute.xlu1 %693 }
 0x562   :  { %v699_v38 = vsel %vm231_vm2, %v694_v34, 0 }
 0x565   :  { %v744_v40 = vpop.permute.xlu1 %743 }
 0x566   :  { %v749_v42 = vsel %vm231_vm2, %v744_v40, 0 }
 0x567   :  { %v1485_v25 = vpop.eup %1484 }
 0x568   :  { %v583_v26 = vsel %vm231_vm2, %v1485_v25, 0.0 }
 0x569   :  { %584 = vadd.xlane.f32.xlu0 %v583_v26  ;;  %v742_v45 = vpop.permute.xlu1 %741 }
 0x56b   :  { %v1487_v27 = vpop.eup %1486 }
 0x56c   :  { %v586_v28 = vsel %vm231_vm2, %v1487_v27, 0.0 }
 0x56d   :  { %587 = vadd.xlane.f32.xlu0 %v586_v28 }
 0x583   :  { %595 = vrot.lane.b32.xlu0 %v1642_v43, %s1513_s19 }
 0x587   :  { %691 = vrot.lane.b32.xlu0 %v1655_v54, %s1514_s20 }
 0x5f2   :  { %v585_v29 = vpop.xlane.xlu0 %584 }
 0x5f3   :  { %1488 = vrcp.f32 %v585_v29 }
 0x5f6   :  { %v588_v30 = vpop.xlane.xlu0 %587 }
 0x5f7   :  { %1490 = vrcp.f32 %v588_v30 }
 0x5fa   :  { %v596_v31 = vpop.permute.xlu0 %595 }
 0x5fb   :  { %v601_v32 = vsel %vm372_vm7, %v596_v31, 0 }
 0x5fc   :  { %1371 = vmatpush3.bf16.msra.mxu0 %v601_v32 }
 0x5fd   :  { %1382 = vmatprep.subr.bf16.mxu0 %v1508_v15 }
 0x5fe   :  { %v692_v44 = vpop.permute.xlu0 %691 }
 0x600   :  { %v1489_v33 = vpop.eup %1488 }
 0x601   :  { %v591_v35 = vmul.f32 %v1489_v33, %v1485_v25 }
 0x603   :  { %v593_v36 = vpack.c.bf16 %v591_v35, %v591_v35 }
 0x604   :  { %v1491_v37 = vpop.eup %1490 }
 0x605   :  { %1373 = vmatmul.mubr.msk.bf16.vlgmr.msra.gmra.mxu0 %vm231_vm2, %v593_v36  ;;  %v592_v39 = vmul.f32 %v1491_v37, %v1487_v27 }
 0x606   :  { %1383 = vmatpush3.bf16.xpose.msra.mxu0 %v699_v38  ;;  %1384 = vmatprep.mubr.msk.bf16.mxu0 %vm1509_vm1, %v1508_v15 }
 0x607   :  { %v594_v41 = vpack.c.bf16 %v592_v39, %v592_v39  ;;  %1394 = vmatprep.subr.bf16.mxu0 %v1508_v15 }
 0x609   :  { %1379 = vmatmul.mubr.msk.bf16.vlgmr.msra.gmra.mxu1 %vm231_vm2, %v594_v41 }
 0x60a   :  { %1389 = vmatpush3.bf16.xpose.msra.mxu1 %v749_v42  ;;  %1390 = vmatprep.mubr.msk.bf16.mxu1 %vm1509_vm1, %v1508_v15 }
 0x60b   :  { %1400 = vmatprep.subr.bf16.mxu1 %v1508_v15 }
 0x60d   :  { %1385 = vmatmul.mubr.msk.bf16.vlgmr.msra.gmra.mxu0 %vm231_vm2, %v692_v44 }
 0x60e   :  { %1396 = vmatprep.mubr.msk.bf16.mxu0 %vm1509_vm1, %v1508_v15 }
 0x611   :  { %1391 = vmatmul.mubr.msk.bf16.vlgmr.msra.gmra.mxu1 %vm231_vm2, %v742_v45 }
 0x612   :  { %1402 = vmatprep.mubr.msk.bf16.mxu1 %vm1509_vm1, %v1508_v15 }
 0x6c5   :  { %v1751_v46 = vpop.f32.mrf.mxu0 }
 0x6c7   :  { %v1374_v47 = vpop.f32.mrf.mxu0 }
 0x6c9   :  { %v640_v49 = vpop.f32.mrf.mxu0  ;;  %v1753_v50 = vpop.f32.mrf.mxu1 }
 0x6ca   :  { %v1451_v51 = vpack.i.bf16 %v1753_v50, %v1751_v46 }
 0x6cb   :  { %v1375_v53 = vpop.f32.mrf.mxu0  ;;  %v1380_v55 = vpop.f32.mrf.mxu1 }
 0x6cd   :  { %v688_v57 = vpop.f32.mrf.mxu1  ;;  %v735_v59 = vpop.f32.mrf.mxu0 }
 0x6ce   :  { %v791_v60 = vmul.f32 0.35355338, %v735_v59 }
 0x6cf   :  { %v1381_v61 = vpop.f32.mrf.mxu1  ;;  %v1386_v62 = vpop.f32.mrf.mxu0 }
 0x6d0   :  { %v793_v63 = vsel %vm338_vm5, -1e+10, %v791_v60 }
 0x6d1   :  { %v738_v2 = vpop.f32.mrf.mxu0  ;;  %v785_v3 = vpop.f32.mrf.mxu1  ;;  %v795_v5 = vsel %vm231_vm2, %v793_v63, -inf }
 0x6d2   :  { %v792_v6 = vmul.f32 0.35355338, %v785_v3  ;;  %796 = vmax.xlane.f32.xlu0 %v795_v5 }
 0x6d3   :  { %v1387_v8 = vpop.f32.mrf.mxu0  ;;  %v1392_v9 = vpop.f32.mrf.mxu1 }
 0x6d4   :  { %v794_v10 = vsel %vm339_vm6, -1e+10, %v792_v6 }
 0x6d5   :  { %v788_v11 = vpop.f32.mrf.mxu1  ;;  %v798_v12 = vsel %vm231_vm2, %v794_v10, -inf }
 0x6d6   :  { %799 = vmax.xlane.f32.xlu1 %v798_v12 }
 0x6d7   :  { %v1393_v13 = vpop.f32.mrf.mxu1 }
 0x6e7   :  { %867 = vrot.lane.b32.xlu1 %v1646_v48, %s1515_s0 }
 0x6eb   :  { %917 = vrot.lane.b32.xlu1 %v1642_v43, %s1516_s21 }
 0x6ef   :  { %967 = vrot.lane.b32.xlu1 %v1646_v48, %s1516_s21 }
 0x6f3   :  { %965 = vrot.lane.b32.xlu1 %v1661_v58, %s1516_s21 }
 0x75b   :  { %v797_v14 = vpop.xlane.xlu0 %796 }
 0x75c   :  { %v801_v16 = vsub.f32 %v793_v63, %v797_v14 }
 0x75e   :  { %v803_v17 = vmul.f32 1.442695, %v801_v16 }
 0x75f   :  { %v800_v18 = vpop.xlane.xlu1 %799 }
 0x760   :  { %1492 = vpow2.f32 %v803_v17  ;;  %v802_v19 = vsub.f32 %v794_v10, %v800_v18 }
 0x762   :  { %v805_v20 = vmul.f32 1.442695, %v802_v19 }
 0x763   :  { %v868_v21 = vpop.permute.xlu1 %867 }
 0x764   :  { %1494 = vpow2.f32 %v805_v20  ;;  %v873_v22 = vsel %vm372_vm7, %v868_v21, 0 }
 0x765   :  { %1401 = vmatpush3.bf16.msra.mxu1 %v873_v22 }
 0x766   :  { %1412 = vmatprep.subr.bf16.mxu1 %v1508_v15 }
 0x767   :  { %v918_v31 = vpop.permute.xlu1 %917 }
 0x768   :  { %v923_v35 = vsel %vm231_vm2, %v918_v31, 0 }
 0x76b   :  { %v968_v36 = vpop.permute.xlu1 %967 }
 0x76c   :  { %v973_v38 = vsel %vm231_vm2, %v968_v36, 0 }
 0x76d   :  { %v1493_v23 = vpop.eup %1492 }
 0x76e   :  { %v807_v24 = vsel %vm231_vm2, %v1493_v23, 0.0 }
 0x76f   :  { %808 = vadd.xlane.f32.xlu0 %v807_v24  ;;  %v966_v40 = vpop.permute.xlu1 %965 }
 0x771   :  { %v1495_v25 = vpop.eup %1494 }
 0x772   :  { %v810_v58 = vsel %vm231_vm2, %v1495_v25, 0.0 }
 0x773   :  { %811 = vadd.xlane.f32.xlu0 %v810_v58 }
 0x789   :  { %819 = vrot.lane.b32.xlu0 %v1642_v43, %s1515_s0 }
 0x78d   :  { %915 = vrot.lane.b32.xlu0 %v1655_v54, %s1516_s21 }
 0x7f8   :  { %v809_v26 = vpop.xlane.xlu0 %808 }
 0x7f9   :  { %1496 = vrcp.f32 %v809_v26 }
 0x7fc   :  { %v812_v27 = vpop.xlane.xlu0 %811 }
 0x7fd   :  { %1498 = vrcp.f32 %v812_v27 }
 0x800   :  { %v820_v28 = vpop.permute.xlu0 %819 }
 0x801   :  { %v825_v29 = vsel %vm372_vm7, %v820_v28, 0  ;;  %v1470_v28 = vld [vmem:[%s1845_s8 + $0x8] sm:$0xff]  }
 0x802   :  { %1395 = vmatpush3.bf16.msra.mxu0 %v825_v29  ;;  %v1471_v29 = vld [vmem:[%s1845_s8] sm:$0xff]  }
 0x803   :  { %1406 = vmatprep.subr.bf16.mxu0 %v1508_v15 }
 0x804   :  { %v916_v39 = vpop.permute.xlu0 %915 }
 0x806   :  { %v1497_v30 = vpop.eup %1496 }
 0x807   :  { %v815_v32 = vmul.f32 %v1497_v30, %v1493_v23 }
 0x809   :  { %v817_v33 = vpack.c.bf16 %v815_v32, %v815_v32 }
 0x80a   :  { %v1499_v34 = vpop.eup %1498 }
 0x80b   :  { %1397 = vmatmul.mubr.msk.bf16.vlgmr.msra.gmra.mxu0 %vm231_vm2, %v817_v33  ;;  %v816_v54 = vmul.f32 %v1499_v34, %v1495_v25 }
 0x80c   :  { %1407 = vmatpush3.bf16.xpose.msra.mxu0 %v923_v35  ;;  %1408 = vmatprep.mubr.msk.bf16.mxu0 %vm1509_vm1, %v1508_v15 }
 0x80d   :  { %v818_v37 = vpack.c.bf16 %v816_v54, %v816_v54  ;;  %1418 = vmatprep.subr.bf16.mxu0 %v1508_v15 }
 0x80f   :  { %1403 = vmatmul.mubr.msk.bf16.vlgmr.msra.gmra.mxu1 %vm231_vm2, %v818_v37 }
 0x810   :  { %1413 = vmatpush3.bf16.xpose.msra.mxu1 %v973_v38  ;;  %1414 = vmatprep.mubr.msk.bf16.mxu1 %vm1509_vm1, %v1508_v15 }
 0x811   :  { %1424 = vmatprep.subr.bf16.mxu1 %v1508_v15 }
 0x813   :  { %1409 = vmatmul.mubr.msk.bf16.vlgmr.msra.gmra.mxu0 %vm231_vm2, %v916_v39 }
 0x814   :  { %1420 = vmatprep.mubr.msk.bf16.mxu0 %vm1509_vm1, %v1508_v15 }
 0x817   :  { %1415 = vmatmul.mubr.msk.bf16.vlgmr.msra.gmra.mxu1 %vm231_vm2, %v966_v40 }
 0x818   :  { %1426 = vmatprep.mubr.msk.bf16.mxu1 %vm1509_vm1, %v1508_v15 }
 0x8cb   :  { %v861_v41 = vpop.f32.mrf.mxu0 }
 0x8cd   :  { %v1398_v42 = vpop.f32.mrf.mxu0 }
 0x8cf   :  { %v864_v44 = vpop.f32.mrf.mxu0  ;;  %v909_v45 = vpop.f32.mrf.mxu1 }
 0x8d0   :  { %v1456_v4 = vpack.i.bf16 %v909_v45, %v861_v41 }
 0x8d1   :  { %v1399_v47 = vpop.f32.mrf.mxu0  ;;  %v1404_v49 = vpop.f32.mrf.mxu1 }
 0x8d3   :  { %v912_v53 = vpop.f32.mrf.mxu1  ;;  %v959_v55 = vpop.f32.mrf.mxu0 }
 0x8d4   :  { %v1015_v57 = vmul.f32 0.35355338, %v959_v55 }
 0x8d5   :  { %v1405_v59 = vpop.f32.mrf.mxu1  ;;  %v1410_v60 = vpop.f32.mrf.mxu0 }
 0x8d6   :  { %v1017_v61 = vsel %vm338_vm5, -1e+10, %v1015_v57 }
 0x8d7   :  { %v962_v62 = vpop.f32.mrf.mxu0  ;;  %v1009_v63 = vpop.f32.mrf.mxu1  ;;  %v1019_v2 = vsel %vm231_vm2, %v1017_v61, -inf }
 0x8d8   :  { %v1016_v3 = vmul.f32 0.35355338, %v1009_v63  ;;  %1020 = vmax.xlane.f32.xlu0 %v1019_v2  ;;  %v1273_v62 = vld [vmem:[%s1846_s9] ss:$0 sm:$0xff] }
 0x8d9   :  { %v1411_v5 = vpop.f32.mrf.mxu0  ;;  %v1416_v6 = vpop.f32.mrf.mxu1 }
 0x8da   :  { %v1018_v8 = vsel %vm339_vm6, -1e+10, %v1016_v3 }
 0x8db   :  { %v1012_v9 = vpop.f32.mrf.mxu1  ;;  %v1022_v10 = vsel %vm231_vm2, %v1018_v8, -inf }
 0x8dc   :  { %1023 = vmax.xlane.f32.xlu1 %v1022_v10 }
 0x8dd   :  { %v1417_v11 = vpop.f32.mrf.mxu1 }
 0x8ed   :  { %1091 = vrot.lane.b32.xlu1 %v1646_v48, %s1517_s22 }
 0x8f1   :  { %1452 = vrot.lane.b32.xlu1 %v1451_v51, %s1518_s23 }
 0x8f5   :  { %1457 = vrot.lane.b32.xlu1 %v1456_v4, %s1519_s24 }
 0x961   :  { %v1021_v12 = vpop.xlane.xlu0 %1020 }
 0x962   :  { %v1025_v13 = vsub.f32 %v1017_v61, %v1021_v12 }
 0x964   :  { %v1027_v7 = vmul.f32 1.442695, %v1025_v13 }
 0x965   :  { %v1024_v14 = vpop.xlane.xlu1 %1023 }
 0x966   :  { %1500 = vpow2.f32 %v1027_v7  ;;  %v1026_v16 = vsub.f32 %v1018_v8, %v1024_v14 }
 0x968   :  { %v1029_v17 = vmul.f32 1.442695, %v1026_v16 }
 0x969   :  { %v1092_v18 = vpop.permute.xlu1 %1091 }
 0x96a   :  { %1502 = vpow2.f32 %v1029_v17  ;;  %v1097_v19 = vsel %vm372_vm7, %v1092_v18, 0 }
 0x96b   :  { %1425 = vmatpush3.bf16.msra.mxu1 %v1097_v19 }
 0x96d   :  { %v1453_v38 = vpop.permute.xlu1 %1452 }
 0x96e   :  { %v1455_v40 = vunpack.i.h.bf16 %v1453_v38 }
 0x970   :  { %v1164_v45 = vsel %vm231_vm2, %v1715_v56, %v1455_v40 }
 0x971   :  { %v1458_v39 = vpop.permute.xlu1 %1457 }
 0x972   :  { %v1460_v41 = vunpack.i.h.bf16 %v1458_v39  ;;  %v1459_v42 = vunpack.i.l.bf16 %v1458_v39 }
 0x973   :  { %v1501_v48 = vpop.eup %1500 }
 0x974   :  { %v1031_v20 = vsel %vm231_vm2, %v1501_v48, 0.0  ;;  %v1167_v55 = vsel %vm1165_vm8, %v1164_v45, %v1460_v41 }
 0x975   :  { %1032 = vadd.xlane.f32.xlu0 %v1031_v20 }
 0x977   :  { %v1503_v46 = vpop.eup %1502 }
 0x978   :  { %v1034_v50 = vsel %vm231_vm2, %v1503_v46, 0.0 }
 0x979   :  { %1035 = vadd.xlane.f32.xlu0 %v1034_v50 }
 0x98f   :  { %1043 = vrot.lane.b32.xlu0 %v1642_v43, %s1517_s22 }
 0x9fe   :  { %v1033_v51 = vpop.xlane.xlu0 %1032 }
 0x9ff   :  { %1504 = vrcp.f32 %v1033_v51 }
 0xa02   :  { %v1036_v21 = vpop.xlane.xlu0 %1035 }
 0xa03   :  { %1506 = vrcp.f32 %v1036_v21 }
 0xa06   :  { %v1044_v22 = vpop.permute.xlu0 %1043 }
 0xa07   :  { %v1049_v23 = vsel %vm372_vm7, %v1044_v22, 0 }
 0xa08   :  { %1419 = vmatpush3.bf16.msra.mxu0 %v1049_v23 }
 0xa09   :  { %1430 = vmatprep.subr.bf16.mxu0 %v1508_v15 }
 0xa0c   :  { %v1505_v24 = vpop.eup %1504 }
 0xa0d   :  { %v1039_v25 = vmul.f32 %v1505_v24, %v1501_v48 }
 0xa0f   :  { %v1041_v58 = vpack.c.bf16 %v1039_v25, %v1039_v25 }
 0xa10   :  { %v1507_v26 = vpop.eup %1506 }
 0xa11   :  { %1421 = vmatmul.mubr.msk.bf16.vlgmr.msra.gmra.mxu0 %vm231_vm2, %v1041_v58  ;;  %v1040_v27 = vmul.f32 %v1507_v26, %v1503_v46 }
 0xa12   :  { %1434 = vmatprep.mubr.msk.bf16.mxu0 %vm1509_vm1, %v1508_v15  ;;  %1431 = vmatpush3.bf16.msra.mxu0 %v1470_v28 }
 0xa13   :  { %v1042_v43 = vpack.c.bf16 %v1040_v27, %v1040_v27  ;;  %1432 = vmatprep.subr.bf16.mxu0 %v1508_v15  ;;  %v1454_v15 = vunpack.i.l.bf16 %v1453_v38 }
 0xa15   :  { %1427 = vmatmul.mubr.msk.bf16.vlgmr.msra.gmra.mxu1 %vm231_vm2, %v1042_v43  ;;  %v1163_v47 = vsel %vm231_vm2, %v1713_v52, %v1454_v15 }
 0xa16   :  { %1433 = vmatpush3.bf16.msra.mxu0 %v1471_v29  ;;  %v1166_v57 = vsel %vm1165_vm8, %v1163_v47, %v1459_v42 }
 0xad1   :  { %v1085_v30 = vpop.f32.mrf.mxu0 }
 0xad3   :  { %v1422_v31 = vpop.f32.mrf.mxu0 }
 0xad5   :  { %v1088_v32 = vpop.f32.mrf.mxu0  ;;  %v1133_v33 = vpop.f32.mrf.mxu1 }
 0xad6   :  { %v1461_v34 = vpack.i.bf16 %v1133_v33, %v1085_v30 }
 0xad7   :  { %v1423_v35 = vpop.f32.mrf.mxu0  ;;  %v1428_v54 = vpop.f32.mrf.mxu1 }
 0xad8   :  { %1462 = vrot.lane.b32.xlu0 %v1461_v34, %s1520_s29 }
 0xad9   :  { %v1136_v36 = vpop.f32.mrf.mxu1 }
 0xadb   :  { %v1429_v37 = vpop.f32.mrf.mxu1 }
 0xb4a   :  { %v1463_v44 = vpop.permute.xlu0 %1462 }
 0xb4b   :  { %v1465_v49 = vunpack.i.h.bf16 %v1463_v44  ;;  %v1464_v53 = vunpack.i.l.bf16 %v1463_v44 }
 0xb4d   :  { %v1170_v59 = vsel %vm1168_vm9, %v1167_v55, %v1465_v49  ;;  %v1169_v60 = vsel %vm1168_vm9, %v1166_v57, %v1464_v53 }
 0xb4e   :  { %v1171_v61 = vpack.c.bf16 %v1170_v59, %v1169_v60 }
 0xb50   :  { %1435 = vmatmul.mubr.msk.bf16.vlgmr.msra.gmra.mxu0 %vm47_vm0, %v1171_v61 }
 0xc10   :  { %v1232_v63 = vpop.f32.mrf.mxu0 }
 0xc11   :  { %v1233_v2 = vadd.f32 %v1273_v62, %v1232_v63 }
 0xc12   :  { %v1436_v3 = vpop.f32.mrf.mxu0 }
 0xc13   :  { %v1239_v56 = vadd.f32 %v1233_v2, %v1584_v0 }
 0xc14   :  { %v1235_v5 = vpop.f32.mrf.mxu0 }
 0xc15   :  { %1241 = vst.msk [vmem:[%s1847_s11] sm:$0xff] %vm47_vm0, %v1239_v56  ;;  %v1236_v52 = vadd.f32 %v1273_v62, %v1235_v5 }
 0xc16   :  { %v1437_v6 = vpop.f32.mrf.mxu0 }
 0xc17   :  { %v1240_v8 = vadd.f32 %v1236_v52, %v1589_v1 }
 0xc19   :  { %1242 = vst.msk [vmem:[%s1847_s11 + $0x8] sm:$0xff] %vm47_vm0, %v1240_v8 }

// kernel: tevc_forward.39
= control target key start
LH: loop header
LB: loop body
LE: loop exit
PB: predicated region body
PF: predicated region fallthrough
CT: control target
= control target key end

     0   :  { %v349_v1 = vmov 0.0   ;;  %vm350_vm0 = vmmov 0   ;;  %vm48_vm1 = vcmask 261120   ;;  %s429_s0 = inlined_call_operand.vmem [shape: f32[2,8,32], index: 0, kind: input, shape index: {}]   ;;  %s430_s1 = inlined_call_operand.vmem [shape: bf16[32,128], index: 1, kind: input, shape index: {}]   ;;  %s431_s2 = inlined_call_operand.vmem [shape: f32[1,128], index: 2, kind: input, shape index: {}]   ;;  %s432_s3 = inlined_call_operand.vmem [shape: bf16[128,128], index: 3, kind: input, shape index: {}]   ;;  %s433_s4 = inlined_call_operand.vmem [shape: f32[1,128], index: 4, kind: input, shape index: {}]   ;;  %s434_s5 = inlined_call_operand.hbm [shape: f32[2,8,128], index: 5, kind: output, shape index: {}]  }
   0x1   :  { %v309_v0 = vld [vmem:[%s430_s1 + $0x8] sm:$0xff]   ;;  %276 = vmatprep.subr.bf16.mxu0 %v349_v1  ;;  %v310_v2 = vld [vmem:[%s430_s1] sm:$0xff]   ;;  %284 = vmatprep.subr.bf16.mxu1 %v349_v1  ;;  %v311_v5 = vld [vmem:[%s432_s3 + $0x38] sm:$0xff]  }
   0x2   :  { %277 = vmatpush3.bf16.msra.mxu0 %v309_v0  ;;  %280 = vmatprep.mubr.msk.bf16.mxu0 %vm350_vm0, %v349_v1  ;;  %v22_v3 = vld [vmem:[%s429_s0] sm:$0xff]  ;;  %v23_v4 = vld [vmem:[%s429_s0 + $0x8] sm:$0xff]  ;;  %v312_v7 = vld [vmem:[%s432_s3 + $0x30] sm:$0xff]  }
   0x3   :  { %278 = vmatprep.subr.bf16.mxu0 %v349_v1  ;;  %300 = vmatprep.mubr.msk.bf16.mxu1 %vm350_vm0, %v349_v1  ;;  %v24_v6 = vpack.c.bf16 %v23_v4, %v22_v3  ;;  %v313_v8 = vld [vmem:[%s432_s3 + $0x28] sm:$0xff]  }
   0x4   :  { %285 = vmatpush3.bf16.msra.mxu1 %v311_v5 }
   0x5   :  { %286 = vmatprep.subr.bf16.mxu1 %v349_v1 }
   0x6   :  { %279 = vmatpush3.bf16.msra.mxu0 %v310_v2 }
   0x8   :  { %287 = vmatpush3.bf16.msra.mxu1 %v312_v7 }
   0x9   :  { %281 = vmatmul.mubr.msk.bf16.vlgmr.msra.gmra.mxu0 %vm48_vm1, %v24_v6  ;;  %288 = vmatprep.subr.bf16.mxu1 %v349_v1 }
   0xa   :  { %10 = vsyncpa [#allocation3], 0  ;;  %v314_v9 = vld [vmem:[%s432_s3 + $0x20] sm:$0xff]   ;;  %v315_v10 = vld [vmem:[%s432_s3 + $0x18] sm:$0xff]   ;;  %v208_v24 = vlaneseq }
   0xb   :  { %v316_v11 = vld [vmem:[%s432_s3 + $0x10] sm:$0xff]   ;;  %v317_v12 = vld [vmem:[%s432_s3 + $0x8] sm:$0xff]   ;;  %v318_v13 = vld [vmem:[%s432_s3] sm:$0xff]  }
   0xc   :  { %289 = vmatpush3.bf16.msra.mxu1 %v313_v8  ;;  %v251_v14 = vld [vmem:[%s431_s2] ss:$0 sm:$0xff]  ;;  %v209_v25 = vand.u32 127, %v208_v24  ;;  %s351_s2 = smov [#allocation2]  }
   0xd   :  { %290 = vmatprep.subr.bf16.mxu1 %v349_v1  ;;  %v255_v26 = vld [vmem:[%s433_s4] ss:$0 sm:$0xff]  ;;  %s240_s3 = sshll.u32 %s351_s2, 4  ;;  %s241_s3 = int_to_ptr.vmem [resolvable:$true] %s240_s3 }
   0xe   :  { %vm210_vm2 = vcmp.lt.s32.totalorder %v209_v25, 64  ;;  %s327_s4 = scalar_lea.vmem %s241_s3, 256  ;;  %p332_p1 = scmp.lt.s32.totalorder %s241_s3, %s241_s3 }
   0xf   :  { %p328_p0 = scmp.ne.s32.totalorder %s241_s3, %s327_s4  ;;  %p333_p2 = scmp.lt.s32.totalorder %s327_s4, %s327_s4 }
  0x10   :  { %291 = vmatpush3.bf16.msra.mxu1 %v314_v9 }
  0x11   :  { %292 = vmatprep.subr.bf16.mxu1 %v349_v1  ;;  %p334_p3 = por %p333_p2, %p332_p1 }
  0x13   :  { %p335_p4 = pnand %p334_p3, %p328_p0 }
  0x14   :  { %293 = vmatpush3.bf16.msra.mxu1 %v315_v10 }
  0x15   :  { %294 = vmatprep.subr.bf16.mxu1 %v349_v1 }
  0x18   :  { %295 = vmatpush3.bf16.msra.mxu1 %v316_v11 }
  0x19   :  { %296 = vmatprep.subr.bf16.mxu1 %v349_v1 }
  0x1c   :  { %297 = vmatpush3.bf16.msra.mxu1 %v317_v12 }
  0x1d   :  { %298 = vmatprep.subr.bf16.mxu1 %v349_v1 }
  0x20   :  { %299 = vmatpush3.bf16.msra.mxu1 %v318_v13 }
  0xc9   :  { %v86_v15 = vpop.f32.mrf.mxu0 }
  0xca   :  { %v87_v17 = vadd.f32 %v251_v14, %v86_v15 }
  0xcb   :  { %v282_v16 = vpop.f32.mrf.mxu0 }
  0xcc   :  { %v93_v21 = vmax.f32 %v87_v17, 0.0 }
  0xcd   :  { %v89_v18 = vpop.f32.mrf.mxu0 }
  0xce   :  { %v90_v19 = vadd.f32 %v251_v14, %v89_v18 }
  0xcf   :  { %v283_v20 = vpop.f32.mrf.mxu0 }
  0xd0   :  { %v94_v22 = vmax.f32 %v90_v19, 0.0 }
  0xd2   :  { %v95_v23 = vpack.c.bf16 %v94_v22, %v93_v21 }
  0xd4   :  { %301 = vmatmul.mubr.bf16.vlgmr.msra.gmra.mxu1 %v95_v23 }
 0x194   :  { %v201_v27 = vpop.f32.mrf.mxu1 }
 0x195   :  { %v202_v28 = vadd.f32 %v255_v26, %v201_v27 }
 0x196   :  { %v302_v29 = vpop.f32.mrf.mxu1 }
 0x197   :  { %v211_v30 = vsel %vm210_vm2, %v202_v28, -1e+30 }
 0x198   :  { %213 = vmax.xlane.f32.xlu0 %v211_v30  ;;  %v204_v31 = vpop.f32.mrf.mxu1 }
 0x199   :  { %v205_v32 = vadd.f32 %v255_v26, %v204_v31 }
 0x19a   :  { %v303_v33 = vpop.f32.mrf.mxu1 }
 0x19b   :  { %v212_v34 = vsel %vm210_vm2, %v205_v32, -1e+30 }
 0x19c   :  { %215 = vmax.xlane.f32.xlu0 %v212_v34 }
 0x221   :  { %v214_v35 = vpop.xlane.xlu0 %213 }
 0x222   :  { %v217_v36 = vsub.f32 %v211_v30, %v214_v35 }
 0x224   :  { %v219_v37 = vmul.f32 1.442695, %v217_v36 }
 0x225   :  { %v216_v38 = vpop.xlane.xlu0 %215 }
 0x226   :  { %v218_v39 = vsub.f32 %v212_v34, %v216_v38  ;;  %319 = vpow2.f32 %v219_v37 }
 0x228   :  { %v221_v40 = vmul.f32 1.442695, %v218_v39 }
 0x22a   :  { %321 = vpow2.f32 %v221_v40 }
 0x233   :  { %v320_v41 = vpop.eup %319 }
 0x234   :  { %223 = vadd.xlane.f32.xlu1 %v320_v41 }
 0x237   :  { %v322_v42 = vpop.eup %321 }
 0x238   :  { %225 = vadd.xlane.f32.xlu1 %v322_v42 }
 0x2bd   :  { %v224_v43 = vpop.xlane.xlu1 %223 }
 0x2be   :  { %323 = vlog2.f32 %v224_v43 }
 0x2c1   :  { %v226_v44 = vpop.xlane.xlu1 %225 }
 0x2c2   :  { %325 = vlog2.f32 %v226_v44 }
 0x2cb   :  { %v324_v45 = vpop.eup %323 }
 0x2cc   :  { %v228_v46 = vmul.f32 0.6931472, %v324_v45 }
 0x2ce   :  { %v231_v47 = vsub.f32 %v217_v36, %v228_v46 }
 0x2cf   :  { %v326_v48 = vpop.eup %325 }
 0x2d0   :  { %233 = vst [vmem:[#allocation2] sm:$0xff] %v231_v47  ;;  %v230_v49 = vmul.f32 0.6931472, %v326_v48 }
 0x2d2   :  { %v232_v50 = vsub.f32 %v218_v39, %v230_v49 }
 0x2d4   :  { %234 = vst [vmem:[#allocation2 + $0x8] sm:$0xff] %v232_v50 }
 0x2d5   :  { %338 = shalt.err (!%p335_p4)
}
 0x2d6   :  { %s352_s19 = smov 128   ;;  %s353_s20 = smov 8  }
 0x2d7   :  { %246 = dma.vmem_to_hbm [thread:$0]  %s241_s3, 256, %s434_s5, [#allocation3], %s352_s19, %s352_s19, %s353_s20  }
 0x2d8   :  { %347 = dma.done.wait [#allocation3], 256  }
 0x2d9   :  { %348 = vsyncadd [#allocation3], 4294967040 }
 0x2da   :  { %250 = vsyncpa [#allocation3], 1 }

</bundles_post_ra>
